<compile_context>
chip_gen: v6e
topology: v6e:2x2x1
jax: 0.10.0
libtpu: 0.0.40
codegen_flags: <defaults>
</compile_context>

<pallas_src>
import functools

import jax
import jax.numpy as jnp
import numpy as np
from jax import lax
from jax.experimental import pallas as pl
from jax.experimental.pallas import tpu as pltpu


def _coattention_kernel(ex_ref, q_ref, we_ref, wgc_ref, wgr_ref,
                        wf1a_ref, wf1b_ref, wf2a_ref, wf2b_ref,
                        out1_ref, out2_ref,
                        mext_scr, m_scr, l_scr, acc_scr,
                        *, mxu_dtype=None):
    """Grid = (batch, hw-column-tile); the tile axis is a reduction ('arbitrary')."""
    j = pl.program_id(1)
    nj = pl.num_programs(1)
    f32 = jnp.float32

    def mx(x):  # optional bf16 cast for the big HW-contraction matmuls
        return x if mxu_dtype is None else x.astype(mxu_dtype)

    ex = ex_ref[0]                       # [C, HW]  exemplar_flat (this batch)
    qt = q_ref[0]                        # [C, T]   query_flat column tile

    # ---- per-batch init (j == 0): M^T = (We @ ex)^T, reset flash state -------
    @pl.when(j == 0)
    def _init():
        # mexT[i, o] = sum_c ex[c, i] * We[o, c]   -> [HW, C]  (== exemplar_corr)
        mext = lax.dot_general(ex, we_ref[...], (((0,), (1,)), ((), ())),
                               preferred_element_type=f32)
        mext_scr[...] = mext.astype(mext_scr.dtype)
        m_scr[...] = jnp.full_like(m_scr, -jnp.inf)
        l_scr[...] = jnp.zeros_like(l_scr)
        acc_scr[...] = jnp.zeros_like(acc_scr)

    # ---- attention scores for this column tile: A[:, tile] = M^T @ q_tile ----
    a = jnp.dot(mext_scr[...], mx(qt), preferred_element_type=f32)    # [HW, T]

    # ---- column-softmax branch (exact per tile, independent of other tiles) --
    col_max = jnp.max(a, axis=0, keepdims=True)                       # [1, T]
    e_col = jnp.exp(a - col_max)
    inv_csum = pl.reciprocal(jnp.sum(e_col, axis=0, keepdims=True), approx=False)
    a1 = e_col * inv_csum                      # softmax(A, dim=1) columns of this tile
    query_att = jnp.dot(mx(ex), mx(a1), preferred_element_type=f32)   # [C, T]

    # gate: 1x1 conv C->1 + sigmoid, as a cross-sublane reduce (off the MXU)
    mask2 = jax.nn.sigmoid(
        jnp.sum(query_att * wgc_ref[...], axis=0, keepdims=True))     # [1, T]
    att2 = query_att * mask2
    out2 = (jnp.dot(wf2a_ref[...], att2, preferred_element_type=f32) +
            jnp.dot(wf2b_ref[...], qt, preferred_element_type=f32))
    out2_ref[0] = out2.astype(out2_ref.dtype)

    # ---- row-softmax branch: flash-style accumulation over column tiles ------
    row_max = jnp.max(a, axis=1, keepdims=True)                       # [HW, 1]
    m_new = jnp.maximum(m_scr[...], row_max)
    alpha = jnp.exp(m_scr[...] - m_new)                               # [HW, 1]
    p = jnp.exp(a - m_new)                                            # [HW, T]
    l_scr[...] = alpha * l_scr[...] + jnp.sum(p, axis=1, keepdims=True)
    # acc[i, c] += sum_j p[i, j] * q[c, j]   (unnormalized exemplar_att^T)
    acc_scr[...] = alpha * acc_scr[...] + lax.dot_general(
        mx(p), mx(qt), (((1,), (1,)), ((), ())), preferred_element_type=f32)
    m_scr[...] = m_new

    # ---- finalize exemplar_att branch on the last column tile ----------------
    @pl.when(j == nj - 1)
    def _finalize():
        inv_l = pl.reciprocal(l_scr[...], approx=False)               # [HW, 1]
        ex_att = acc_scr[...] * inv_l                                 # [HW, C] = exemplar_att^T
        mask1 = jax.nn.sigmoid(
            jnp.sum(ex_att * wgr_ref[...], axis=1, keepdims=True))    # [HW, 1]
        att1 = ex_att * mask1                                         # [HW, C]
        out1 = lax.dot_general(wf1a_ref[...], att1, (((1,), (1,)), ((), ())),
                               preferred_element_type=f32)            # [C, HW]
        out1 = out1 + jnp.dot(wf1b_ref[...], ex, preferred_element_type=f32)
        out1_ref[0] = out1.astype(out1_ref.dtype)


def _pick_tile_hw(hw, max_tile=512):
    """Largest lane-aligned (multiple of 128) tile <= max_tile that divides HW."""
    if hw <= max_tile:
        return hw
    if hw % 128 != 0:
        # TODO(synk): pad HW to a multiple of 128 and mask the padded columns in
        # the row-softmax instead of falling back to a single full-width tile.
        return hw
    t = (max_tile // 128) * 128
    while hw % t != 0:
        t -= 128
    return t


def coattention(input_1, input_2, w_e, w_gate, w_f1, w_f2,
                *, tile_hw=None, mxu_dtype=None):
    """input_1, input_2: [N, C, H, W]; w_e: [C, C]; w_gate: [1, C]; w_f*: [C, 2C]."""
    n, c, h, w = input_1.shape
    hw = h * w
    ex = input_1.reshape(n, c, hw)
    q = input_2.reshape(n, c, hw)

    t = _pick_tile_hw(hw) if tile_hw is None else int(tile_hw)
    assert hw % t == 0, f"tile_hw={t} must divide H*W={hw}"
    n_j = hw // t

    # Pre-split / pre-orient the tiny weights so the kernel never slices a
    # [C, 2C] tensor mid lane-tile (copy-free MXU operands).
    w_gate_col = w_gate.reshape(c, 1)
    w_gate_row = w_gate.reshape(1, c)
    wf1a, wf1b = w_f1[:, :c], w_f1[:, c:]
    wf2a, wf2b = w_f2[:, :c], w_f2[:, c:]

    mex_dtype = jnp.float32 if mxu_dtype is None else mxu_dtype

    # Explicit VMEM budget: double-buffered in/out blocks + weights + scratch +
    # in-kernel [HW, T] temporaries, with 2x headroom.  (On v7x — 64 MiB physical
    # VMEM — keep tile_hw <= ~512 and the budget under ~48 MiB.)
    itm = 4
    raw_vmem = (2 * 2 * (c * hw + c * t) * itm                # ex/q/out1/out2 blocks
                + 2 * (5 * c * c + 2 * c) * itm               # weights
                + hw * c * jnp.dtype(mex_dtype).itemsize      # (We@ex)^T scratch
                + (hw * c + 2 * hw * 128) * itm               # acc + lane-padded m/l
                + 4 * hw * t * itm)                           # a / e_col / a1 / p temps
    vmem_limit = int(max(32 * 2**20, min(96 * 2**20, 2 * raw_vmem)))

    flops = int(n * (6 * c * hw * hw + 10 * c * c * hw))
    cost = pl.CostEstimate(
        flops=flops,
        transcendentals=int(2 * n * hw * hw + 2 * n * hw),
        bytes_accessed=int(4 * n * c * hw * 4 + (5 * c * c + 2 * c) * 4))

    batch_full = pl.BlockSpec((1, c, hw), lambda b, j: (b, 0, 0))
    batch_tile = pl.BlockSpec((1, c, t), lambda b, j: (b, 0, j))

    def wspec(shape):
        return pl.BlockSpec(shape, lambda b, j: (0, 0))

    kernel = functools.partial(_coattention_kernel, mxu_dtype=mxu_dtype)

    out1, out2 = pl.pallas_call(
        kernel,
        out_shape=(jax.ShapeDtypeStruct((n, c, hw), input_1.dtype),
                   jax.ShapeDtypeStruct((n, c, hw), input_2.dtype)),
        grid_spec=pltpu.PrefetchScalarGridSpec(
            num_scalar_prefetch=0,
            grid=(n, n_j),
            in_specs=[batch_full, batch_tile,
                      wspec((c, c)), wspec((c, 1)), wspec((1, c)),
                      wspec((c, c)), wspec((c, c)),
                      wspec((c, c)), wspec((c, c))],
            out_specs=[batch_full, batch_tile],
            scratch_shapes=[
                pltpu.VMEM((hw, c), mex_dtype),     # (We @ ex)^T, per batch element
                pltpu.VMEM((hw, 1), jnp.float32),   # running row max
                pltpu.VMEM((hw, 1), jnp.float32),   # running row sum
                pltpu.VMEM((hw, c), jnp.float32),   # running exemplar_att^T (unnorm.)
            ]),
        compiler_params=pltpu.CompilerParams(
            dimension_semantics=("parallel", "arbitrary"),
            vmem_limit_bytes=vmem_limit),
        cost_estimate=cost,
    )(ex, q, w_e, w_gate_col, w_gate_row, wf1a, wf1b, wf2a, wf2b)

    return out1.reshape(n, c, h, w), out2.reshape(n, c, h, w)


def coattention_reference(input_1, input_2, w_e, w_gate, w_f1, w_f2):
    """Pure-JAX transcription of the PyTorch forward (simple final_conv)."""
    n, c, h, w = input_1.shape
    hw = h * w
    ex = input_1.reshape(n, c, hw)
    q = input_2.reshape(n, c, hw)
    ex_t = jnp.transpose(ex, (0, 2, 1))                       # [N, HW, C]
    ex_corr = ex_t @ w_e.T                                    # linear_e
    A = ex_corr @ q                                           # [N, HW, HW]
    A1 = jax.nn.softmax(A, axis=1)
    B = jax.nn.softmax(jnp.transpose(A, (0, 2, 1)), axis=1)
    query_att = ex @ A1                                       # [N, C, HW]
    exemplar_att = q @ B                                      # [N, C, HW]
    in1_att = exemplar_att.reshape(n, c, h, w)
    in2_att = query_att.reshape(n, c, h, w)
    m1 = jax.nn.sigmoid(jnp.einsum('oc,nchw->nohw', w_gate, in1_att))
    m2 = jax.nn.sigmoid(jnp.einsum('oc,nchw->nohw', w_gate, in2_att))
    in1_att = in1_att * m1
    in2_att = in2_att * m2
    cat1 = jnp.concatenate([in1_att, input_1], axis=1)
    cat2 = jnp.concatenate([in2_att, input_2], axis=1)
    o1 = jnp.einsum('oc,nchw->nohw', w_f1, cat1)
    o2 = jnp.einsum('oc,nchw->nohw', w_f2, cat2)
    return o1, o2


if __name__ == "__main__":
    N, C, H, W = 2, 8, 16, 16          # HW = 256 (lane-aligned)

    key = jax.random.PRNGKey(0)
    k1, k2, k3, k4, k5, k6 = jax.random.split(key, 6)

    input_1 = jax.random.normal(k1, (N, C, H, W), dtype=jnp.float32)
    input_2 = jax.random.normal(k2, (N, C, H, W), dtype=jnp.float32)

    # linear_e.weight: [C, C] (deterministic uniform); Conv2d 1x1 weights ~ N(0, 0.01)
    bound = 1.0 / np.sqrt(C)
    w_e = jax.random.uniform(k3, (C, C), minval=-bound, maxval=bound,
                             dtype=jnp.float32)
    w_gate = 0.01 * jax.random.normal(k4, (1, C), dtype=jnp.float32)
    w_f1 = 0.01 * jax.random.normal(k5, (C, 2 * C), dtype=jnp.float32)
    w_f2 = 0.01 * jax.random.normal(k6, (C, 2 * C), dtype=jnp.float32)

    # tile_hw=128 -> 2 column tiles, exercising the flash-style row-softmax path.
    out1, out2 = coattention(input_1, input_2, w_e, w_gate, w_f1, w_f2,
                             tile_hw=128)
    jax.block_until_ready((out1, out2))

    ref1, ref2 = coattention_reference(input_1, input_2, w_e, w_gate, w_f1, w_f2)
    np.testing.assert_allclose(np.asarray(out1), np.asarray(ref1),
                               rtol=1e-5, atol=1e-5)
    np.testing.assert_allclose(np.asarray(out2), np.asarray(ref2),
                               rtol=1e-5, atol=1e-5)

    print("KERNEL_OK")
</pallas_src>

<mosaic_0001>
module attributes {stable_mosaic.version = 11 : i64} {
  func.func @_coattention_kernel(%arg0: i32, %arg1: i32, %arg2: memref<1x8x256xf32, #tpu.memory_space<vmem>>, %arg3: memref<1x8x128xf32, #tpu.memory_space<vmem>>, %arg4: memref<8x8xf32, #tpu.memory_space<vmem>>, %arg5: memref<8x1xf32, #tpu.memory_space<vmem>>, %arg6: memref<1x8xf32, #tpu.memory_space<vmem>>, %arg7: memref<8x8xf32, #tpu.memory_space<vmem>>, %arg8: memref<8x8xf32, #tpu.memory_space<vmem>>, %arg9: memref<8x8xf32, #tpu.memory_space<vmem>>, %arg10: memref<8x8xf32, #tpu.memory_space<vmem>>, %arg11: memref<1x8x256xf32, #tpu.memory_space<vmem>>, %arg12: memref<1x8x128xf32, #tpu.memory_space<vmem>>, %arg13: memref<256x8xf32, #tpu.memory_space<vmem>>, %arg14: memref<256x1xf32, #tpu.memory_space<vmem>>, %arg15: memref<256x1xf32, #tpu.memory_space<vmem>>, %arg16: memref<256x8xf32, #tpu.memory_space<vmem>>) attributes {dimension_semantics = [#tpu.dimension_semantics<parallel>, #tpu.dimension_semantics<arbitrary>], iteration_bounds = array<i64: 2, 2>, scalar_prefetch = 0 : i64, scratch_operands = 4 : i64, tpu.core_type = #tpu.core_type<tc>, window_params = [{transform_indices = @transform_0, window_bounds = array<i64: 1, 8, 256>}, {transform_indices = @transform_1, window_bounds = array<i64: 1, 8, 128>}, {pipeline_mode = #tpu.pipeline_mode<synchronous>, transform_indices = @transform_2, window_bounds = array<i64: 8, 8>}, {pipeline_mode = #tpu.pipeline_mode<synchronous>, transform_indices = @transform_3, window_bounds = array<i64: 8, 1>}, {pipeline_mode = #tpu.pipeline_mode<synchronous>, transform_indices = @transform_4, window_bounds = array<i64: 1, 8>}, {pipeline_mode = #tpu.pipeline_mode<synchronous>, transform_indices = @transform_5, window_bounds = array<i64: 8, 8>}, {pipeline_mode = #tpu.pipeline_mode<synchronous>, transform_indices = @transform_6, window_bounds = array<i64: 8, 8>}, {pipeline_mode = #tpu.pipeline_mode<synchronous>, transform_indices = @transform_7, window_bounds = array<i64: 8, 8>}, {pipeline_mode = #tpu.pipeline_mode<synchronous>, transform_indices = @transform_8, window_bounds = array<i64: 8, 8>}, {transform_indices = @transform_9, window_bounds = array<i64: 1, 8, 256>}, {transform_indices = @transform_10, window_bounds = array<i64: 1, 8, 128>}]} {
    %c0 = arith.constant 0 : index
    %c0_0 = arith.constant 0 : index
    %c0_1 = arith.constant 0 : index
    %0 = vector.load %arg2[%c0, %c0_0, %c0_1] : memref<1x8x256xf32, #tpu.memory_space<vmem>>, vector<1x8x256xf32>
    %1 = vector.shape_cast %0 : vector<1x8x256xf32> to vector<8x256xf32>
    %c0_2 = arith.constant 0 : index
    %c0_3 = arith.constant 0 : index
    %c0_4 = arith.constant 0 : index
    %2 = vector.load %arg3[%c0_2, %c0_3, %c0_4] : memref<1x8x128xf32, #tpu.memory_space<vmem>>, vector<1x8x128xf32>
    %3 = vector.shape_cast %2 : vector<1x8x128xf32> to vector<8x128xf32>
    %c0_i32 = arith.constant 0 : i32
    %4 = arith.cmpi eq, %arg1, %c0_i32 : i32
    %5 = arith.extui %4 : i1 to i32
    %c0_i32_5 = arith.constant 0 : i32
    %6 = arith.cmpi ne, %5, %c0_i32_5 : i32
    scf.if %6 {
      %c0_42 = arith.constant 0 : index
      %c0_43 = arith.constant 0 : index
      %66 = vector.load %arg4[%c0_42, %c0_43] : memref<8x8xf32, #tpu.memory_space<vmem>>, vector<8x8xf32>
      %cst_44 = arith.constant dense<0.000000e+00> : vector<256x8xf32>
      %67 = tpu.matmul %1, %66, %cst_44 {dimension_numbers = #tpu.dot_dimension_numbers<[0], [1], [1], [0], [0, 1, 1, 0], [], []>} : vector<8x256xf32>, vector<8x8xf32>, vector<256x8xf32> -> vector<256x8xf32>
      %c0_45 = arith.constant 0 : index
      %c0_46 = arith.constant 0 : index
      %68 = vector.load %arg13[%c0_45, %c0_46] : memref<256x8xf32, #tpu.memory_space<vmem>>, vector<256x8xf32>
      tpu.vector_store %arg13[%c0_45, %c0_46], %67 {strides = array<i32>} : memref<256x8xf32, #tpu.memory_space<vmem>>, vector<256x8xf32>,
      %cst_47 = arith.constant 0xFF800000 : f32
      %69 = vector.broadcast %cst_47 : f32 to vector<256x1xf32>
      %c0_48 = arith.constant 0 : index
      %c0_49 = arith.constant 0 : index
      %70 = vector.load %arg14[%c0_48, %c0_49] : memref<256x1xf32, #tpu.memory_space<vmem>>, vector<256x1xf32>
      tpu.vector_store %arg14[%c0_48, %c0_49], %69 {strides = array<i32>} : memref<256x1xf32, #tpu.memory_space<vmem>>, vector<256x1xf32>,
      %cst_50 = arith.constant 0.000000e+00 : f32
      %71 = vector.broadcast %cst_50 : f32 to vector<256x1xf32>
      %c0_51 = arith.constant 0 : index
      %c0_52 = arith.constant 0 : index
      %72 = vector.load %arg15[%c0_51, %c0_52] : memref<256x1xf32, #tpu.memory_space<vmem>>, vector<256x1xf32>
      tpu.vector_store %arg15[%c0_51, %c0_52], %71 {strides = array<i32>} : memref<256x1xf32, #tpu.memory_space<vmem>>, vector<256x1xf32>,
      %cst_53 = arith.constant 0.000000e+00 : f32
      %73 = vector.broadcast %cst_53 : f32 to vector<256x8xf32>
      %c0_54 = arith.constant 0 : index
      %c0_55 = arith.constant 0 : index
      %74 = vector.load %arg16[%c0_54, %c0_55] : memref<256x8xf32, #tpu.memory_space<vmem>>, vector<256x8xf32>
      tpu.vector_store %arg16[%c0_54, %c0_55], %73 {strides = array<i32>} : memref<256x8xf32, #tpu.memory_space<vmem>>, vector<256x8xf32>,
    } else {
    }
    %c0_6 = arith.constant 0 : index
    %c0_7 = arith.constant 0 : index
    %7 = vector.load %arg13[%c0_6, %c0_7] : memref<256x8xf32, #tpu.memory_space<vmem>>, vector<256x8xf32>
    %cst = arith.constant dense<0.000000e+00> : vector<256x128xf32>
    %8 = tpu.matmul %7, %3, %cst {dimension_numbers = #tpu.dot_dimension_numbers<[1], [0], [0], [1], [0, 0, 1, 1], [], []>} : vector<256x8xf32>, vector<8x128xf32>, vector<256x128xf32> -> vector<256x128xf32>
    %cst_8 = arith.constant dense<0xFF800000> : vector<128xf32>
    %9 = vector.multi_reduction <maximumf>, %8, %cst_8 [0] : vector<256x128xf32> to vector<128xf32>
    %10 = vector.shape_cast %9 : vector<128xf32> to vector<1x128xf32>
    %11 = vector.broadcast %10 : vector<1x128xf32> to vector<256x128xf32>
    %12 = arith.subf %8, %11 : vector<256x128xf32>
    %13 = math.exp %12 : vector<256x128xf32>
    %cst_9 = arith.constant dense<0.000000e+00> : vector<128xf32>
    %14 = vector.multi_reduction <add>, %13, %cst_9 [0] : vector<256x128xf32> to vector<128xf32>
    %15 = vector.shape_cast %14 : vector<128xf32> to vector<1x128xf32>
    %16 = tpu.reciprocal %15 : vector<1x128xf32> -> vector<1x128xf32>
    %17 = vector.broadcast %16 : vector<1x128xf32> to vector<256x128xf32>
    %18 = arith.mulf %13, %17 : vector<256x128xf32>
    %cst_10 = arith.constant dense<0.000000e+00> : vector<8x128xf32>
    %19 = tpu.matmul %1, %18, %cst_10 {dimension_numbers = #tpu.dot_dimension_numbers<[1], [0], [0], [1], [0, 0, 1, 1], [], []>} : vector<8x256xf32>, vector<256x128xf32>, vector<8x128xf32> -> vector<8x128xf32>
    %c0_11 = arith.constant 0 : index
    %c0_12 = arith.constant 0 : index
    %20 = vector.load %arg5[%c0_11, %c0_12] : memref<8x1xf32, #tpu.memory_space<vmem>>, vector<8x1xf32>
    %21 = vector.broadcast %20 : vector<8x1xf32> to vector<8x128xf32>
    %22 = arith.mulf %19, %21 : vector<8x128xf32>
    %cst_13 = arith.constant dense<0.000000e+00> : vector<128xf32>
    %23 = vector.multi_reduction <add>, %22, %cst_13 [0] : vector<8x128xf32> to vector<128xf32>
    %24 = vector.shape_cast %23 : vector<128xf32> to vector<1x128xf32>
    %25 = arith.negf %24 : vector<1x128xf32>
    %26 = math.exp %25 : vector<1x128xf32>
    %cst_14 = arith.constant 1.000000e+00 : f32
    %27 = vector.broadcast %cst_14 : f32 to vector<1x128xf32>
    %28 = arith.addf %27, %26 : vector<1x128xf32>
    %29 = arith.divf %27, %28 : vector<1x128xf32>
    %30 = vector.broadcast %29 : vector<1x128xf32> to vector<8x128xf32>
    %31 = arith.mulf %19, %30 : vector<8x128xf32>
    %c0_15 = arith.constant 0 : index
    %c0_16 = arith.constant 0 : index
    %32 = vector.load %arg9[%c0_15, %c0_16] : memref<8x8xf32, #tpu.memory_space<vmem>>, vector<8x8xf32>
    %cst_17 = arith.constant dense<0.000000e+00> : vector<8x128xf32>
    %33 = tpu.matmul %32, %31, %cst_17 {dimension_numbers = #tpu.dot_dimension_numbers<[1], [0], [0], [1], [0, 0, 1, 1], [], []>} : vector<8x8xf32>, vector<8x128xf32>, vector<8x128xf32> -> vector<8x128xf32>
    %c0_18 = arith.constant 0 : index
    %c0_19 = arith.constant 0 : index
    %34 = vector.load %arg10[%c0_18, %c0_19] : memref<8x8xf32, #tpu.memory_space<vmem>>, vector<8x8xf32>
    %cst_20 = arith.constant dense<0.000000e+00> : vector<8x128xf32>
    %35 = tpu.matmul %34, %3, %cst_20 {dimension_numbers = #tpu.dot_dimension_numbers<[1], [0], [0], [1], [0, 0, 1, 1], [], []>} : vector<8x8xf32>, vector<8x128xf32>, vector<8x128xf32> -> vector<8x128xf32>
    %36 = arith.addf %33, %35 : vector<8x128xf32>
    %c0_21 = arith.constant 0 : index
    %c0_22 = arith.constant 0 : index
    %c0_23 = arith.constant 0 : index
    %37 = vector.load %arg12[%c0_21, %c0_22, %c0_23] : memref<1x8x128xf32, #tpu.memory_space<vmem>>, vector<1x8x128xf32>
    %38 = vector.shape_cast %37 : vector<1x8x128xf32> to vector<8x128xf32>
    %39 = vector.shape_cast %36 : vector<8x128xf32> to vector<1x8x128xf32>
    tpu.vector_store %arg12[%c0_21, %c0_22, %c0_23], %39 {strides = array<i32>} : memref<1x8x128xf32, #tpu.memory_space<vmem>>, vector<1x8x128xf32>,
    %cst_24 = arith.constant dense<0xFF800000> : vector<256xf32>
    %40 = vector.multi_reduction <maximumf>, %8, %cst_24 [1] : vector<256x128xf32> to vector<256xf32>
    %41 = vector.shape_cast %40 : vector<256xf32> to vector<256x1xf32>
    %c0_25 = arith.constant 0 : index
    %c0_26 = arith.constant 0 : index
    %42 = vector.load %arg14[%c0_25, %c0_26] : memref<256x1xf32, #tpu.memory_space<vmem>>, vector<256x1xf32>
    %43 = arith.maximumf %42, %41 : vector<256x1xf32>
    %c0_27 = arith.constant 0 : index
    %c0_28 = arith.constant 0 : index
    %44 = vector.load %arg14[%c0_27, %c0_28] : memref<256x1xf32, #tpu.memory_space<vmem>>, vector<256x1xf32>
    %45 = arith.subf %44, %43 : vector<256x1xf32>
    %46 = math.exp %45 : vector<256x1xf32>
    %47 = vector.broadcast %43 : vector<256x1xf32> to vector<256x128xf32>
    %48 = arith.subf %8, %47 : vector<256x128xf32>
    %49 = math.exp %48 : vector<256x128xf32>
    %c0_29 = arith.constant 0 : index
    %c0_30 = arith.constant 0 : index
    %50 = vector.load %arg15[%c0_29, %c0_30] : memref<256x1xf32, #tpu.memory_space<vmem>>, vector<256x1xf32>
    %51 = arith.mulf %46, %50 : vector<256x1xf32>
    %cst_31 = arith.constant dense<0.000000e+00> : vector<256xf32>
    %52 = vector.multi_reduction <add>, %49, %cst_31 [1] : vector<256x128xf32> to vector<256xf32>
    %53 = vector.shape_cast %52 : vector<256xf32> to vector<256x1xf32>
    %54 = arith.addf %51, %53 : vector<256x1xf32>
    %c0_32 = arith.constant 0 : index
    %c0_33 = arith.constant 0 : index
    %55 = vector.load %arg15[%c0_32, %c0_33] : memref<256x1xf32, #tpu.memory_space<vmem>>, vector<256x1xf32>
    tpu.vector_store %arg15[%c0_32, %c0_33], %54 {strides = array<i32>} : memref<256x1xf32, #tpu.memory_space<vmem>>, vector<256x1xf32>,
    %c0_34 = arith.constant 0 : index
    %c0_35 = arith.constant 0 : index
    %56 = vector.load %arg16[%c0_34, %c0_35] : memref<256x8xf32, #tpu.memory_space<vmem>>, vector<256x8xf32>
    %57 = vector.broadcast %46 : vector<256x1xf32> to vector<256x8xf32>
    %58 = arith.mulf %57, %56 : vector<256x8xf32>
    %cst_36 = arith.constant dense<0.000000e+00> : vector<256x8xf32>
    %59 = tpu.matmul %49, %3, %cst_36 {dimension_numbers = #tpu.dot_dimension_numbers<[1], [1], [0], [0], [0, 0, 1, 0], [], []>} : vector<256x128xf32>, vector<8x128xf32>, vector<256x8xf32> -> vector<256x8xf32>
    %60 = arith.addf %58, %59 : vector<256x8xf32>
    %c0_37 = arith.constant 0 : index
    %c0_38 = arith.constant 0 : index
    %61 = vector.load %arg16[%c0_37, %c0_38] : memref<256x8xf32, #tpu.memory_space<vmem>>, vector<256x8xf32>
    tpu.vector_store %arg16[%c0_37, %c0_38], %60 {strides = array<i32>} : memref<256x8xf32, #tpu.memory_space<vmem>>, vector<256x8xf32>,
    %c0_39 = arith.constant 0 : index
    %c0_40 = arith.constant 0 : index
    %62 = vector.load %arg14[%c0_39, %c0_40] : memref<256x1xf32, #tpu.memory_space<vmem>>, vector<256x1xf32>
    tpu.vector_store %arg14[%c0_39, %c0_40], %43 {strides = array<i32>} : memref<256x1xf32, #tpu.memory_space<vmem>>, vector<256x1xf32>,
    %c1_i32 = arith.constant 1 : i32
    %63 = arith.cmpi eq, %arg1, %c1_i32 : i32
    %64 = arith.extui %63 : i1 to i32
    %c0_i32_41 = arith.constant 0 : i32
    %65 = arith.cmpi ne, %64, %c0_i32_41 : i32
    scf.if %65 {
      %c0_42 = arith.constant 0 : index
      %c0_43 = arith.constant 0 : index
      %66 = vector.load %arg15[%c0_42, %c0_43] : memref<256x1xf32, #tpu.memory_space<vmem>>, vector<256x1xf32>
      %67 = tpu.reciprocal %66 : vector<256x1xf32> -> vector<256x1xf32>
      %c0_44 = arith.constant 0 : index
      %c0_45 = arith.constant 0 : index
      %68 = vector.load %arg16[%c0_44, %c0_45] : memref<256x8xf32, #tpu.memory_space<vmem>>, vector<256x8xf32>
      %69 = vector.broadcast %67 : vector<256x1xf32> to vector<256x8xf32>
      %70 = arith.mulf %68, %69 : vector<256x8xf32>
      %c0_46 = arith.constant 0 : index
      %c0_47 = arith.constant 0 : index
      %71 = vector.load %arg6[%c0_46, %c0_47] : memref<1x8xf32, #tpu.memory_space<vmem>>, vector<1x8xf32>
      %72 = vector.broadcast %71 : vector<1x8xf32> to vector<256x8xf32>
      %73 = arith.mulf %70, %72 : vector<256x8xf32>
      %cst_48 = arith.constant dense<0.000000e+00> : vector<256xf32>
      %74 = vector.multi_reduction <add>, %73, %cst_48 [1] : vector<256x8xf32> to vector<256xf32>
      %75 = vector.shape_cast %74 : vector<256xf32> to vector<256x1xf32>
      %76 = arith.negf %75 : vector<256x1xf32>
      %77 = math.exp %76 : vector<256x1xf32>
      %cst_49 = arith.constant 1.000000e+00 : f32
      %78 = vector.broadcast %cst_49 : f32 to vector<256x1xf32>
      %79 = arith.addf %78, %77 : vector<256x1xf32>
      %80 = arith.divf %78, %79 : vector<256x1xf32>
      %81 = vector.broadcast %80 : vector<256x1xf32> to vector<256x8xf32>
      %82 = arith.mulf %70, %81 : vector<256x8xf32>
      %c0_50 = arith.constant 0 : index
      %c0_51 = arith.constant 0 : index
      %83 = vector.load %arg7[%c0_50, %c0_51] : memref<8x8xf32, #tpu.memory_space<vmem>>, vector<8x8xf32>
      %cst_52 = arith.constant dense<0.000000e+00> : vector<8x256xf32>
      %84 = tpu.matmul %83, %82, %cst_52 {dimension_numbers = #tpu.dot_dimension_numbers<[1], [1], [0], [0], [0, 0, 1, 0], [], []>} : vector<8x8xf32>, vector<256x8xf32>, vector<8x256xf32> -> vector<8x256xf32>
      %c0_53 = arith.constant 0 : index
      %c0_54 = arith.constant 0 : index
      %85 = vector.load %arg8[%c0_53, %c0_54] : memref<8x8xf32, #tpu.memory_space<vmem>>, vector<8x8xf32>
      %cst_55 = arith.constant dense<0.000000e+00> : vector<8x256xf32>
      %86 = tpu.matmul %85, %1, %cst_55 {dimension_numbers = #tpu.dot_dimension_numbers<[1], [0], [0], [1], [0, 0, 1, 1], [], []>} : vector<8x8xf32>, vector<8x256xf32>, vector<8x256xf32> -> vector<8x256xf32>
      %87 = arith.addf %84, %86 : vector<8x256xf32>
      %c0_56 = arith.constant 0 : index
      %c0_57 = arith.constant 0 : index
      %c0_58 = arith.constant 0 : index
      %88 = vector.load %arg11[%c0_56, %c0_57, %c0_58] : memref<1x8x256xf32, #tpu.memory_space<vmem>>, vector<1x8x256xf32>
      %89 = vector.shape_cast %88 : vector<1x8x256xf32> to vector<8x256xf32>
      %90 = vector.shape_cast %87 : vector<8x256xf32> to vector<1x8x256xf32>
      tpu.vector_store %arg11[%c0_56, %c0_57, %c0_58], %90 {strides = array<i32>} : memref<1x8x256xf32, #tpu.memory_space<vmem>>, vector<1x8x256xf32>,
    } else {
    }
    return
  }
  func.func @transform_0(%arg0: i32, %arg1: i32) -> (i32, i32, i32) {
    %c0_i32 = arith.constant 0 : i32
    %c0_i32_0 = arith.constant 0 : i32
    %c0_i32_1 = arith.constant 0 : i32
    return %arg0, %c0_i32, %c0_i32_0 : i32, i32, i32
  }
  func.func @transform_1(%arg0: i32, %arg1: i32) -> (i32, i32, i32) {
    %c0_i32 = arith.constant 0 : i32
    %c0_i32_0 = arith.constant 0 : i32
    return %arg0, %c0_i32, %arg1 : i32, i32, i32
  }
  func.func @transform_2(%arg0: i32, %arg1: i32) -> (i32, i32) {
    %c0_i32 = arith.constant 0 : i32
    %c0_i32_0 = arith.constant 0 : i32
    %c0_i32_1 = arith.constant 0 : i32
    return %c0_i32, %c0_i32_0 : i32, i32
  }
  func.func @transform_3(%arg0: i32, %arg1: i32) -> (i32, i32) {
    %c0_i32 = arith.constant 0 : i32
    %c0_i32_0 = arith.constant 0 : i32
    %c0_i32_1 = arith.constant 0 : i32
    return %c0_i32, %c0_i32_0 : i32, i32
  }
  func.func @transform_4(%arg0: i32, %arg1: i32) -> (i32, i32) {
    %c0_i32 = arith.constant 0 : i32
    %c0_i32_0 = arith.constant 0 : i32
    %c0_i32_1 = arith.constant 0 : i32
    return %c0_i32, %c0_i32_0 : i32, i32
  }
  func.func @transform_5(%arg0: i32, %arg1: i32) -> (i32, i32) {
    %c0_i32 = arith.constant 0 : i32
    %c0_i32_0 = arith.constant 0 : i32
    %c0_i32_1 = arith.constant 0 : i32
    return %c0_i32, %c0_i32_0 : i32, i32
  }
  func.func @transform_6(%arg0: i32, %arg1: i32) -> (i32, i32) {
    %c0_i32 = arith.constant 0 : i32
    %c0_i32_0 = arith.constant 0 : i32
    %c0_i32_1 = arith.constant 0 : i32
    return %c0_i32, %c0_i32_0 : i32, i32
  }
  func.func @transform_7(%arg0: i32, %arg1: i32) -> (i32, i32) {
    %c0_i32 = arith.constant 0 : i32
    %c0_i32_0 = arith.constant 0 : i32
    %c0_i32_1 = arith.constant 0 : i32
    return %c0_i32, %c0_i32_0 : i32, i32
  }
  func.func @transform_8(%arg0: i32, %arg1: i32) -> (i32, i32) {
    %c0_i32 = arith.constant 0 : i32
    %c0_i32_0 = arith.constant 0 : i32
    %c0_i32_1 = arith.constant 0 : i32
    return %c0_i32, %c0_i32_0 : i32, i32
  }
  func.func @transform_9(%arg0: i32, %arg1: i32) -> (i32, i32, i32) {
    %c0_i32 = arith.constant 0 : i32
    %c0_i32_0 = arith.constant 0 : i32
    %c0_i32_1 = arith.constant 0 : i32
    return %arg0, %c0_i32, %c0_i32_0 : i32, i32, i32
  }
  func.func @transform_10(%arg0: i32, %arg1: i32) -> (i32, i32, i32) {
    %c0_i32 = arith.constant 0 : i32
    %c0_i32_0 = arith.constant 0 : i32
    return %arg0, %c0_i32, %arg1 : i32, i32, i32
  }
}

</mosaic_0001>

<bundles_post_ra>
// kernel: tpu_custom_call.1
= control target key start
LH: loop header
LB: loop body
LE: loop exit
PB: predicated region body
PF: predicated region fallthrough
CT: control target
= control target key end

     0   :  { %s7535_s0 = inlined_call_operand.hbm [shape: f32[2,8,256], index: 0, kind: input, shape index: {}]   ;;  %s7536_s1 = inlined_call_operand.hbm [shape: f32[2,8,256], index: 1, kind: input, shape index: {}]   ;;  %s7537_s2 = inlined_call_operand.vmem [shape: f32[8,8], index: 2, kind: input, shape index: {}]   ;;  %s7538_s3 = inlined_call_operand.vmem [shape: f32[8,1], index: 3, kind: input, shape index: {}]   ;;  %s7539_s4 = inlined_call_operand.vmem [shape: f32[1,8], index: 4, kind: input, shape index: {}]   ;;  %s7540_s5 = inlined_call_operand.vmem [shape: f32[8,8], index: 5, kind: input, shape index: {}]   ;;  %s7541_s6 = inlined_call_operand.hbm [shape: f32[8,8], index: 6, kind: input, shape index: {}]   ;;  %s7542_s7 = inlined_call_operand.hbm [shape: f32[8,8], index: 7, kind: input, shape index: {}]   ;;  %s7543_s8 = inlined_call_operand.hbm [shape: f32[8,8], index: 8, kind: input, shape index: {}]   ;;  %s7544_s9 = inlined_call_operand.hbm [shape: f32[2,8,256], index: 9, kind: output, shape index: {0}]   ;;  %s7545_s10 = inlined_call_operand.hbm [shape: f32[2,8,256], index: 10, kind: output, shape index: {1}]  }
   0x1   :  { %7643 = sst [smem:[#allocation94_spill]] %s7535_s0 }
   0x2   :  { %7644 = sst [smem:[#allocation95_spill]] %s7536_s1 }
   0x3   :  { %7645 = sst [smem:[#allocation96_spill]] %s7537_s2 }
   0x4   :  { %7646 = sst [smem:[#allocation97_spill]] %s7538_s3 }
   0x5   :  { %7647 = sst [smem:[#allocation98_spill]] %s7539_s4 }
   0x6   :  { %7648 = sst [smem:[#allocation99_spill]] %s7540_s5 }
   0x7   :  { %7649 = sst [smem:[#allocation100_spill]] %s7541_s6 }
   0x8   :  { %7650 = sst [smem:[#allocation101_spill]] %s7542_s7 }
   0x9   :  { %7651 = sst [smem:[#allocation102_spill]] %s7543_s8 }
   0xa   :  { %7652 = sst [smem:[#allocation103_spill]] %s7544_s9 }
   0xb   :  { %7653 = sst [smem:[#allocation104_spill]] %s7545_s10 }
   0xc   :  { %16 = vsyncpa [#allocation7], 0 }
   0xd   :  { %18 = vsyncpa [#allocation7 + $0x1], 0 }
   0xe   :  { %19 = vsyncpa [#allocation10], 0 }
   0xf   :  { %21 = vsyncpa [#allocation10 + $0x1], 0 }
  0x10   :  { %22 = vsyncpa [#allocation13], 0 }
  0x11   :  { %23 = vsyncpa [#allocation8], 0 }
  0x12   :  { %25 = vsyncpa [#allocation8 + $0x1], 0 }
  0x13   :  { %26 = vsyncpa [#allocation17], 0 }
  0x14   :  { %28 = vsyncpa [#allocation17 + $0x1], 0  ;;  %s5534_s13 = smov 0   ;;  %s5536_s14 = smov 0  }
  0x15   :  { %s5538_s15 = smov 0   ;;  %s5540_s16 = smov 0  }
  0x16   :  { %s5542_s17 = smov 0   ;;  %s5544_s18 = smov 0  }
  0x17   :  { %s5546_s19 = smov 0   ;;  %s5548_s20 = smov 0  }
  0x18   :  { %s5550_s21 = smov 0   ;;  %s5552_s22 = smov 0  }
  0x19   :  { %s5554_s23 = smov 0  }
  0x1a LB: > { %7654 = sst [smem:[#allocation24_spill]] %s5423_s13  ;;  %s5590_s24 = sadd.s32 4294967295, %s5463_s23   ;;  %s5463_s23 = sphi %s5554_s23, %s34_s23   ;;  %s5459_s22 = sphi %s5552_s22, %s7940_s22   ;;  %s5455_s21 = sphi %s5550_s21, %s7939_s21   ;;  %s5451_s20 = sphi %s5548_s20, %s7938_s20   ;;  %s5447_s19 = sphi %s5546_s19, %s7937_s19   ;;  %s5443_s18 = sphi %s5544_s18, %s7936_s18   ;;  %s5439_s17 = sphi %s5542_s17, %s7935_s17   ;;  %s5435_s16 = sphi %s5540_s16, %s7934_s16   ;;  %s5431_s15 = sphi %s5538_s15, %s7933_s15   ;;  %s5427_s14 = sphi %s5536_s14, %s7932_s14   ;;  %s5423_s13 = sphi %s5534_s13, %s7931_s13  }
  0x1b   : > { %7655 = sst [smem:[#allocation25_spill]] %s5435_s16  ;;  %p4123_p0 = scmp.ge.s32.totalorder %s5463_s23, 1 }
  0x1c   : > { %7656 = sst [smem:[#allocation26_spill]] %s5451_s20  ;;  %p7547_p1 = scmp.eq.s32.totalorder %s5590_s24, 0 }
  0x1d   : > { %p306_p2 = scmp.lt.s32.totalorder %s5463_s23, 5  ;;  %s5465_s26 = smov [#allocation11]  }
  0x1e   : > { %s331_s27 = sshll.u32 %s5465_s26, 4  ;;  %s5466_s28 = smov [#allocation12]   ;;  %s332_s27 = int_to_ptr.vmem [resolvable:$true] %s331_s27 }
  0x1f   : > { %p5595_p3 = pnand %p4123_p0, %p306_p2  ;;  %s342_s29 = sshll.u32 %s5466_s28, 4  ;;  %s343_s29 = int_to_ptr.vmem [resolvable:$true] %s342_s29 }
  0x20   : > { %s5467_s11 = smov [#allocation14]   ;;  %s5178_s26 = scalar_lea.vmem %s332_s27, 128 }
  0x21   : > { %s7657_s25 = scalar_select %p5595_p3, 1, 0 }
  0x22   : > { %p4643_p4 = pneg %p5595_p3  ;;  %s353_s12 = sshll.u32 %s5467_s11, 4  ;;  %s5607_s12 = int_to_ptr.vmem [resolvable:$true] %s353_s12 }
  0x23   : > { %p5179_p7 = scmp.ne.s32.totalorder %s332_s27, %s5178_s26  ;;  %p5186_p10 = scmp.lt.s32.totalorder %s332_s27, %s332_s27 }
  0x24   : > { %p5603_p5 = pnand %p4643_p4, %p7547_p1  ;;  %p5187_p11 = scmp.lt.s32.totalorder %s5178_s26, %s5178_s26 }
  0x26   : > { %p5169_p6 = pneg %p5603_p5  ;;  %p5188_p12 = por %p5187_p11, %p5186_p10 }
  0x28   : > { %p5181_p8 = pnand %p5179_p7, %p5169_p6 }
  0x2a   : > { %p5182_p9 = pneg %p5181_p8 }
  0x2c   : > { %p5189_p13 = pnand %p5188_p12, %p5182_p9 }
  0x2e   : > { %5192 = shalt.err (!%p5189_p13)
}
  0x2f   : > { %s7659_s6 = sld [smem:[#allocation100_spill]]  ;;  %s5204_s11 = scalar_lea.vmem %s343_s29, 128 }
  0x30   : > { %p5205_p0 = scmp.ne.s32.totalorder %s343_s29, %s5204_s11  ;;  %p5212_p7 = scmp.lt.s32.totalorder %s343_s29, %s343_s29 }
  0x31   : > { %p5213_p8 = scmp.lt.s32.totalorder %s5204_s11, %s5204_s11 }
  0x32   : > { %p5207_p2 = pnand %p5205_p0, %p5169_p6 }
  0x33   : > { %p5214_p1 = por %p5213_p8, %p5212_p7 }
  0x34   : > { %p5208_p4 = pneg %p5207_p2 }
  0x35   : > { %4646 = dma.hbm_to_vmem [thread:$0]  (!%p5603_p5), %s7659_s6, 128, %s332_s27, [#allocation10]  }
  0x36   : > { %p5215_p3 = pnand %p5214_p1, %p5208_p4 }
  0x38   : > { %5218 = shalt.err (!%p5215_p3)
}
  0x39   : > { %s7660_s7 = sld [smem:[#allocation101_spill]]  ;;  %s5230_s10 = scalar_lea.vmem %s5607_s12, 128 }
  0x3a   : > { %p5231_p9 = scmp.ne.s32.totalorder %s5607_s12, %s5230_s10  ;;  %p5238_p12 = scmp.lt.s32.totalorder %s5607_s12, %s5607_s12 }
  0x3b   : > { %p5239_p1 = scmp.lt.s32.totalorder %s5230_s10, %s5230_s10 }
  0x3c   : > { %p5233_p10 = pnand %p5231_p9, %p5169_p6 }
  0x3d   : > { %p5240_p3 = por %p5239_p1, %p5238_p12 }
  0x3e   : > { %p5234_p11 = pneg %p5233_p10 }
  0x3f   : > { %4649 = dma.hbm_to_vmem [thread:$0]  (!%p5603_p5), %s7660_s7, 128, %s343_s29, [#allocation13]  }
  0x40   : > { %p5241_p13 = pnand %p5240_p3, %p5234_p11 }
  0x42   : > { %5244 = shalt.err (!%p5241_p13)
}
  0x43   : > { %s7661_s8 = sld [smem:[#allocation102_spill]]  ;;  %s4122_s29 = sadd.s32 4294967294, %s5463_s23  }
  0x44   : > { %p60_p6 = scmp.ne.s32.totalorder %s5443_s18, %s5439_s17  ;;  %p7556_p0 = scmp.eq.s32.totalorder %s5463_s23, 0 }
  0x45   : > { %p66_p2 = scmp.ne.s32.totalorder %s5439_s17, %s5435_s16  ;;  %p7555_p4 = scmp.eq.s32.totalorder %s5590_s24, 3 }
  0x46   : > { %p62_p7 = por %p7556_p0, %p60_p6  ;;  %p5651_p8 = scmp.eq.s32.totalorder %s4122_s29, 3 }
  0x47   : > { %p7663_p9 = scmp.eq.s32.totalorder %s5590_s24, 0  ;;  %p7557_p12 = scmp.lt.s32.totalorder %s5463_s23, 4 }
  0x48   : > { %p5669_p11 = por %p5651_p8, %p66_p2  ;;  %s364_s9 = sand.u32 1, %s5443_s18  }
  0x49   : > { %4652 = dma.hbm_to_vmem [thread:$0]  (!%p5603_p5), %s7661_s8, 128, %s5607_s12, [#allocation13]  }
  0x4a   : > { %p5657_p10 = por %p7663_p9, %p66_p2  ;;  %p5663_p5 = por %p7555_p4, %p60_p6 }
  0x4b   : > { %s7667_s10 = scalar_select %p5669_p11, 1, 0 }
  0x4c   : > { %s7665_s12 = scalar_select %p5663_p5, 1, 0 }
  0x4d   : > { %7668 = sst [smem:[#allocation28_spill]] %s7667_s10  ;;  %s4287_s27 = sshll.u32 %s5459_s22, 8 }
  0x4e   : > { %7666 = sst [smem:[#allocation27_spill]] %s7665_s12  ;;  %s4128_s29 = sshll.u32 %s364_s9, 4 }
  0x4f   : > { %s7669_s0 = sld [smem:[#allocation94_spill]]  ;;  %s368_s7 = scalar_lea.vmem [#allocation6], %s4128_s29 }
  0x50   : > { %s376_s8 = sshll.u32 %s368_s7, 4  ;;  %p5681_p1 = pnand %p7557_p12, %p62_p7  ;;  %s377_s8 = int_to_ptr.vmem [resolvable:$true] %s376_s8 }
  0x51   : > { %s365_s12 = scalar_lea.sflag [#allocation7], %s364_s9  ;;  %s5258_s10 = scalar_lea.vmem %s377_s8, 256 }
  0x52   : > { %p5247_p3 = pneg %p5681_p1  ;;  %p5259_p13 = scmp.ne.s32.totalorder %s377_s8, %s5258_s10 }
  0x53   : > { %s5468_s20 = smov [#allocation6]  }
  0x54   : > { %p5261_p6 = pnand %p5259_p13, %p5247_p3  ;;  %s5263_s5 = sshll.u32 %s5468_s20, 4  ;;  %s5264_s5 = int_to_ptr.vmem [resolvable:$false] %s5263_s5 }
  0x55   : > { %s374_s6 = scalar_lea.hbm %s7669_s0, %s4287_s27  ;;  %s5265_s30 = scalar_lea.vmem %s5264_s5, 512 }
  0x56   : > { %p5262_p2 = pneg %p5261_p6  ;;  %p5266_p9 = scmp.lt.s32.totalorder %s377_s8, %s5264_s5 }
  0x57   : > { %p5267_p4 = scmp.lt.s32.totalorder %s5265_s30, %s5258_s10 }
  0x59   : > { %p5268_p0 = por %p5267_p4, %p5266_p9 }
  0x5b   : > { %p5269_p7 = pnand %p5268_p0, %p5262_p2 }
  0x5d   : > { %5272 = shalt.err (!%p5269_p7)
}
  0x5e   : > { %4656 = dma.hbm_to_vmem [thread:$0]  (!%p5681_p1), %s374_s6, 256, %s377_s8, %s365_s12  }
  0x5f   : > { %s43_s5 = sadd.s32 1, %s5455_s21  ;;  %s81_s7 = sadd.s32 1, %s5431_s15 }
  0x60   : > { %p44_p0 = scmp.ge.s32.totalorder %s43_s5, 2  ;;  %p88_p4 = scmp.ne.s32.totalorder %s5431_s15, %s5427_s14 }
  0x61   : > { %p94_p3 = scmp.ne.s32.totalorder %s5427_s14, %s5423_s13  ;;  %s383_s16 = sand.u32 1, %s5463_s23  }
  0x62   : > { %s7942_s5 = smov (%p44_p0, %s43_s5), 0  ;;  %s7672_s20 = sadd.s32 1, %s5459_s22 }
  0x63   : > { %7671 = sst [smem:[#allocation29_spill]] %s7942_s5  ;;  %s7944_s20 = smov (!%p44_p0, %s7672_s20), %s5459_s22 }
  0x64   : > { %s77_s28 = ssub.s32 %s5455_s21, %s7942_s5  ;;  %p7673_p13 = scmp.eq.s32.totalorder %s5463_s23, 0 }
  0x65   : > { %p48_p6 = scmp.ge.s32.totalorder %s7944_s20, 2  ;;  %p7675_p2 = scmp.eq.s32.totalorder %s5590_s24, 0 }
  0x66   : > { %p5705_p1 = por %p88_p4, %p7673_p13  ;;  %p7677_p7 = scmp.eq.s32.totalorder %s5590_s24, 3 }
  0x67   : > { %p5711_p9 = por %p94_p3, %p7675_p2  ;;  %p5723_p0 = por %p5651_p8, %p94_p3 }
  0x68   : > { %p5717_p12 = por %p7677_p7, %p88_p4  ;;  %s7946_s20 = smov (%p48_p6, %s7944_s20), 0 }
  0x69   : > { %s7680_s10 = scalar_select %p5723_p0, 1, 0 }
  0x6a   : > { %s7678_s12 = scalar_select %p5717_p12, 1, 0 }
  0x6b   : > { %7681 = sst [smem:[#allocation31_spill]] %s7680_s10  ;;  %s385_s9 = sand.u32 1, %s5431_s15  }
  0x6c   : > { %7679 = sst [smem:[#allocation30_spill]] %s7678_s12  ;;  %s50_s27 = ssub.s32 %s5459_s22, %s7946_s20 }
  0x6d   : > { %s4131_s29 = sshll.u32 %s385_s9, 3  ;;  %p51_p13 = scmp.eq.s32.totalorder %s50_s27, 0 }
  0x6e   : > { %s78_s30 = sor.u32 %s77_s28, %s50_s27  ;;  %s7682_s0 = sadd.s32 1, %s5443_s18 }
  0x6f   : > { %p79_p2 = scmp.eq.s32.totalorder %s78_s30, 0  ;;  %s4132_s11 = sshll.u32 %s5459_s22, 1 }
  0x70   : > { %s5735_s5 = scalar_select %p51_p13, %s5443_s18, %s7682_s0  }
  0x71   : > { %s5738_s13 = scalar_select %p79_p2, %s5431_s15, %s81_s7  }
  0x72   : > { %s387_s12 = scalar_lea.vmem [#allocation9], %s4131_s29  ;;  %s392_s10 = sadd.s32 %s5455_s21, %s4132_s11 }
  0x73   : > { %s396_s4 = sshll.u32 %s387_s12, 4  ;;  %s4133_s3 = sshll.u32 %s392_s10, 7  ;;  %s397_s4 = int_to_ptr.vmem [resolvable:$true] %s396_s4 }
  0x74   : > { %p7683_p8 = scmp.lt.s32.totalorder %s5463_s23, 4  ;;  %s7685_s1 = sld [smem:[#allocation95_spill]] }
  0x75   : > { %s384_s27 = scalar_lea.sflag [#allocation10], %s383_s16  ;;  %s5286_s7 = scalar_lea.vmem %s397_s4, 128 }
  0x76   : > { %p5746_p4 = pnand %p7683_p8, %p5705_p1  ;;  %p5287_p6 = scmp.ne.s32.totalorder %s397_s4, %s5286_s7 }
  0x77   : > { %s5469_s12 = smov [#allocation9]  }
  0x78   : > { %p5275_p3 = pneg %p5746_p4  ;;  %s5291_s10 = sshll.u32 %s5469_s12, 4  ;;  %s5292_s10 = int_to_ptr.vmem [resolvable:$false] %s5291_s10 }
  0x79   : > { %s5293_s6 = scalar_lea.vmem %s5292_s10, 256  ;;  %p5294_p1 = scmp.lt.s32.totalorder %s397_s4, %s5292_s10 }
  0x7a   : > { %s394_s0 = scalar_lea.hbm %s7685_s1, %s4133_s3  ;;  %p5289_p7 = pnand %p5287_p6, %p5275_p3 }
  0x7b   : > { %p5295_p2 = scmp.lt.s32.totalorder %s5293_s6, %s5286_s7 }
  0x7c   : > { %p5290_p13 = pneg %p5289_p7 }
  0x7d   : > { %p5296_p8 = por %p5295_p2, %p5294_p1 }
  0x7f   : > { %p5297_p0 = pnand %p5296_p8, %p5290_p13 }
  0x81   : > { %5300 = shalt.err (!%p5297_p0)
}
  0x82   : > { %4659 = dma.hbm_to_vmem [thread:$0]  (!%p5746_p4), %s394_s0, 128, %s397_s4, %s384_s27  }
  0x83   : > { %p7686_p11 = scmp.ne.s32.totalorder %s7657_s25, 0 }
  0x85   : > { %405 = sbr.rel (%p7686_p11) target bundleno = 2166 (0x876), region = 56 }
  0x8a   : > { %s5760_s3 = sand.u32 1, %s5439_s17  }
  0x8b   : > { %s4135_s16 = sshll.u32 %s5760_s3, 4  ;;  %s408_s29 = scalar_lea.sflag [#allocation7], %s5760_s3 }
  0x8c   : > { %s411_s30 = scalar_lea.vmem [#allocation6], %s4135_s16 }
  0x8d   : > { %5398 = dma.done.wait (%p5657_p10), %s408_s29, 256  }
  0x8e   : > { %5400 = vsyncadd (%p5657_p10), %s408_s29, 4294967040  ;;  %s416_s2 = sand.u32 1, %s5590_s24   ;;  %s418_s4 = sand.u32 1, %s5427_s14  }
  0x8f   : > { %s5772_s25 = sshll.u32 %s418_s4, 3  ;;  %s417_s11 = scalar_lea.sflag [#allocation10], %s416_s2 }
  0x90   : > { %s420_s9 = scalar_lea.vmem [#allocation9], %s5772_s25 }
  0x91   : > { %5402 = dma.done.wait (%p5711_p9), %s417_s11, 128  }
  0x92   : > { %5404 = vsyncadd (%p5711_p9), %s417_s11, 4294967168  ;;  %p7687_p11 = scmp.eq.s32.totalorder %s5590_s24, 0 }
  0x94   : > { %5406 = dma.done.wait (%p7687_p11), [#allocation10], 128   ;;  %p7688_p10 = pmov %p7687_p11 }
  0x96   : > { %5408 = vsyncadd (%p7688_p10), [#allocation10], 4294967168  ;;  %p7689_p0 = pmov %p7688_p10 }
  0x98   : > { %5410 = dma.done.wait (%p7689_p0), [#allocation13], 256   ;;  %p7690_p4 = pmov %p7689_p0 }
  0x99   : > { %v5787_v0 = vld [vmem:[%s411_s30] sm:$0xff]  ;;  %v5789_v1 = vld [vmem:[%s411_s30 + $0x8] sm:$0xff]  ;;  %s5793_s26 = scalar_lea.vmem [#allocation15], %s4135_s16  ;;  %s478_s8 = scalar_lea.vmem [#allocation16], %s5772_s25 }
  0x9a   : > { %5412 = vsyncadd (%p7690_p4), [#allocation13], 4294967040  ;;  %7691 = vst [vmem:[#allocation32_spill] sm:$0xff] %v5787_v0  ;;  %v5791_v2 = vld [vmem:[%s420_s9] sm:$0xff]  ;;  %p4142_p9 = scmp.ne.s32.totalorder %s5447_s19, 0 }
  0x9b   : > { %7692 = vst [vmem:[#allocation33_spill] sm:$0xff] %v5789_v1  ;;  %7693 = vst [vmem:[#allocation34_spill] sm:$0xff] %v5791_v2  ;;  %s7694_s27 = sld [smem:[#allocation96_spill]] (!%p4142_p9) }
  0x9c   : > { %485 = sbr.rel (%p4142_p9) target bundleno = 606 (0x25e), region = 80 }
  0xa1   : > { %487 = vxpose.xlu0.b32.start.end [1/1] (short) %v5787_v0, 128  ;;  %v486_v3 = vld [vmem:[%s7694_s27] sm:$0xff]  ;;  %vm551_vm0 = vcmask 64512   ;;  %v5470_v4 = vmov 0.0   ;;  %vm908_vm1 = vcmask 7168   ;;  %v5471_v37 = vmov -inf  }
  0xa2   : > { %4461 = vmatprep.subr.msk.mxu0 %vm551_vm0, %v486_v3  ;;  %973 = vst.msk [vmem:[#allocation5] sm:$0xff] %vm551_vm0, %v5470_v4  ;;  %974 = vst.msk [vmem:[#allocation5 + $0x8] sm:$0xff] %vm551_vm0, %v5470_v4  ;;  %4621 = vmatprep.subr.msk.mxu1 %vm551_vm0, %v486_v3 }
  0xa3   : > { %975 = vst.msk [vmem:[#allocation5 + $0x10] sm:$0xff] %vm551_vm0, %v5470_v4  ;;  %976 = vst.msk [vmem:[#allocation5 + $0x18] sm:$0xff] %vm551_vm0, %v5470_v4  ;;  %4462 = vmatpush3.xpose.msk.msra.mxu0 %vm551_vm0, %v486_v3  ;;  %4622 = vmatpush3.xpose.msk.msra.mxu1 %vm551_vm0, %v486_v3 }
  0xa4   : > { %977 = vst.msk [vmem:[#allocation5 + $0x20] sm:$0xff] %vm551_vm0, %v5470_v4  ;;  %978 = vst.msk [vmem:[#allocation5 + $0x28] sm:$0xff] %vm551_vm0, %v5470_v4 }
  0xa5   : > { %979 = vst.msk [vmem:[#allocation5 + $0x30] sm:$0xff] %vm551_vm0, %v5470_v4  ;;  %980 = vst.msk [vmem:[#allocation5 + $0x38] sm:$0xff] %vm551_vm0, %v5470_v4 }
  0xa6   : > { %981 = vst.msk [vmem:[#allocation5 + $0x40] sm:$0xff] %vm551_vm0, %v5470_v4  ;;  %982 = vst.msk [vmem:[#allocation5 + $0x48] sm:$0xff] %vm551_vm0, %v5470_v4 }
  0xa7   : > { %983 = vst.msk [vmem:[#allocation5 + $0x50] sm:$0xff] %vm551_vm0, %v5470_v4  ;;  %984 = vst.msk [vmem:[#allocation5 + $0x58] sm:$0xff] %vm551_vm0, %v5470_v4 }
  0xa8   : > { %985 = vst.msk [vmem:[#allocation5 + $0x60] sm:$0xff] %vm551_vm0, %v5470_v4  ;;  %986 = vst.msk [vmem:[#allocation5 + $0x68] sm:$0xff] %vm551_vm0, %v5470_v4 }
  0xa9   : > { %987 = vst.msk [vmem:[#allocation5 + $0x70] sm:$0xff] %vm551_vm0, %v5470_v4  ;;  %988 = vst.msk [vmem:[#allocation5 + $0x78] sm:$0xff] %vm551_vm0, %v5470_v4 }
  0xaa   : > { %989 = vst.msk [vmem:[#allocation5 + $0x80] sm:$0xff] %vm551_vm0, %v5470_v4  ;;  %990 = vst.msk [vmem:[#allocation5 + $0x88] sm:$0xff] %vm551_vm0, %v5470_v4 }
  0xab   : > { %991 = vst.msk [vmem:[#allocation5 + $0x90] sm:$0xff] %vm551_vm0, %v5470_v4  ;;  %992 = vst.msk [vmem:[#allocation5 + $0x98] sm:$0xff] %vm551_vm0, %v5470_v4 }
  0xac   : > { %993 = vst.msk [vmem:[#allocation5 + $0xa0] sm:$0xff] %vm551_vm0, %v5470_v4  ;;  %994 = vst.msk [vmem:[#allocation5 + $0xa8] sm:$0xff] %vm551_vm0, %v5470_v4 }
  0xad   : > { %995 = vst.msk [vmem:[#allocation5 + $0xb0] sm:$0xff] %vm551_vm0, %v5470_v4  ;;  %996 = vst.msk [vmem:[#allocation5 + $0xb8] sm:$0xff] %vm551_vm0, %v5470_v4 }
  0xae   : > { %997 = vst.msk [vmem:[#allocation5 + $0xc0] sm:$0xff] %vm551_vm0, %v5470_v4  ;;  %998 = vst.msk [vmem:[#allocation5 + $0xc8] sm:$0xff] %vm551_vm0, %v5470_v4 }
  0xaf   : > { %999 = vst.msk [vmem:[#allocation5 + $0xd0] sm:$0xff] %vm551_vm0, %v5470_v4  ;;  %1000 = vst.msk [vmem:[#allocation5 + $0xd8] sm:$0xff] %vm551_vm0, %v5470_v4 }
  0xb0   : > { %1001 = vst.msk [vmem:[#allocation5 + $0xe0] sm:$0xff] %vm551_vm0, %v5470_v4  ;;  %1002 = vst.msk [vmem:[#allocation5 + $0xe8] sm:$0xff] %vm551_vm0, %v5470_v4 }
  0xb1   : > { %1003 = vst.msk [vmem:[#allocation5 + $0xf0] sm:$0xff] %vm551_vm0, %v5470_v4  ;;  %1004 = vst.msk [vmem:[#allocation5 + $0xf8] sm:$0xff] %vm551_vm0, %v5470_v4 }
  0xb2   : > { %909 = vst.msk [vmem:[#allocation3] sm:$0xff] %vm908_vm1, %v5471_v37  ;;  %910 = vst.msk [vmem:[#allocation3 + $0x8] sm:$0xff] %vm908_vm1, %v5471_v37 }
  0xb3   : > { %911 = vst.msk [vmem:[#allocation3 + $0x10] sm:$0xff] %vm908_vm1, %v5471_v37  ;;  %912 = vst.msk [vmem:[#allocation3 + $0x18] sm:$0xff] %vm908_vm1, %v5471_v37 }
  0xb4   : > { %913 = vst.msk [vmem:[#allocation3 + $0x20] sm:$0xff] %vm908_vm1, %v5471_v37  ;;  %914 = vst.msk [vmem:[#allocation3 + $0x28] sm:$0xff] %vm908_vm1, %v5471_v37 }
  0xb5   : > { %915 = vst.msk [vmem:[#allocation3 + $0x30] sm:$0xff] %vm908_vm1, %v5471_v37  ;;  %916 = vst.msk [vmem:[#allocation3 + $0x38] sm:$0xff] %vm908_vm1, %v5471_v37 }
  0xb6   : > { %917 = vst.msk [vmem:[#allocation3 + $0x40] sm:$0xff] %vm908_vm1, %v5471_v37  ;;  %918 = vst.msk [vmem:[#allocation3 + $0x48] sm:$0xff] %vm908_vm1, %v5471_v37 }
  0xb7   : > { %919 = vst.msk [vmem:[#allocation3 + $0x50] sm:$0xff] %vm908_vm1, %v5471_v37  ;;  %920 = vst.msk [vmem:[#allocation3 + $0x58] sm:$0xff] %vm908_vm1, %v5471_v37 }
  0xb8   : > { %921 = vst.msk [vmem:[#allocation3 + $0x60] sm:$0xff] %vm908_vm1, %v5471_v37  ;;  %922 = vst.msk [vmem:[#allocation3 + $0x68] sm:$0xff] %vm908_vm1, %v5471_v37 }
  0xb9   : > { %923 = vst.msk [vmem:[#allocation3 + $0x70] sm:$0xff] %vm908_vm1, %v5471_v37  ;;  %924 = vst.msk [vmem:[#allocation3 + $0x78] sm:$0xff] %vm908_vm1, %v5471_v37 }
  0xba   : > { %925 = vst.msk [vmem:[#allocation3 + $0x80] sm:$0xff] %vm908_vm1, %v5471_v37  ;;  %926 = vst.msk [vmem:[#allocation3 + $0x88] sm:$0xff] %vm908_vm1, %v5471_v37 }
  0xbb   : > { %927 = vst.msk [vmem:[#allocation3 + $0x90] sm:$0xff] %vm908_vm1, %v5471_v37  ;;  %928 = vst.msk [vmem:[#allocation3 + $0x98] sm:$0xff] %vm908_vm1, %v5471_v37 }
  0xbc   : > { %929 = vst.msk [vmem:[#allocation3 + $0xa0] sm:$0xff] %vm908_vm1, %v5471_v37  ;;  %930 = vst.msk [vmem:[#allocation3 + $0xa8] sm:$0xff] %vm908_vm1, %v5471_v37 }
  0xbd   : > { %931 = vst.msk [vmem:[#allocation3 + $0xb0] sm:$0xff] %vm908_vm1, %v5471_v37  ;;  %932 = vst.msk [vmem:[#allocation3 + $0xb8] sm:$0xff] %vm908_vm1, %v5471_v37 }
  0xbe   : > { %933 = vst.msk [vmem:[#allocation3 + $0xc0] sm:$0xff] %vm908_vm1, %v5471_v37  ;;  %934 = vst.msk [vmem:[#allocation3 + $0xc8] sm:$0xff] %vm908_vm1, %v5471_v37 }
  0xbf   : > { %935 = vst.msk [vmem:[#allocation3 + $0xd0] sm:$0xff] %vm908_vm1, %v5471_v37  ;;  %936 = vst.msk [vmem:[#allocation3 + $0xd8] sm:$0xff] %vm908_vm1, %v5471_v37 }
  0xc0   : > { %937 = vst.msk [vmem:[#allocation3 + $0xe0] sm:$0xff] %vm908_vm1, %v5471_v37  ;;  %938 = vst.msk [vmem:[#allocation3 + $0xe8] sm:$0xff] %vm908_vm1, %v5471_v37 }
  0xc1   : > { %939 = vst.msk [vmem:[#allocation3 + $0xf0] sm:$0xff] %vm908_vm1, %v5471_v37  ;;  %940 = vst.msk [vmem:[#allocation3 + $0xf8] sm:$0xff] %vm908_vm1, %v5471_v37 }
  0xc2   : > { %941 = vst.msk [vmem:[#allocation4] sm:$0xff] %vm908_vm1, %v5470_v4  ;;  %942 = vst.msk [vmem:[#allocation4 + $0x8] sm:$0xff] %vm908_vm1, %v5470_v4 }
  0xc3   : > { %943 = vst.msk [vmem:[#allocation4 + $0x10] sm:$0xff] %vm908_vm1, %v5470_v4  ;;  %944 = vst.msk [vmem:[#allocation4 + $0x18] sm:$0xff] %vm908_vm1, %v5470_v4 }
  0xc4   : > { %945 = vst.msk [vmem:[#allocation4 + $0x20] sm:$0xff] %vm908_vm1, %v5470_v4  ;;  %946 = vst.msk [vmem:[#allocation4 + $0x28] sm:$0xff] %vm908_vm1, %v5470_v4 }
  0xc5   : > { %947 = vst.msk [vmem:[#allocation4 + $0x30] sm:$0xff] %vm908_vm1, %v5470_v4  ;;  %948 = vst.msk [vmem:[#allocation4 + $0x38] sm:$0xff] %vm908_vm1, %v5470_v4 }
  0xc6   : > { %949 = vst.msk [vmem:[#allocation4 + $0x40] sm:$0xff] %vm908_vm1, %v5470_v4  ;;  %950 = vst.msk [vmem:[#allocation4 + $0x48] sm:$0xff] %vm908_vm1, %v5470_v4 }
  0xc7   : > { %951 = vst.msk [vmem:[#allocation4 + $0x50] sm:$0xff] %vm908_vm1, %v5470_v4  ;;  %952 = vst.msk [vmem:[#allocation4 + $0x58] sm:$0xff] %vm908_vm1, %v5470_v4 }
  0xc8   : > { %953 = vst.msk [vmem:[#allocation4 + $0x60] sm:$0xff] %vm908_vm1, %v5470_v4  ;;  %954 = vst.msk [vmem:[#allocation4 + $0x68] sm:$0xff] %vm908_vm1, %v5470_v4 }
  0xc9   : > { %955 = vst.msk [vmem:[#allocation4 + $0x70] sm:$0xff] %vm908_vm1, %v5470_v4  ;;  %956 = vst.msk [vmem:[#allocation4 + $0x78] sm:$0xff] %vm908_vm1, %v5470_v4 }
  0xca   : > { %957 = vst.msk [vmem:[#allocation4 + $0x80] sm:$0xff] %vm908_vm1, %v5470_v4  ;;  %958 = vst.msk [vmem:[#allocation4 + $0x88] sm:$0xff] %vm908_vm1, %v5470_v4 }
  0xcb   : > { %959 = vst.msk [vmem:[#allocation4 + $0x90] sm:$0xff] %vm908_vm1, %v5470_v4  ;;  %960 = vst.msk [vmem:[#allocation4 + $0x98] sm:$0xff] %vm908_vm1, %v5470_v4 }
  0xcc   : > { %961 = vst.msk [vmem:[#allocation4 + $0xa0] sm:$0xff] %vm908_vm1, %v5470_v4  ;;  %962 = vst.msk [vmem:[#allocation4 + $0xa8] sm:$0xff] %vm908_vm1, %v5470_v4 }
  0xcd   : > { %963 = vst.msk [vmem:[#allocation4 + $0xb0] sm:$0xff] %vm908_vm1, %v5470_v4  ;;  %964 = vst.msk [vmem:[#allocation4 + $0xb8] sm:$0xff] %vm908_vm1, %v5470_v4 }
  0xce   : > { %965 = vst.msk [vmem:[#allocation4 + $0xc0] sm:$0xff] %vm908_vm1, %v5470_v4  ;;  %966 = vst.msk [vmem:[#allocation4 + $0xc8] sm:$0xff] %vm908_vm1, %v5470_v4 }
  0xcf   : > { %967 = vst.msk [vmem:[#allocation4 + $0xd0] sm:$0xff] %vm908_vm1, %v5470_v4  ;;  %968 = vst.msk [vmem:[#allocation4 + $0xd8] sm:$0xff] %vm908_vm1, %v5470_v4 }
  0xd0   : > { %969 = vst.msk [vmem:[#allocation4 + $0xe0] sm:$0xff] %vm908_vm1, %v5470_v4  ;;  %970 = vst.msk [vmem:[#allocation4 + $0xe8] sm:$0xff] %vm908_vm1, %v5470_v4 }
  0xd1   : > { %971 = vst.msk [vmem:[#allocation4 + $0xf0] sm:$0xff] %vm908_vm1, %v5470_v4  ;;  %972 = vst.msk [vmem:[#allocation4 + $0xf8] sm:$0xff] %vm908_vm1, %v5470_v4 }
  0xde   : > { %519 = vxpose.xlu0.b32.start.end [1/1] (short) %v5789_v1, 128 }
 0x11d   : > { %v503_v5 = vpop.trf.xlu0 }
 0x11e   : > { %4463 = vmatprep.mubr.msk.f32.mxu0 %vm551_vm0, %v503_v5 }
 0x121   : > { %v504_v6 = vpop.trf.xlu0 }
 0x122   : > { %4464 = vmatmul.mubr.msk.f32.vlgmr.msra.gmra.mxu0 %vm551_vm0, %v504_v6 }
 0x125   : > { %v505_v7 = vpop.trf.xlu0 }
 0x126   : > { %4466 = vmatprep.mubr.msk.f32.mxu0 %vm551_vm0, %v505_v7 }
 0x129   : > { %v506_v8 = vpop.trf.xlu0 }
 0x12a   : > { %4467 = vmatmul.mubr.msk.f32.gmra.mxu0 %vm551_vm0, %v506_v8 }
 0x12d   : > { %v507_v9 = vpop.trf.xlu0 }
 0x12e   : > { %4469 = vmatprep.mubr.msk.f32.mxu0 %vm551_vm0, %v507_v9 }
 0x131   : > { %v508_v10 = vpop.trf.xlu0 }
 0x132   : > { %4470 = vmatmul.mubr.msk.f32.gmra.mxu0 %vm551_vm0, %v508_v10 }
 0x135   : > { %v509_v11 = vpop.trf.xlu0 }
 0x136   : > { %4472 = vmatprep.mubr.msk.f32.mxu0 %vm551_vm0, %v509_v11 }
 0x139   : > { %v510_v12 = vpop.trf.xlu0 }
 0x13a   : > { %4473 = vmatmul.mubr.msk.f32.gmra.mxu0 %vm551_vm0, %v510_v12 }
 0x13d   : > { %v511_v13 = vpop.trf.xlu0 }
 0x13e   : > { %4475 = vmatprep.mubr.msk.f32.mxu0 %vm551_vm0, %v511_v13 }
 0x141   : > { %v512_v14 = vpop.trf.xlu0 }
 0x142   : > { %4476 = vmatmul.mubr.msk.f32.gmra.mxu0 %vm551_vm0, %v512_v14 }
 0x145   : > { %v513_v15 = vpop.trf.xlu0 }
 0x146   : > { %4478 = vmatprep.mubr.msk.f32.mxu0 %vm551_vm0, %v513_v15 }
 0x149   : > { %v514_v16 = vpop.trf.xlu0 }
 0x14a   : > { %4479 = vmatmul.mubr.msk.f32.gmra.mxu0 %vm551_vm0, %v514_v16 }
 0x14d   : > { %v515_v17 = vpop.trf.xlu0 }
 0x14e   : > { %4481 = vmatprep.mubr.msk.f32.mxu0 %vm551_vm0, %v515_v17 }
 0x151   : > { %v516_v18 = vpop.trf.xlu0 }
 0x152   : > { %4482 = vmatmul.mubr.msk.f32.gmra.mxu0 %vm551_vm0, %v516_v18 }
 0x155   : > { %v517_v19 = vpop.trf.xlu0 }
 0x156   : > { %4484 = vmatprep.mubr.msk.f32.mxu0 %vm551_vm0, %v517_v19 }
 0x159   : > { %v518_v20 = vpop.trf.xlu0 }
 0x15a   : > { %4485 = vmatmul.mubr.msk.f32.gmra.mxu0 %vm551_vm0, %v518_v20 }
 0x15d   : > { %v535_v21 = vpop.trf.xlu0 }
 0x15e   : > { %4487 = vmatprep.mubr.msk.f32.mxu1 %vm551_vm0, %v535_v21 }
 0x161   : > { %v536_v22 = vpop.trf.xlu0 }
 0x162   : > { %4488 = vmatmul.mubr.msk.f32.vlgmr.msra.gmra.mxu1 %vm551_vm0, %v536_v22 }
 0x165   : > { %v537_v23 = vpop.trf.xlu0 }
 0x166   : > { %4490 = vmatprep.mubr.msk.f32.mxu1 %vm551_vm0, %v537_v23 }
 0x169   : > { %v538_v24 = vpop.trf.xlu0 }
 0x16a   : > { %4491 = vmatmul.mubr.msk.f32.gmra.mxu1 %vm551_vm0, %v538_v24 }
 0x16d   : > { %v539_v25 = vpop.trf.xlu0 }
 0x16e   : > { %4493 = vmatprep.mubr.msk.f32.mxu1 %vm551_vm0, %v539_v25 }
 0x171   : > { %v540_v26 = vpop.trf.xlu0 }
 0x172   : > { %4494 = vmatmul.mubr.msk.f32.gmra.mxu1 %vm551_vm0, %v540_v26 }
 0x175   : > { %v541_v27 = vpop.trf.xlu0 }
 0x176   : > { %4496 = vmatprep.mubr.msk.f32.mxu1 %vm551_vm0, %v541_v27 }
 0x179   : > { %v542_v28 = vpop.trf.xlu0 }
 0x17a   : > { %4497 = vmatmul.mubr.msk.f32.gmra.mxu1 %vm551_vm0, %v542_v28 }
 0x17d   : > { %v543_v29 = vpop.trf.xlu0 }
 0x17e   : > { %4499 = vmatprep.mubr.msk.f32.mxu1 %vm551_vm0, %v543_v29 }
 0x181   : > { %v544_v30 = vpop.trf.xlu0 }
 0x182   : > { %4500 = vmatmul.mubr.msk.f32.gmra.mxu1 %vm551_vm0, %v544_v30 }
 0x185   : > { %v545_v31 = vpop.trf.xlu0 }
 0x186   : > { %4502 = vmatprep.mubr.msk.f32.mxu1 %vm551_vm0, %v545_v31 }
 0x189   : > { %v546_v32 = vpop.trf.xlu0 }
 0x18a   : > { %4503 = vmatmul.mubr.msk.f32.gmra.mxu1 %vm551_vm0, %v546_v32 }
 0x18d   : > { %v547_v33 = vpop.trf.xlu0 }
 0x18e   : > { %4505 = vmatprep.mubr.msk.f32.mxu1 %vm551_vm0, %v547_v33 }
 0x191   : > { %v548_v34 = vpop.trf.xlu0 }
 0x192   : > { %4506 = vmatmul.mubr.msk.f32.gmra.mxu1 %vm551_vm0, %v548_v34 }
 0x195   : > { %v549_v35 = vpop.trf.xlu0 }
 0x196   : > { %4508 = vmatprep.mubr.msk.f32.mxu1 %vm551_vm0, %v549_v35 }
 0x199   : > { %v550_v36 = vpop.trf.xlu0 }
 0x19a   : > { %4509 = vmatmul.mubr.msk.f32.gmra.mxu1 %vm551_vm0, %v550_v36 }
 0x1e2   : > { %v4465_v38 = vpop.f32.mrf.mxu0 }
 0x1e3   : > { %877 = vst.msk [vmem:[#allocation2 + $0x8] sm:$0xff] %vm551_vm0, %v4465_v38 }
 0x1e4   : > { %v717_v39 = vpop.f32.mrf.mxu0 }
 0x1e5   : > { %876 = vst.msk [vmem:[#allocation2] sm:$0xff] %vm551_vm0, %v717_v39 }
 0x1ea   : > { %v4468_v40 = vpop.f32.mrf.mxu0 }
 0x1eb   : > { %879 = vst.msk [vmem:[#allocation2 + $0x18] sm:$0xff] %vm551_vm0, %v4468_v40 }
 0x1ec   : > { %v727_v41 = vpop.f32.mrf.mxu0 }
 0x1ed   : > { %878 = vst.msk [vmem:[#allocation2 + $0x10] sm:$0xff] %vm551_vm0, %v727_v41 }
 0x1f2   : > { %v4471_v42 = vpop.f32.mrf.mxu0 }
 0x1f3   : > { %881 = vst.msk [vmem:[#allocation2 + $0x28] sm:$0xff] %vm551_vm0, %v4471_v42 }
 0x1f4   : > { %v737_v43 = vpop.f32.mrf.mxu0 }
 0x1f5   : > { %880 = vst.msk [vmem:[#allocation2 + $0x20] sm:$0xff] %vm551_vm0, %v737_v43 }
 0x1fa   : > { %v4474_v44 = vpop.f32.mrf.mxu0 }
 0x1fb   : > { %883 = vst.msk [vmem:[#allocation2 + $0x38] sm:$0xff] %vm551_vm0, %v4474_v44 }
 0x1fc   : > { %v747_v45 = vpop.f32.mrf.mxu0 }
 0x1fd   : > { %882 = vst.msk [vmem:[#allocation2 + $0x30] sm:$0xff] %vm551_vm0, %v747_v45 }
 0x202   : > { %v4477_v46 = vpop.f32.mrf.mxu0 }
 0x203   : > { %885 = vst.msk [vmem:[#allocation2 + $0x48] sm:$0xff] %vm551_vm0, %v4477_v46 }
 0x204   : > { %v757_v47 = vpop.f32.mrf.mxu0 }
 0x205   : > { %884 = vst.msk [vmem:[#allocation2 + $0x40] sm:$0xff] %vm551_vm0, %v757_v47 }
 0x20a   : > { %v4480_v48 = vpop.f32.mrf.mxu0 }
 0x20b   : > { %887 = vst.msk [vmem:[#allocation2 + $0x58] sm:$0xff] %vm551_vm0, %v4480_v48 }
 0x20c   : > { %v767_v49 = vpop.f32.mrf.mxu0 }
 0x20d   : > { %886 = vst.msk [vmem:[#allocation2 + $0x50] sm:$0xff] %vm551_vm0, %v767_v49 }
 0x212   : > { %v4483_v50 = vpop.f32.mrf.mxu0 }
 0x213   : > { %889 = vst.msk [vmem:[#allocation2 + $0x68] sm:$0xff] %vm551_vm0, %v4483_v50 }
 0x214   : > { %v777_v51 = vpop.f32.mrf.mxu0 }
 0x215   : > { %888 = vst.msk [vmem:[#allocation2 + $0x60] sm:$0xff] %vm551_vm0, %v777_v51 }
 0x21a   : > { %v4486_v52 = vpop.f32.mrf.mxu0 }
 0x21b   : > { %891 = vst.msk [vmem:[#allocation2 + $0x78] sm:$0xff] %vm551_vm0, %v4486_v52 }
 0x21c   : > { %v787_v53 = vpop.f32.mrf.mxu0 }
 0x21d   : > { %890 = vst.msk [vmem:[#allocation2 + $0x70] sm:$0xff] %vm551_vm0, %v787_v53 }
 0x222   : > { %v4489_v54 = vpop.f32.mrf.mxu1 }
 0x223   : > { %893 = vst.msk [vmem:[#allocation2 + $0x88] sm:$0xff] %vm551_vm0, %v4489_v54 }
 0x224   : > { %v797_v55 = vpop.f32.mrf.mxu1 }
 0x225   : > { %892 = vst.msk [vmem:[#allocation2 + $0x80] sm:$0xff] %vm551_vm0, %v797_v55 }
 0x22a   : > { %v4492_v56 = vpop.f32.mrf.mxu1 }
 0x22b   : > { %895 = vst.msk [vmem:[#allocation2 + $0x98] sm:$0xff] %vm551_vm0, %v4492_v56 }
 0x22c   : > { %v807_v57 = vpop.f32.mrf.mxu1 }
 0x22d   : > { %894 = vst.msk [vmem:[#allocation2 + $0x90] sm:$0xff] %vm551_vm0, %v807_v57 }
 0x232   : > { %v4495_v58 = vpop.f32.mrf.mxu1 }
 0x233   : > { %897 = vst.msk [vmem:[#allocation2 + $0xa8] sm:$0xff] %vm551_vm0, %v4495_v58 }
 0x234   : > { %v817_v59 = vpop.f32.mrf.mxu1 }
 0x235   : > { %896 = vst.msk [vmem:[#allocation2 + $0xa0] sm:$0xff] %vm551_vm0, %v817_v59 }
 0x23a   : > { %v4498_v60 = vpop.f32.mrf.mxu1 }
 0x23b   : > { %899 = vst.msk [vmem:[#allocation2 + $0xb8] sm:$0xff] %vm551_vm0, %v4498_v60 }
 0x23c   : > { %v827_v61 = vpop.f32.mrf.mxu1 }
 0x23d   : > { %898 = vst.msk [vmem:[#allocation2 + $0xb0] sm:$0xff] %vm551_vm0, %v827_v61 }
 0x242   : > { %v4501_v62 = vpop.f32.mrf.mxu1 }
 0x243   : > { %901 = vst.msk [vmem:[#allocation2 + $0xc8] sm:$0xff] %vm551_vm0, %v4501_v62 }
 0x244   : > { %v837_v63 = vpop.f32.mrf.mxu1 }
 0x245   : > { %900 = vst.msk [vmem:[#allocation2 + $0xc0] sm:$0xff] %vm551_vm0, %v837_v63 }
 0x24a   : > { %v4504_v3 = vpop.f32.mrf.mxu1 }
 0x24b   : > { %903 = vst.msk [vmem:[#allocation2 + $0xd8] sm:$0xff] %vm551_vm0, %v4504_v3 }
 0x24c   : > { %v847_v4 = vpop.f32.mrf.mxu1 }
 0x24d   : > { %902 = vst.msk [vmem:[#allocation2 + $0xd0] sm:$0xff] %vm551_vm0, %v847_v4 }
 0x252   : > { %v4507_v5 = vpop.f32.mrf.mxu1 }
 0x253   : > { %905 = vst.msk [vmem:[#allocation2 + $0xe8] sm:$0xff] %vm551_vm0, %v4507_v5 }
 0x254   : > { %v857_v6 = vpop.f32.mrf.mxu1 }
 0x255   : > { %904 = vst.msk [vmem:[#allocation2 + $0xe0] sm:$0xff] %vm551_vm0, %v857_v6 }
 0x25a   : > { %v4510_v7 = vpop.f32.mrf.mxu1 }
 0x25b   : > { %907 = vst.msk [vmem:[#allocation2 + $0xf8] sm:$0xff] %vm551_vm0, %v4510_v7 }
 0x25c   : > { %v867_v8 = vpop.f32.mrf.mxu1 }
 0x25d   : > { %906 = vst.msk [vmem:[#allocation2 + $0xf0] sm:$0xff] %vm551_vm0, %v867_v8 }
 0x25e PF: > { %4511 = vmatprep.subr.mxu0 %v5791_v2  ;;  %v1005_v9 = vld [vmem:[#allocation2] sm:$0xff]  ;;  %vm1037_vm2 = vcmask 64512   ;;  %v1006_v10 = vld [vmem:[#allocation2 + $0x8] sm:$0xff]  ;;  %v1007_v11 = vld [vmem:[#allocation2 + $0x10] sm:$0xff]  ;;  %v5472_v12 = vmov 0   ;;  %s7695_s12 = sld [smem:[#allocation97_spill]] }
 0x25f   : > { %4512 = vmatpush3.msra.mxu0 %v5791_v2  ;;  %4513 = vmatprep.mubr.msk.f32.mxu0 %vm1037_vm2, %v1005_v9  ;;  %v1008_v13 = vld [vmem:[#allocation2 + $0x18] sm:$0xff]  ;;  %v1009_v14 = vld [vmem:[#allocation2 + $0x20] sm:$0xff]  ;;  %v1010_v15 = vld [vmem:[#allocation2 + $0x28] sm:$0xff]  ;;  %vm2441_vm3 = vcmask 7168   ;;  %vm5474_vm4 = vmmov 0   ;;  %p4211_p3 = scmp.ne.s32.totalorder %s5447_s19, 1 }
 0x260   : > { %4514 = vmatmul.mubr.msk.f32.vlgmr.msra.gmra.mxu0 %vm1037_vm2, %v1006_v10  ;;  %4773 = vset.pattern.permute.xlu0 %v5472_v12  ;;  %v1011_v16 = vld [vmem:[#allocation2 + $0x30] sm:$0xff]  ;;  %v1012_v18 = vld [vmem:[#allocation2 + $0x38] sm:$0xff]  ;;  %v1013_v19 = vld [vmem:[#allocation2 + $0x40] sm:$0xff]  ;;  %s7915_s16 = sld [smem:[#allocation98_spill]] (!%p4211_p3) }
 0x261   : > { %4516 = vmatprep.mubr.msk.f32.mxu0 %vm1037_vm2, %v1007_v11  ;;  %4774 = vset.pattern.permute.xlu1 %v5472_v12  ;;  %v1014_v20 = vld [vmem:[#allocation2 + $0x48] sm:$0xff]  ;;  %v1015_v21 = vld [vmem:[#allocation2 + $0x50] sm:$0xff]  ;;  %v1016_v22 = vld [vmem:[#allocation2 + $0x58] sm:$0xff]  ;;  %s7916_s2 = sld [smem:[#allocation99_spill]] (!%p4211_p3) }
 0x262   : > { %v1017_v23 = vld [vmem:[#allocation2 + $0x60] sm:$0xff]  ;;  %v1018_v24 = vld [vmem:[#allocation2 + $0x68] sm:$0xff]  ;;  %v1019_v25 = vld [vmem:[#allocation2 + $0x70] sm:$0xff] }
 0x263   : > { %v1020_v26 = vld [vmem:[#allocation2 + $0x78] sm:$0xff]  ;;  %v1021_v27 = vld [vmem:[#allocation2 + $0x80] sm:$0xff]  ;;  %v1022_v28 = vld [vmem:[#allocation2 + $0x88] sm:$0xff] }
 0x264   : > { %4517 = vmatmul.mubr.msk.f32.gmra.mxu0 %vm1037_vm2, %v1008_v13  ;;  %v1632_v17 = vld [vmem:[%s7695_s12] sm:$0xff]  ;;  %v1023_v29 = vld [vmem:[#allocation2 + $0x90] sm:$0xff]  ;;  %v1024_v30 = vld [vmem:[#allocation2 + $0x98] sm:$0xff] }
 0x265   : > { %4519 = vmatprep.mubr.msk.f32.mxu0 %vm1037_vm2, %v1009_v14  ;;  %1635 = vperm.xlu0 %4773, %v1632_v17   ;;  %v1025_v31 = vld [vmem:[#allocation2 + $0xa0] sm:$0xff]  ;;  %v1026_v32 = vld [vmem:[#allocation2 + $0xa8] sm:$0xff]  ;;  %v1027_v33 = vld [vmem:[#allocation2 + $0xb0] sm:$0xff] }
 0x266   : > { %v1028_v34 = vld [vmem:[#allocation2 + $0xb8] sm:$0xff]  ;;  %v1029_v35 = vld [vmem:[#allocation2 + $0xc0] sm:$0xff]  ;;  %v1030_v36 = vld [vmem:[#allocation2 + $0xc8] sm:$0xff] }
 0x267   : > { %v1031_v37 = vld [vmem:[#allocation2 + $0xd0] sm:$0xff]  ;;  %v1032_v38 = vld [vmem:[#allocation2 + $0xd8] sm:$0xff]  ;;  %v1033_v39 = vld [vmem:[#allocation2 + $0xe0] sm:$0xff] }
 0x268   : > { %4520 = vmatmul.mubr.msk.f32.gmra.mxu0 %vm1037_vm2, %v1010_v15  ;;  %v1034_v40 = vld [vmem:[#allocation2 + $0xe8] sm:$0xff]  ;;  %v1035_v41 = vld [vmem:[#allocation2 + $0xf0] sm:$0xff]  ;;  %v1036_v42 = vld [vmem:[#allocation2 + $0xf8] sm:$0xff] }
 0x269   : > { %4522 = vmatprep.mubr.msk.f32.mxu0 %vm1037_vm2, %v1011_v16  ;;  %v6455_v0 = vld [vmem:[#allocation3 + $0x80] sm:$0xff] }
 0x26a   : > { %7738 = vst [vmem:[#allocation77_spill] sm:$0xff] %v6455_v0 }
 0x26c   : > { %4523 = vmatmul.mubr.msk.f32.gmra.mxu0 %vm1037_vm2, %v1012_v18 }
 0x26d   : > { %4525 = vmatprep.mubr.msk.f32.mxu0 %vm1037_vm2, %v1013_v19 }
 0x270   : > { %4526 = vmatmul.mubr.msk.f32.gmra.mxu0 %vm1037_vm2, %v1014_v20 }
 0x271   : > { %4528 = vmatprep.mubr.msk.f32.mxu0 %vm1037_vm2, %v1015_v21 }
 0x274   : > { %4529 = vmatmul.mubr.msk.f32.gmra.mxu0 %vm1037_vm2, %v1016_v22 }
 0x275   : > { %4531 = vmatprep.mubr.msk.f32.mxu0 %vm1037_vm2, %v1017_v23 }
 0x278   : > { %4532 = vmatmul.mubr.msk.f32.gmra.mxu0 %vm1037_vm2, %v1018_v24 }
 0x279   : > { %4534 = vmatprep.mubr.msk.f32.mxu0 %vm1037_vm2, %v1019_v25 }
 0x27c   : > { %4535 = vmatmul.mubr.msk.f32.gmra.mxu0 %vm1037_vm2, %v1020_v26 }
 0x27d   : > { %4537 = vmatprep.mubr.msk.f32.mxu0 %vm1037_vm2, %v1021_v27 }
 0x280   : > { %4538 = vmatmul.mubr.msk.f32.gmra.mxu0 %vm1037_vm2, %v1022_v28 }
 0x281   : > { %4540 = vmatprep.mubr.msk.f32.mxu0 %vm1037_vm2, %v1023_v29 }
 0x284   : > { %4541 = vmatmul.mubr.msk.f32.gmra.mxu0 %vm1037_vm2, %v1024_v30 }
 0x285   : > { %4543 = vmatprep.mubr.msk.f32.mxu0 %vm1037_vm2, %v1025_v31 }
 0x288   : > { %4544 = vmatmul.mubr.msk.f32.gmra.mxu0 %vm1037_vm2, %v1026_v32 }
 0x289   : > { %4546 = vmatprep.mubr.msk.f32.mxu0 %vm1037_vm2, %v1027_v33 }
 0x28c   : > { %4547 = vmatmul.mubr.msk.f32.gmra.mxu0 %vm1037_vm2, %v1028_v34 }
 0x28d   : > { %4549 = vmatprep.mubr.msk.f32.mxu0 %vm1037_vm2, %v1029_v35 }
 0x290   : > { %4550 = vmatmul.mubr.msk.f32.gmra.mxu0 %vm1037_vm2, %v1030_v36 }
 0x291   : > { %4552 = vmatprep.mubr.msk.f32.mxu0 %vm1037_vm2, %v1031_v37 }
 0x294   : > { %4553 = vmatmul.mubr.msk.f32.gmra.mxu0 %vm1037_vm2, %v1032_v38 }
 0x295   : > { %4555 = vmatprep.mubr.msk.f32.mxu0 %vm1037_vm2, %v1033_v39 }
 0x298   : > { %4556 = vmatmul.mubr.msk.f32.gmra.mxu0 %vm1037_vm2, %v1034_v40 }
 0x299   : > { %4558 = vmatprep.mubr.msk.f32.mxu0 %vm1037_vm2, %v1035_v41 }
 0x29c   : > { %4559 = vmatmul.mubr.msk.f32.gmra.mxu0 %vm1037_vm2, %v1036_v42 }
 0x29d   : > { %1626 = vmatprep.mubr.f32.mxu0 %v5789_v1 }
 0x320   : > { %v6068_v43 = vpop.f32.mrf.mxu0 }
 0x321   : > { %7696 = vst [vmem:[#allocation35_spill] sm:$0xff] %v6068_v43  ;;  %1803 = vmax.xlane.f32.xlu1 %v6068_v43 }
 0x322   : > { %v6071_v44 = vpop.f32.mrf.mxu0 }
 0x323   : > { %7697 = vst [vmem:[#allocation36_spill] sm:$0xff] %v6071_v44  ;;  %1801 = vmax.xlane.f32.xlu0 %v6071_v44 }
 0x324   : > { %v6074_v45 = vpop.f32.mrf.mxu0 }
 0x325   : > { %7698 = vst [vmem:[#allocation37_spill] sm:$0xff] %v6074_v45  ;;  %1807 = vmax.xlane.f32.xlu1 %v6074_v45 }
 0x326   : > { %v6077_v46 = vpop.f32.mrf.mxu0 }
 0x327   : > { %7699 = vst [vmem:[#allocation38_spill] sm:$0xff] %v6077_v46 }
 0x328   : > { %v6079_v47 = vpop.f32.mrf.mxu0 }
 0x329   : > { %7700 = vst [vmem:[#allocation39_spill] sm:$0xff] %v6079_v47  ;;  %1805 = vmax.xlane.f32.xlu1 %v6077_v46  ;;  %v1360_v9 = vmax.f32 %v6068_v43, %v6079_v47 }
 0x32a   : > { %v6082_v48 = vpop.f32.mrf.mxu0 }
 0x32b   : > { %7701 = vst [vmem:[#allocation40_spill] sm:$0xff] %v6082_v48  ;;  %v1359_v7 = vmax.f32 %v6071_v44, %v6082_v48 }
 0x32c   : > { %v6084_v49 = vpop.f32.mrf.mxu0 }
 0x32d   : > { %7702 = vst [vmem:[#allocation41_spill] sm:$0xff] %v6084_v49  ;;  %1811 = vmax.xlane.f32.xlu1 %v6079_v47  ;;  %v1362_v10 = vmax.f32 %v6074_v45, %v6084_v49 }
 0x32e   : > { %v6087_v50 = vpop.f32.mrf.mxu0 }
 0x32f   : > { %7703 = vst [vmem:[#allocation42_spill] sm:$0xff] %v6087_v50  ;;  %v1361_v11 = vmax.f32 %v6077_v46, %v6087_v50 }
 0x330   : > { %v6089_v51 = vpop.f32.mrf.mxu0 }
 0x331   : > { %7704 = vst [vmem:[#allocation43_spill] sm:$0xff] %v6089_v51  ;;  %1809 = vmax.xlane.f32.xlu1 %v6082_v48  ;;  %v1364_v14 = vmax.f32 %v1360_v9, %v6089_v51 }
 0x332   : > { %v6092_v52 = vpop.f32.mrf.mxu0 }
 0x333   : > { %7705 = vst [vmem:[#allocation44_spill] sm:$0xff] %v6092_v52  ;;  %v1363_v12 = vmax.f32 %v1359_v7, %v6092_v52 }
 0x334   : > { %v6094_v53 = vpop.f32.mrf.mxu0 }
 0x335   : > { %7706 = vst [vmem:[#allocation45_spill] sm:$0xff] %v6094_v53  ;;  %1815 = vmax.xlane.f32.xlu1 %v6084_v49  ;;  %v1366_v15 = vmax.f32 %v1362_v10, %v6094_v53 }
 0x336   : > { %v6097_v54 = vpop.f32.mrf.mxu0 }
 0x337   : > { %7707 = vst [vmem:[#allocation46_spill] sm:$0xff] %v6097_v54  ;;  %1821 = vmax.xlane.f32.xlu0 %v6097_v54  ;;  %v1365_v16 = vmax.f32 %v1361_v11, %v6097_v54 }
 0x338   : > { %v6100_v55 = vpop.f32.mrf.mxu0 }
 0x339   : > { %7708 = vst [vmem:[#allocation47_spill] sm:$0xff] %v6100_v55  ;;  %1813 = vmax.xlane.f32.xlu1 %v6087_v50  ;;  %v1368_v19 = vmax.f32 %v1364_v14, %v6100_v55 }
 0x33a   : > { %v6103_v56 = vpop.f32.mrf.mxu0 }
 0x33b   : > { %7709 = vst [vmem:[#allocation48_spill] sm:$0xff] %v6103_v56  ;;  %1825 = vmax.xlane.f32.xlu0 %v6103_v56  ;;  %v1367_v17 = vmax.f32 %v1363_v12, %v6103_v56 }
 0x33c   : > { %v6106_v57 = vpop.f32.mrf.mxu0 }
 0x33d   : > { %7710 = vst [vmem:[#allocation49_spill] sm:$0xff] %v6106_v57  ;;  %1819 = vmax.xlane.f32.xlu1 %v6089_v51  ;;  %v1370_v20 = vmax.f32 %v1366_v15, %v6106_v57 }
 0x33e   : > { %v6109_v58 = vpop.f32.mrf.mxu0 }
 0x33f   : > { %7711 = vst [vmem:[#allocation50_spill] sm:$0xff] %v6109_v58  ;;  %1829 = vmax.xlane.f32.xlu0 %v6109_v58  ;;  %v1369_v21 = vmax.f32 %v1365_v16, %v6109_v58 }
 0x340   : > { %v6112_v59 = vpop.f32.mrf.mxu0 }
 0x341   : > { %7712 = vst [vmem:[#allocation51_spill] sm:$0xff] %v6112_v59  ;;  %1817 = vmax.xlane.f32.xlu1 %v6092_v52  ;;  %v1372_v24 = vmax.f32 %v1368_v19, %v6112_v59 }
 0x342   : > { %v6115_v60 = vpop.f32.mrf.mxu0 }
 0x343   : > { %7713 = vst [vmem:[#allocation52_spill] sm:$0xff] %v6115_v60  ;;  %1833 = vmax.xlane.f32.xlu0 %v6115_v60  ;;  %v1371_v22 = vmax.f32 %v1367_v17, %v6115_v60 }
 0x344   : > { %v6118_v61 = vpop.f32.mrf.mxu0 }
 0x345   : > { %7714 = vst [vmem:[#allocation53_spill] sm:$0xff] %v6118_v61  ;;  %1823 = vmax.xlane.f32.xlu1 %v6094_v53  ;;  %v1374_v25 = vmax.f32 %v1370_v20, %v6118_v61 }
 0x346   : > { %v6121_v62 = vpop.f32.mrf.mxu0 }
 0x347   : > { %7715 = vst [vmem:[#allocation54_spill] sm:$0xff] %v6121_v62  ;;  %1837 = vmax.xlane.f32.xlu0 %v6121_v62  ;;  %v1373_v26 = vmax.f32 %v1369_v21, %v6121_v62 }
 0x348   : > { %v6124_v63 = vpop.f32.mrf.mxu0 }
 0x349   : > { %7716 = vst [vmem:[#allocation55_spill] sm:$0xff] %v6124_v63  ;;  %1827 = vmax.xlane.f32.xlu1 %v6100_v55  ;;  %v1376_v29 = vmax.f32 %v1372_v24, %v6124_v63 }
 0x34a   : > { %v6127_v3 = vpop.f32.mrf.mxu0 }
 0x34b   : > { %7717 = vst [vmem:[#allocation56_spill] sm:$0xff] %v6127_v3  ;;  %1841 = vmax.xlane.f32.xlu0 %v6127_v3  ;;  %v1375_v27 = vmax.f32 %v1371_v22, %v6127_v3 }
 0x34c   : > { %v6130_v4 = vpop.f32.mrf.mxu0 }
 0x34d   : > { %7718 = vst [vmem:[#allocation57_spill] sm:$0xff] %v6130_v4  ;;  %1831 = vmax.xlane.f32.xlu1 %v6106_v57  ;;  %v1378_v30 = vmax.f32 %v1374_v25, %v6130_v4 }
 0x34e   : > { %v6133_v5 = vpop.f32.mrf.mxu0 }
 0x34f   : > { %7719 = vst [vmem:[#allocation58_spill] sm:$0xff] %v6133_v5  ;;  %1845 = vmax.xlane.f32.xlu0 %v6133_v5  ;;  %v1377_v31 = vmax.f32 %v1373_v26, %v6133_v5 }
 0x350   : > { %v6136_v6 = vpop.f32.mrf.mxu0 }
 0x351   : > { %7720 = vst [vmem:[#allocation59_spill] sm:$0xff] %v6136_v6  ;;  %1835 = vmax.xlane.f32.xlu1 %v6112_v59  ;;  %v1380_v34 = vmax.f32 %v1376_v29, %v6136_v6 }
 0x352   : > { %v6141_v8 = vpop.f32.mrf.mxu0 }
 0x353   : > { %7721 = vst [vmem:[#allocation60_spill] sm:$0xff] %v6141_v8  ;;  %1849 = vmax.xlane.f32.xlu0 %v6141_v8  ;;  %v1379_v32 = vmax.f32 %v1375_v27, %v6141_v8 }
 0x354   : > { %v6151_v13 = vpop.f32.mrf.mxu0 }
 0x355   : > { %7722 = vst [vmem:[#allocation61_spill] sm:$0xff] %v6151_v13  ;;  %1839 = vmax.xlane.f32.xlu1 %v6118_v61  ;;  %v1382_v35 = vmax.f32 %v1378_v30, %v6151_v13 }
 0x356   : > { %v6158_v18 = vpop.f32.mrf.mxu0 }
 0x357   : > { %7723 = vst [vmem:[#allocation62_spill] sm:$0xff] %v6158_v18  ;;  %1853 = vmax.xlane.f32.xlu0 %v6158_v18  ;;  %v1381_v36 = vmax.f32 %v1377_v31, %v6158_v18 }
 0x358   : > { %v6165_v23 = vpop.f32.mrf.mxu0 }
 0x359   : > { %7724 = vst [vmem:[#allocation63_spill] sm:$0xff] %v6165_v23  ;;  %1843 = vmax.xlane.f32.xlu1 %v6124_v63  ;;  %v1384_v39 = vmax.f32 %v1380_v34, %v6165_v23 }
 0x35a   : > { %v6172_v28 = vpop.f32.mrf.mxu0 }
 0x35b   : > { %7725 = vst [vmem:[#allocation64_spill] sm:$0xff] %v6172_v28  ;;  %1857 = vmax.xlane.f32.xlu0 %v6172_v28  ;;  %v1383_v37 = vmax.f32 %v1379_v32, %v6172_v28 }
 0x35c   : > { %v6179_v33 = vpop.f32.mrf.mxu0 }
 0x35d   : > { %7726 = vst [vmem:[#allocation65_spill] sm:$0xff] %v6179_v33  ;;  %1847 = vmax.xlane.f32.xlu1 %v6130_v4  ;;  %v1386_v40 = vmax.f32 %v1382_v35, %v6179_v33  ;;  %v1387_v42 = vmax.f32 %v1383_v37, %v1384_v39 }
 0x35e   : > { %v6186_v38 = vpop.f32.mrf.mxu0 }
 0x35f   : > { %7727 = vst [vmem:[#allocation66_spill] sm:$0xff] %v6186_v38  ;;  %v1385_v41 = vmax.f32 %v1381_v36, %v6186_v38  ;;  %1861 = vmax.xlane.f32.xlu0 %v6186_v38 }
 0x361   : > { %v1388_v7 = vmax.f32 %v1385_v41, %v1386_v40  ;;  %1851 = vmax.xlane.f32.xlu1 %v6136_v6 }
 0x363   : > { %v1389_v9 = vmax.f32 %v1387_v42, %v1388_v7 }
 0x365   : > { %v1390_v10 = vrot.slane %v1389_v9, 4  ;;  %1855 = vmax.xlane.f32.xlu1 %v6151_v13 }
 0x367   : > { %v1391_v11 = vmax.f32 %v1389_v9, %v1390_v10 }
 0x369   : > { %v1392_v12 = vrot.slane %v1391_v11, 2  ;;  %1859 = vmax.xlane.f32.xlu1 %v6165_v23 }
 0x36b   : > { %v1393_v14 = vmax.f32 %v1391_v11, %v1392_v12 }
 0x36d   : > { %v1394_v15 = vrot.slane %v1393_v14, 1  ;;  %1863 = vmax.xlane.f32.xlu1 %v6179_v33 }
 0x36f   : > { %v6196_v16 = vmax.f32 %v1393_v14, %v1394_v15 }
 0x371   : > { %v1396_v17 = vsub.f32 %v6071_v44, %v6196_v16  ;;  %v1397_v19 = vsub.f32 %v6068_v43, %v6196_v16  ;;  %v1398_v20 = vsub.f32 %v6077_v46, %v6196_v16  ;;  %v1399_v21 = vsub.f32 %v6074_v45, %v6196_v16  ;;  %v6447_v44 = vld [vmem:[#allocation3 + $0x40] sm:$0xff] }
 0x372   : > { %v1400_v25 = vsub.f32 %v6082_v48, %v6196_v16  ;;  %v1401_v27 = vsub.f32 %v6079_v47, %v6196_v16  ;;  %v1402_v30 = vsub.f32 %v6087_v50, %v6196_v16  ;;  %v1403_v32 = vsub.f32 %v6084_v49, %v6196_v16 }
 0x373   : > { %v1428_v22 = vmul.f32 1.442695, %v1396_v17  ;;  %v1430_v24 = vmul.f32 1.442695, %v1397_v19  ;;  %v1432_v26 = vmul.f32 1.442695, %v1398_v20  ;;  %v1404_v35 = vsub.f32 %v6092_v52, %v6196_v16 }
 0x374   : > { %v1434_v29 = vmul.f32 1.442695, %v1399_v21  ;;  %v1436_v31 = vmul.f32 1.442695, %v1400_v25  ;;  %v1438_v34 = vmul.f32 1.442695, %v1401_v27  ;;  %v1405_v37 = vsub.f32 %v6089_v51, %v6196_v16 }
 0x375   : > { %4775 = vpow2.f32 %v1428_v22  ;;  %v1440_v36 = vmul.f32 1.442695, %v1402_v30  ;;  %v1442_v39 = vmul.f32 1.442695, %v1403_v32  ;;  %v1406_v40 = vsub.f32 %v6097_v54, %v6196_v16 }
 0x376   : > { %4777 = vpow2.f32 %v1430_v24  ;;  %v1444_v41 = vmul.f32 1.442695, %v1404_v35  ;;  %v1407_v7 = vsub.f32 %v6094_v53, %v6196_v16  ;;  %v1446_v9 = vmul.f32 1.442695, %v1405_v37 }
 0x377   : > { %4779 = vpow2.f32 %v1432_v26  ;;  %v1408_v11 = vsub.f32 %v6103_v56, %v6196_v16  ;;  %v1448_v12 = vmul.f32 1.442695, %v1406_v40  ;;  %v1409_v17 = vsub.f32 %v6100_v55, %v6196_v16  ;;  %v6408_v55 = vld [vmem:[#allocation3 + $0x30] sm:$0xff] }
 0x378   : > { %4781 = vpow2.f32 %v1434_v29  ;;  %v1450_v19 = vmul.f32 1.442695, %v1407_v7  ;;  %v1410_v22 = vsub.f32 %v6109_v58, %v6196_v16  ;;  %v1411_v27 = vsub.f32 %v6106_v57, %v6196_v16 }
 0x379   : > { %4783 = vpow2.f32 %v1436_v31  ;;  %v1452_v24 = vmul.f32 1.442695, %v1408_v11  ;;  %v1454_v29 = vmul.f32 1.442695, %v1409_v17  ;;  %v1412_v32 = vsub.f32 %v6115_v60, %v6196_v16  ;;  %v6400_v60 = vld [vmem:[#allocation3 + $0x50] sm:$0xff] }
 0x37a   : > { %4785 = vpow2.f32 %v1438_v34  ;;  %v1456_v34 = vmul.f32 1.442695, %v1410_v22  ;;  %v1413_v37 = vsub.f32 %v6112_v59, %v6196_v16  ;;  %v1414_v7 = vsub.f32 %v6121_v62, %v6196_v16 }
 0x37b   : > { %4787 = vpow2.f32 %v1440_v36  ;;  %v1416_v22 = vsub.f32 %v6127_v3, %v6196_v16  ;;  %v1423_v2 = vsub.f32 %v6151_v13, %v6196_v16 }
 0x37c   : > { %4789 = vpow2.f32 %v1442_v39  ;;  %v1458_v39 = vmul.f32 1.442695, %v1411_v27  ;;  %v1462_v17 = vmul.f32 1.442695, %v1413_v37 }
 0x37d   : > { %4791 = vpow2.f32 %v1444_v41  ;;  %v1468_v37 = vmul.f32 1.442695, %v1416_v22 }
 0x37e   : > { %4793 = vpow2.f32 %v1446_v9  ;;  %v1460_v9 = vmul.f32 1.442695, %v1412_v32 }
 0x37f   : > { %4795 = vpow2.f32 %v1448_v12 }
 0x380   : > { %4797 = vpow2.f32 %v1450_v19 }
 0x381   : > { %4799 = vpow2.f32 %v1452_v24  ;;  %v1464_v24 = vmul.f32 1.442695, %v1414_v7  ;;  %v1419_v7 = vsub.f32 %v6130_v4, %v6196_v16 }
 0x382   : > { %v6220_v42 = vpop.eup %4775  ;;  %4801 = vpow2.f32 %v1454_v29  ;;  %v1417_v29 = vsub.f32 %v6124_v63, %v6196_v16 }
 0x383   : > { %7728 = vst [vmem:[#allocation67_spill] sm:$0xff] %v6220_v42  ;;  %v6224_v10 = vpop.eup %4777  ;;  %4803 = vpow2.f32 %v1456_v34 }
 0x384   : > { %7729 = vst [vmem:[#allocation68_spill] sm:$0xff] %v6224_v10  ;;  %v1492_v14 = vadd.f32 %v6224_v10, %v6220_v42  ;;  %v6230_v15 = vpop.eup %4779  ;;  %4805 = vpow2.f32 %v1458_v39  ;;  %v6462_v10 = vld [vmem:[#allocation3 + $0x58] sm:$0xff] }
 0x385   : > { %7730 = vst [vmem:[#allocation69_spill] sm:$0xff] %v6230_v15  ;;  %v6235_v21 = vpop.eup %4781  ;;  %4807 = vpow2.f32 %v1460_v9  ;;  %v1470_v9 = vmul.f32 1.442695, %v1417_v29  ;;  %7739 = vst [vmem:[#allocation78_spill] sm:$0xff] %v6462_v10 }
 0x386   : > { %v1493_v20 = vadd.f32 %v6230_v15, %v1492_v14  ;;  %v6240_v26 = vpop.eup %4783  ;;  %v1415_v14 = vsub.f32 %v6118_v61, %v6196_v16  ;;  %4809 = vpow2.f32 %v1462_v17  ;;  %v1420_v17 = vsub.f32 %v6141_v8, %v6196_v16  ;;  %v6477_v15 = vld [vmem:[#allocation3 + $0x68] sm:$0xff] }
 0x387   : > { %v6245_v31 = vpop.eup %4785  ;;  %4811 = vpow2.f32 %v1464_v24  ;;  %7742 = vst [vmem:[#allocation81_spill] sm:$0xff] %v6477_v15 }
 0x388   : > { %v1494_v25 = vadd.f32 %v6235_v21, %v1493_v20  ;;  %v6250_v36 = vpop.eup %4787  ;;  %v1476_v1 = vmul.f32 1.442695, %v1420_v17  ;;  %v1424_v17 = vsub.f32 %v6172_v28, %v6196_v16 }
 0x389   : > { %v6255_v41 = vpop.eup %4789 }
 0x38a   : > { %v1495_v30 = vadd.f32 %v6240_v26, %v1494_v25  ;;  %v6260_v12 = vpop.eup %4791 }
 0x38b   : > { %v6265_v20 = vpop.eup %4793 }
 0x38c   : > { %v1496_v35 = vadd.f32 %v6245_v31, %v1495_v30  ;;  %v6270_v27 = vpop.eup %4795  ;;  %v1466_v30 = vmul.f32 1.442695, %v1415_v14 }
 0x38d   : > { %v6275_v34 = vpop.eup %4797 }
 0x38e   : > { %v1497_v40 = vadd.f32 %v6250_v36, %v1496_v35  ;;  %v1418_v35 = vsub.f32 %v6133_v5, %v6196_v16  ;;  %4813 = vpow2.f32 %v1466_v30  ;;  %v6364_v5 = vld [vmem:[#allocation3 + $0x28] sm:$0xff] }
 0x38f   : > { %4815 = vpow2.f32 %v1468_v37  ;;  %v6300_v37 = vpop.permute.xlu0 %1635 }
 0x390   : > { %v1498_v11 = vadd.f32 %v6255_v41, %v1497_v40  ;;  %v6280_v40 = vpop.eup %4799  ;;  %4817 = vpow2.f32 %v1470_v9  ;;  %7731 = vst [vmem:[#allocation70_spill] sm:$0xff] %v6300_v37 }
 0x391   : > { %v6285_v14 = vpop.eup %4801 }
 0x392   : > { %v1499_v19 = vadd.f32 %v6260_v12, %v1498_v11  ;;  %v6290_v24 = vpop.eup %4803 }
 0x393   : > { %v6295_v30 = vpop.eup %4805 }
 0x394   : > { %v1500_v25 = vadd.f32 %v6265_v20, %v1499_v19  ;;  %v1472_v19 = vmul.f32 1.442695, %v1418_v35 }
 0x396   : > { %v1501_v32 = vadd.f32 %v6270_v27, %v1500_v25  ;;  %v1421_v25 = vsub.f32 %v6136_v6, %v6196_v16  ;;  %4819 = vpow2.f32 %v1472_v19 }
 0x398   : > { %v1502_v39 = vadd.f32 %v6275_v34, %v1501_v32  ;;  %v1474_v32 = vmul.f32 1.442695, %v1419_v7  ;;  %v1478_v7 = vmul.f32 1.442695, %v1421_v25 }
 0x39a   : > { %v1503_v11 = vadd.f32 %v6280_v40, %v1502_v39  ;;  %v1422_v39 = vsub.f32 %v6158_v18, %v6196_v16  ;;  %4821 = vpow2.f32 %v1474_v32  ;;  %v6314_v18 = vld [vmem:[#allocation3] sm:$0xff]  ;;  %v1425_v32 = vsub.f32 %v6165_v23, %v6196_v16 }
 0x39b   : > { %4823 = vpow2.f32 %v1476_v1  ;;  %v6324_v1 = vld [vmem:[#allocation3 + $0x18] sm:$0xff] }
 0x39c   : > { %v1504_v22 = vadd.f32 %v6285_v14, %v1503_v11  ;;  %v6302_v11 = vpop.eup %4807  ;;  %v1480_v19 = vmul.f32 1.442695, %v1422_v39  ;;  %4825 = vpow2.f32 %v1478_v7 }
 0x39d   : > { %7732 = vst [vmem:[#allocation71_spill] sm:$0xff] %v6302_v11  ;;  %v6309_v6 = vpop.eup %4809 }
 0x39e   : > { %v1505_v29 = vadd.f32 %v6290_v24, %v1504_v22  ;;  %v6307_v22 = vld [vmem:[#allocation3 + $0x8] sm:$0xff]  ;;  %7733 = vst [vmem:[#allocation72_spill] sm:$0xff] %v6309_v6  ;;  %v6316_v13 = vpop.eup %4811  ;;  %4827 = vpow2.f32 %v1480_v19  ;;  %v6348_v19 = vld [vmem:[#allocation3 + $0x10] sm:$0xff] }
 0x39f   : > { %7734 = vst [vmem:[#allocation73_spill] sm:$0xff] %v6316_v13  ;;  %v6326_v39 = vpop.eup %4813 }
 0x3a0   : > { %v1506_v35 = vadd.f32 %v6295_v30, %v1505_v29  ;;  %v6337_v23 = vpop.eup %4815 }
 0x3a2   : > { %v1507_v9 = vadd.f32 %v6302_v11, %v1506_v35  ;;  %v1482_v35 = vmul.f32 1.442695, %v1423_v2  ;;  %v1484_v2 = vmul.f32 1.442695, %v1424_v17 }
 0x3a4   : > { %v1508_v29 = vadd.f32 %v6309_v6, %v1507_v9  ;;  %4829 = vpow2.f32 %v1482_v35 }
 0x3a5   : > { %4831 = vpow2.f32 %v1484_v2 }
 0x3a6   : > { %v1509_v8 = vadd.f32 %v6316_v13, %v1508_v29 }
 0x3a8   : > { %v1510_v7 = vadd.f32 %v6326_v39, %v1509_v8  ;;  %v6350_v8 = vpop.eup %4817 }
 0x3aa   : > { %v1804_v37 = vpop.xlane.xlu1 %1803  ;;  %v1511_v17 = vadd.f32 %v6337_v23, %v1510_v7 }
 0x3ab   : > { %v6319_v25 = vmax.f32 %v6307_v22, %v1804_v37  ;;  %v1426_v37 = vsub.f32 %v6186_v38, %v6196_v16  ;;  %v1486_v38 = vmul.f32 1.442695, %v1425_v32 }
 0x3ac   : > { %v1802_v28 = vpop.xlane.xlu0 %1801  ;;  %v1512_v63 = vadd.f32 %v6350_v8, %v1511_v17 }
 0x3ad   : > { %2988 = vst.msk [vmem:[#allocation3 + $0x8] sm:$0xff] %vm2441_vm3, %v6319_v25  ;;  %v6331_v9 = vmax.f32 %v6314_v18, %v1802_v28  ;;  %2032 = vperm.xlu1 %4774, %v6319_v25   ;;  %v1427_v28 = vsub.f32 %v6179_v33, %v6196_v16  ;;  %v6357_v16 = vpop.eup %4819  ;;  %4833 = vpow2.f32 %v1486_v38 }
 0x3ae   : > { %v1808_v29 = vpop.xlane.xlu1 %1807  ;;  %v1513_v7 = vadd.f32 %v6357_v16, %v1512_v63  ;;  %v6366_v33 = vpop.eup %4821 }
 0x3af   : > { %2987 = vst.msk [vmem:[#allocation3] sm:$0xff] %vm2441_vm3, %v6331_v9  ;;  %v6342_v4 = vmax.f32 %v6324_v1, %v1808_v29  ;;  %2027 = vperm.xlu0 %4773, %v6331_v9   ;;  %v1488_v29 = vmul.f32 1.442695, %v1426_v37  ;;  %v1490_v35 = vmul.f32 1.442695, %v1427_v28  ;;  %v6372_v2 = vpop.eup %4823  ;;  %v6378_v28 = vld [vmem:[#allocation3 + $0x20] sm:$0xff] }
 0x3b0   : > { %v1514_v37 = vadd.f32 %v6366_v33, %v1513_v7  ;;  %v6380_v17 = vpop.eup %4825 }
 0x3b1   : > { %2990 = vst.msk [vmem:[#allocation3 + $0x18] sm:$0xff] %vm2441_vm3, %v6342_v4  ;;  %4835 = vpow2.f32 %v1488_v29  ;;  %v6386_v61 = vpop.eup %4827 }
 0x3b2   : > { %v1806_v3 = vpop.xlane.xlu1 %1805  ;;  %4837 = vpow2.f32 %v1490_v35  ;;  %v1515_v63 = vadd.f32 %v6372_v2, %v1514_v37  ;;  %v6392_v37 = vld [vmem:[#allocation3 + $0x38] sm:$0xff]  ;;  %v6394_v62 = vpop.eup %4829 }
 0x3b3   : > { %v6360_v32 = vmax.f32 %v6348_v19, %v1806_v3  ;;  %2042 = vperm.xlu0 %4773, %v6342_v4   ;;  %v6402_v57 = vpop.eup %4831 }
 0x3b4   : > { %v1516_v29 = vadd.f32 %v6380_v17, %v1515_v63 }
 0x3b5   : > { %2989 = vst.msk [vmem:[#allocation3 + $0x10] sm:$0xff] %vm2441_vm3, %v6360_v32  ;;  %2037 = vperm.xlu1 %4774, %v6360_v32  }
 0x3b6   : > { %v1812_v3 = vpop.xlane.xlu1 %1811  ;;  %v1517_v35 = vadd.f32 %v6386_v61, %v1516_v29 }
 0x3b7   : > { %v6375_v38 = vmax.f32 %v6364_v5, %v1812_v3 }
 0x3b8   : > { %v1518_v59 = vadd.f32 %v6394_v62, %v1517_v35 }
 0x3b9   : > { %2992 = vst.msk [vmem:[#allocation3 + $0x28] sm:$0xff] %vm2441_vm3, %v6375_v38  ;;  %2052 = vperm.xlu0 %4773, %v6375_v38  }
 0x3ba   : > { %v1810_v7 = vpop.xlane.xlu1 %1809  ;;  %v1519_v29 = vadd.f32 %v6402_v57, %v1518_v59  ;;  %v6410_v56 = vpop.eup %4833 }
 0x3bb   : > { %v6389_v3 = vmax.f32 %v6378_v28, %v1810_v7 }
 0x3bc   : > { %v1520_v53 = vadd.f32 %v6410_v56, %v1519_v29 }
 0x3bd   : > { %2991 = vst.msk [vmem:[#allocation3 + $0x20] sm:$0xff] %vm2441_vm3, %v6389_v3  ;;  %2047 = vperm.xlu1 %4774, %v6389_v3  }
 0x3be   : > { %v1816_v63 = vpop.xlane.xlu1 %1815  ;;  %v6421_v51 = vpop.eup %4835 }
 0x3bf   : > { %v6405_v7 = vmax.f32 %v6392_v37, %v1816_v63  ;;  %v6419_v63 = vld [vmem:[#allocation3 + $0x60] sm:$0xff]  ;;  %v1521_v52 = vadd.f32 %v6421_v51, %v1520_v53  ;;  %v6431_v50 = vpop.eup %4837 }
 0x3c0   : > { %v1822_v58 = vpop.xlane.xlu0 %1821  ;;  %7735 = vst [vmem:[#allocation74_spill] sm:$0xff] %v6419_v63 }
 0x3c1   : > { %2994 = vst.msk [vmem:[#allocation3 + $0x38] sm:$0xff] %vm2441_vm3, %v6405_v7  ;;  %v6415_v35 = vmax.f32 %v6400_v60, %v1822_v58  ;;  %2062 = vperm.xlu0 %4773, %v6405_v7   ;;  %v6429_v58 = vld [vmem:[#allocation3 + $0x48] sm:$0xff]  ;;  %v1522_v47 = vadd.f32 %v6431_v50, %v1521_v52 }
 0x3c2   : > { %v1814_v54 = vpop.xlane.xlu1 %1813 }
 0x3c3   : > { %2997 = vst.msk [vmem:[#allocation3 + $0x50] sm:$0xff] %vm2441_vm3, %v6415_v35  ;;  %v6426_v59 = vmax.f32 %v6408_v55, %v1814_v54  ;;  %v6440_v54 = vld [vmem:[#allocation3 + $0x70] sm:$0xff]  ;;  %v1523_v45 = vrot.slane %v1522_v47, 4 }
 0x3c4   : > { %v1826_v49 = vpop.xlane.xlu0 %1825  ;;  %7736 = vst [vmem:[#allocation75_spill] sm:$0xff] %v6440_v54 }
 0x3c5   : > { %2993 = vst.msk [vmem:[#allocation3 + $0x30] sm:$0xff] %vm2441_vm3, %v6426_v59  ;;  %v6436_v29 = vmax.f32 %v6419_v63, %v1826_v49  ;;  %2057 = vperm.xlu1 %4774, %v6426_v59   ;;  %v1524_v52 = vadd.f32 %v1523_v45, %v1522_v47 }
 0x3c6   : > { %v1820_v48 = vpop.xlane.xlu1 %1819 }
 0x3c7   : > { %2999 = vst.msk [vmem:[#allocation3 + $0x60] sm:$0xff] %vm2441_vm3, %v6436_v29  ;;  %v6445_v53 = vmax.f32 %v6429_v58, %v1820_v48  ;;  %v1525_v42 = vrot.slane %v1524_v52, 2 }
 0x3c8   : > { %v1830_v46 = vpop.xlane.xlu0 %1829 }
 0x3c9   : > { %2996 = vst.msk [vmem:[#allocation3 + $0x48] sm:$0xff] %vm2441_vm3, %v6445_v53  ;;  %v6452_v49 = vmax.f32 %v6440_v54, %v1830_v46  ;;  %2072 = vperm.xlu0 %4773, %v6445_v53   ;;  %v1526_v45 = vadd.f32 %v1525_v42, %v1524_v52  ;;  %v6470_v54 = vld [vmem:[#allocation3 + $0x90] sm:$0xff] }
 0x3ca   : > { %v1818_v43 = vpop.xlane.xlu1 %1817  ;;  %7741 = vst [vmem:[#allocation80_spill] sm:$0xff] %v6470_v54 }
 0x3cb   : > { %7737 = vst [vmem:[#allocation76_spill] sm:$0xff] %v6452_v49  ;;  %3001 = vst.msk [vmem:[#allocation3 + $0x70] sm:$0xff] %vm2441_vm3, %v6452_v49  ;;  %v6460_v48 = vmax.f32 %v6447_v44, %v1818_v43  ;;  %v1527_v63 = vrot.slane %v1526_v45, 1 }
 0x3cc   : > { %v1834_v11 = vpop.xlane.xlu0 %1833 }
 0x3cd   : > { %2995 = vst.msk [vmem:[#allocation3 + $0x40] sm:$0xff] %vm2441_vm3, %v6460_v48  ;;  %v6467_v46 = vmax.f32 %v6455_v0, %v1834_v11  ;;  %2067 = vperm.xlu1 %4774, %v6460_v48   ;;  %v1528_v42 = vadd.f32 %v1527_v63, %v1526_v45  ;;  %v6486_v0 = vld [vmem:[#allocation3 + $0xa0] sm:$0xff]  ;;  %v6502_v45 = vld [vmem:[#allocation3 + $0xb0] sm:$0xff] }
 0x3ce   : > { %v1824_v47 = vpop.xlane.xlu1 %1823  ;;  %7744 = vst [vmem:[#allocation83_spill] sm:$0xff] %v6486_v0  ;;  %7747 = vst [vmem:[#allocation86_spill] sm:$0xff] %v6502_v45 }
 0x3cf   : > { %7740 = vst [vmem:[#allocation79_spill] sm:$0xff] %v6467_v46  ;;  %3003 = vst.msk [vmem:[#allocation3 + $0x80] sm:$0xff] %vm2441_vm3, %v6467_v46  ;;  %v6475_v43 = vmax.f32 %v6462_v10, %v1824_v47  ;;  %4839 = vrcp.f32 %v1528_v42  ;;  %v6493_v10 = vld [vmem:[#allocation3 + $0x78] sm:$0xff] }
 0x3d0   : > { %v1838_v6 = vpop.xlane.xlu0 %1837  ;;  %7746 = vst [vmem:[#allocation85_spill] sm:$0xff] %v6493_v10 }
 0x3d1   : > { %2998 = vst.msk [vmem:[#allocation3 + $0x58] sm:$0xff] %vm2441_vm3, %v6475_v43  ;;  %v6482_v11 = vmax.f32 %v6470_v54, %v1838_v6  ;;  %2077 = vperm.xlu1 %4774, %v6415_v35   ;;  %2082 = vperm.xlu0 %4773, %v6475_v43   ;;  %v6509_v54 = vld [vmem:[#allocation3 + $0x88] sm:$0xff] }
 0x3d2   : > { %v1828_v52 = vpop.xlane.xlu1 %1827  ;;  %7749 = vst [vmem:[#allocation88_spill] sm:$0xff] %v6509_v54 }
 0x3d3   : > { %7743 = vst [vmem:[#allocation82_spill] sm:$0xff] %v6482_v11  ;;  %3005 = vst.msk [vmem:[#allocation3 + $0x90] sm:$0xff] %vm2441_vm3, %v6482_v11  ;;  %v6491_v47 = vmax.f32 %v6477_v15, %v1828_v52  ;;  %v6518_v15 = vld [vmem:[#allocation3 + $0xc0] sm:$0xff] }
 0x3d4   : > { %v1842_v13 = vpop.xlane.xlu0 %1841  ;;  %7750 = vst [vmem:[#allocation89_spill] sm:$0xff] %v6518_v15 }
 0x3d5   : > { %7745 = vst [vmem:[#allocation84_spill] sm:$0xff] %v6491_v47  ;;  %3000 = vst.msk [vmem:[#allocation3 + $0x68] sm:$0xff] %vm2441_vm3, %v6491_v47  ;;  %v6498_v6 = vmax.f32 %v6486_v0, %v1842_v13  ;;  %2087 = vperm.xlu1 %4774, %v6436_v29   ;;  %2092 = vperm.xlu0 %4773, %v6491_v47   ;;  %v6525_v47 = vld [vmem:[#allocation3 + $0x98] sm:$0xff] }
 0x3d6   : > { %v1832_v63 = vpop.xlane.xlu1 %1831  ;;  %7752 = vst [vmem:[#allocation91_spill] sm:$0xff] %v6525_v47 }
 0x3d7   : > { %3007 = vst.msk [vmem:[#allocation3 + $0xa0] sm:$0xff] %vm2441_vm3, %v6498_v6  ;;  %v6507_v42 = vmax.f32 %v6493_v10, %v1832_v63 }
 0x3d8   : > { %v1846_v52 = vpop.xlane.xlu0 %1845 }
 0x3d9   : > { %7748 = vst [vmem:[#allocation87_spill] sm:$0xff] %v6507_v42  ;;  %3002 = vst.msk [vmem:[#allocation3 + $0x78] sm:$0xff] %vm2441_vm3, %v6507_v42  ;;  %v6514_v13 = vmax.f32 %v6502_v45, %v1846_v52  ;;  %2097 = vperm.xlu1 %4774, %v6452_v49   ;;  %2102 = vperm.xlu0 %4773, %v6507_v42   ;;  %v6534_v42 = vld [vmem:[#allocation3 + $0xd0] sm:$0xff] }
 0x3da   : > { %v1836_v0 = vpop.xlane.xlu1 %1835  ;;  %7753 = vst [vmem:[#allocation92_spill] sm:$0xff] %v6534_v42 }
 0x3db   : > { %3009 = vst.msk [vmem:[#allocation3 + $0xb0] sm:$0xff] %vm2441_vm3, %v6514_v13  ;;  %v6523_v63 = vmax.f32 %v6509_v54, %v1836_v0 }
 0x3dc   : > { %v1850_v10 = vpop.xlane.xlu0 %1849  ;;  %v6541_v49 = vpop.eup %4839 }
 0x3dd   : > { %7751 = vst [vmem:[#allocation90_spill] sm:$0xff] %v6523_v63  ;;  %3004 = vst.msk [vmem:[#allocation3 + $0x88] sm:$0xff] %vm2441_vm3, %v6523_v63  ;;  %v6530_v52 = vmax.f32 %v6518_v15, %v1850_v10  ;;  %2107 = vperm.xlu1 %4774, %v6467_v46   ;;  %2112 = vperm.xlu0 %4773, %v6523_v63   ;;  %v6550_v15 = vld [vmem:[#allocation3 + $0xa8] sm:$0xff]  ;;  %v1561_v63 = vmul.f32 %v6541_v49, %v6431_v50  ;;  %v6556_v46 = vld [vmem:[#allocation3 + $0xe0] sm:$0xff] }
 0x3de   : > { %v1840_v45 = vpop.xlane.xlu1 %1839  ;;  %v1544_v50 = vmul.f32 %v6541_v49, %v6290_v24  ;;  %v1543_v24 = vmul.f32 %v6541_v49, %v6285_v14  ;;  %v1542_v14 = vmul.f32 %v6541_v49, %v6280_v40  ;;  %v1541_v40 = vmul.f32 %v6541_v49, %v6275_v34 }
 0x3df   : > { %3011 = vst.msk [vmem:[#allocation3 + $0xc0] sm:$0xff] %vm2441_vm3, %v6530_v52  ;;  %v6539_v0 = vmax.f32 %v6525_v47, %v1840_v45  ;;  %v1545_v45 = vmul.f32 %v6541_v49, %v6295_v30  ;;  %4355 = vmatprep.subr.mxu0 %v1561_v63  ;;  %v1930_v63 = vsub.f32 %v6307_v22, %v6319_v25 }
 0x3e0   : > { %v1854_v54 = vpop.xlane.xlu0 %1853  ;;  %v1558_v25 = vmul.f32 %v6541_v49, %v6402_v57  ;;  %v1557_v57 = vmul.f32 %v6541_v49, %v6394_v62  ;;  %v1540_v34 = vmul.f32 %v6541_v49, %v6270_v27  ;;  %v1539_v27 = vmul.f32 %v6541_v49, %v6265_v20 }
 0x3e1   : > { %7754 = vst [vmem:[#allocation93_spill] sm:$0xff] %v6539_v0  ;;  %3006 = vst.msk [vmem:[#allocation3 + $0x98] sm:$0xff] %vm2441_vm3, %v6539_v0  ;;  %v6546_v10 = vmax.f32 %v6534_v42, %v1854_v54  ;;  %2117 = vperm.xlu1 %4774, %v6482_v11   ;;  %2122 = vperm.xlu0 %4773, %v6539_v0   ;;  %v1560_v54 = vmul.f32 %v6541_v49, %v6421_v51  ;;  %v6565_v11 = vld [vmem:[#allocation3 + $0xb8] sm:$0xff] }
 0x3e2   : > { %v1844_v47 = vpop.xlane.xlu1 %1843  ;;  %4356 = vmatpush3.msra.mxu0 %v1545_v45  ;;  %v1559_v51 = vmul.f32 %v6541_v49, %v6410_v56  ;;  %v6580_v45 = vld [vmem:[#allocation3 + $0xf0] sm:$0xff]  ;;  %v1929_v56 = vsub.f32 %v6314_v18, %v6331_v9  ;;  %v1963_v18 = vmul.f32 1.442695, %v1930_v63  ;;  %v1538_v20 = vmul.f32 %v6541_v49, %v6260_v12 }
 0x3e3   : > { %3013 = vst.msk [vmem:[#allocation3 + $0xd0] sm:$0xff] %vm2441_vm3, %v6546_v10  ;;  %v6563_v42 = vmax.f32 %v6550_v15, %v1844_v47  ;;  %4357 = vmatprep.subr.mxu0 %v1560_v54  ;;  %v6593_v54 = vld [vmem:[#allocation3 + $0xc8] sm:$0xff]  ;;  %v1537_v12 = vmul.f32 %v6541_v49, %v6255_v41  ;;  %v1551_v41 = vmul.f32 %v6541_v49, %v6350_v8 }
 0x3e4   : > { %v1858_v0 = vpop.xlane.xlu0 %1857  ;;  %4358 = vmatpush3.msra.mxu0 %v1544_v50  ;;  %v1961_v62 = vmul.f32 1.442695, %v1929_v56  ;;  %4841 = vpow2.f32 %v1963_v18  ;;  %v6643_v18 = vld [vmem:[#allocation3 + $0xe8] sm:$0xff]  ;;  %v1550_v8 = vmul.f32 %v6541_v49, %v6337_v23  ;;  %v1939_v23 = vsub.f32 %v6400_v60, %v6415_v35  ;;  %v7758_v60 = vld [vmem:[#allocation69_spill] sm:$0xff] }
 0x3e5   : > { %v6570_v30 = vmax.f32 %v6556_v46, %v1858_v0  ;;  %2127 = vperm.xlu1 %4774, %v6498_v6   ;;  %3008 = vst.msk [vmem:[#allocation3 + $0xa8] sm:$0xff] %vm2441_vm3, %v6563_v42  ;;  %2132 = vperm.xlu0 %4773, %v6563_v42   ;;  %v1532_v35 = vmul.f32 %v6541_v49, %v7758_v60 }
 0x3e6   : > { %v1848_v47 = vpop.xlane.xlu1 %1847  ;;  %4359 = vmatprep.subr.mxu0 %v1559_v51  ;;  %v1931_v51 = vsub.f32 %v6348_v19, %v6360_v32  ;;  %v1933_v19 = vsub.f32 %v6378_v28, %v6389_v3  ;;  %v1555_v32 = vmul.f32 %v6541_v49, %v6380_v17  ;;  %4843 = vpow2.f32 %v1961_v62 }
 0x3e7   : > { %3015 = vst.msk [vmem:[#allocation3 + $0xe0] sm:$0xff] %vm2441_vm3, %v6570_v30  ;;  %v6587_v22 = vmax.f32 %v6565_v11, %v1848_v47  ;;  %4360 = vmatpush3.msra.mxu0 %v1543_v24  ;;  %v1556_v24 = vmul.f32 %v6541_v49, %v6386_v61  ;;  %v7755_v28 = vsub.f32 %v6324_v1, %v6342_v4 }
 0x3e8   : > { %v1862_v0 = vpop.xlane.xlu0 %1861  ;;  %4361 = vmatprep.subr.mxu0 %v1558_v25  ;;  %v6619_v25 = vld [vmem:[#allocation3 + $0xd8] sm:$0xff]  ;;  %v1965_v56 = vmul.f32 1.442695, %v1931_v51  ;;  %v1934_v17 = vsub.f32 %v6364_v5, %v6375_v38  ;;  %v1969_v4 = vmul.f32 1.442695, %v1933_v19  ;;  %v1553_v5 = vmul.f32 %v6541_v49, %v6366_v33 }
 0x3e9   : > { %3010 = vst.msk [vmem:[#allocation3 + $0xb8] sm:$0xff] %vm2441_vm3, %v6587_v22  ;;  %v6600_v50 = vmax.f32 %v6580_v45, %v1862_v0  ;;  %2137 = vperm.xlu1 %4774, %v6514_v13   ;;  %2142 = vperm.xlu0 %4773, %v6587_v22   ;;  %v1967_v3 = vmul.f32 1.442695, %v7755_v28  ;;  %v1552_v33 = vmul.f32 %v6541_v49, %v6357_v16  ;;  %v6664_v51 = vld [vmem:[#allocation3 + $0xf8] sm:$0xff] }
 0x3ea   : > { %v1852_v9 = vpop.xlane.xlu1 %1851  ;;  %4362 = vmatpush3.msra.mxu0 %v1542_v14  ;;  %v1554_v14 = vmul.f32 %v6541_v49, %v6372_v2  ;;  %4845 = vpow2.f32 %v1965_v56  ;;  %v1935_v2 = vsub.f32 %v6408_v55, %v6426_v59  ;;  %v1536_v55 = vmul.f32 %v6541_v49, %v6250_v36 }
 0x3eb   : > { %3017 = vst.msk [vmem:[#allocation3 + $0xf0] sm:$0xff] %vm2441_vm3, %v6600_v50  ;;  %v6615_v63 = vmax.f32 %v6593_v54, %v1852_v9  ;;  %4363 = vmatprep.subr.mxu0 %v1557_v57  ;;  %4847 = vpow2.f32 %v1967_v3  ;;  %v1971_v57 = vmul.f32 1.442695, %v1934_v17  ;;  %v1936_v9 = vsub.f32 %v6392_v37, %v6405_v7  ;;  %v7761_v3 = vld [vmem:[#allocation68_spill] sm:$0xff] }
 0x3ec   : > { %4364 = vmatpush3.msra.mxu0 %v1541_v40  ;;  %4849 = vpow2.f32 %v1969_v4  ;;  %v1973_v16 = vmul.f32 1.442695, %v1935_v2  ;;  %v1937_v7 = vsub.f32 %v6447_v44, %v6460_v48  ;;  %v1535_v36 = vmul.f32 %v6541_v49, %v6245_v31  ;;  %v7762_v4 = vld [vmem:[#allocation84_spill] sm:$0xff]  ;;  %v7764_v2 = vld [vmem:[#allocation71_spill] sm:$0xff] }
 0x3ed   : > { %3012 = vst.msk [vmem:[#allocation3 + $0xc8] sm:$0xff] %vm2441_vm3, %v6615_v63  ;;  %2147 = vperm.xlu1 %4774, %v6530_v52   ;;  %4365 = vmatprep.subr.mxu0 %v1556_v24  ;;  %4851 = vpow2.f32 %v1971_v57  ;;  %v1975_v40 = vmul.f32 1.442695, %v1936_v9  ;;  %v1938_v62 = vsub.f32 %v6429_v58, %v6445_v53  ;;  %v1534_v44 = vmul.f32 %v6541_v49, %v6240_v26  ;;  %v7806_v48 = vld [vmem:[#allocation55_spill] sm:$0xff] }
 0x3ee   : > { %2152 = vperm.xlu0 %4773, %v6615_v63   ;;  %v1856_v61 = vpop.xlane.xlu1 %1855  ;;  %4366 = vmatpush3.msra.mxu0 %v1540_v34  ;;  %v1549_v31 = vmul.f32 %v6541_v49, %v6326_v39  ;;  %4853 = vpow2.f32 %v1973_v16  ;;  %v1977_v58 = vmul.f32 1.442695, %v1937_v7  ;;  %v1533_v26 = vmul.f32 %v6541_v49, %v6235_v21  ;;  %v7756_v34 = vld [vmem:[#allocation78_spill] sm:$0xff]  ;;  %v7757_v39 = vld [vmem:[#allocation73_spill] sm:$0xff]  ;;  %v7759_v21 = vld [vmem:[#allocation72_spill] sm:$0xff] }
 0x3ef   : > { %v6634_v0 = vmax.f32 %v6619_v25, %v1856_v61  ;;  %4367 = vmatprep.subr.mxu0 %v1555_v32  ;;  %4855 = vpow2.f32 %v1975_v40  ;;  %v1979_v24 = vmul.f32 1.442695, %v1938_v62  ;;  %v1940_v19 = vsub.f32 %v7756_v34, %v6475_v43  ;;  %v7760_v43 = vld [vmem:[#allocation74_spill] sm:$0xff]  ;;  %v7769_v40 = vld [vmem:[#allocation85_spill] sm:$0xff] }
 0x3f0   : > { %4368 = vmatpush3.msra.mxu0 %v1539_v27  ;;  %v1548_v32 = vmul.f32 %v6541_v49, %v7757_v39  ;;  %v1547_v56 = vmul.f32 %v6541_v49, %v7759_v21  ;;  %v1981_v27 = vmul.f32 1.442695, %v1939_v23  ;;  %v1941_v28 = vsub.f32 %v7760_v43, %v6436_v29  ;;  %v7765_v29 = vld [vmem:[#allocation67_spill] sm:$0xff]  ;;  %v7772_v23 = vld [vmem:[#allocation77_spill] sm:$0xff]  ;;  %v7773_v34 = vld [vmem:[#allocation90_spill] sm:$0xff] }
 0x3f1   : > { %3014 = vst.msk [vmem:[#allocation3 + $0xd8] sm:$0xff] %vm2441_vm3, %v6634_v0  ;;  %2157 = vperm.xlu1 %4774, %v6546_v10   ;;  %4369 = vmatprep.subr.mxu0 %v1554_v14  ;;  %v6699_v53 = vpop.eup %4841  ;;  %4857 = vpow2.f32 %v1977_v58  ;;  %v1531_v17 = vmul.f32 %v6541_v49, %v7761_v3  ;;  %v1530_v9 = vmul.f32 %v6541_v49, %v7765_v29  ;;  %v7776_v21 = vld [vmem:[#allocation80_spill] sm:$0xff]  ;;  %v7778_v3 = vld [vmem:[#allocation91_spill] sm:$0xff] }
 0x3f2   : > { %2162 = vperm.xlu0 %4773, %v6634_v0   ;;  %v1860_v1 = vpop.xlane.xlu1 %1859  ;;  %4370 = vmatpush3.msra.mxu0 %v1538_v20  ;;  %4859 = vpow2.f32 %v1979_v24  ;;  %v1983_v20 = vmul.f32 1.442695, %v1940_v19  ;;  %v7774_v19 = vld [vmem:[#allocation88_spill] sm:$0xff]  ;;  %v1950_v29 = vsub.f32 %v6550_v15, %v6563_v42  ;;  %v7781_v42 = vld [vmem:[#allocation89_spill] sm:$0xff] }
 0x3f3   : > { %v6658_v38 = vmax.f32 %v6643_v18, %v1860_v1  ;;  %4371 = vmatprep.subr.mxu0 %v1553_v5  ;;  %v6705_v61 = vpop.eup %4843  ;;  %v7763_v5 = vld [vmem:[#allocation81_spill] sm:$0xff]  ;;  %4861 = vpow2.f32 %v1981_v27  ;;  %v1946_v39 = vsub.f32 %v7774_v19, %v7773_v34 }
 0x3f4   : > { %4372 = vmatpush3.msra.mxu0 %v1537_v12  ;;  %v1942_v1 = vsub.f32 %v7763_v5, %v7762_v4  ;;  %v1546_v12 = vmul.f32 %v6541_v49, %v7764_v2  ;;  %4863 = vpow2.f32 %v1983_v20  ;;  %v7779_v5 = vld [vmem:[#allocation83_spill] sm:$0xff] }
 0x3f5   : > { %3016 = vst.msk [vmem:[#allocation3 + $0xe8] sm:$0xff] %vm2441_vm3, %v6658_v38  ;;  %2167 = vperm.xlu1 %4774, %v6570_v30   ;;  %4373 = vmatprep.subr.mxu0 %v1552_v33  ;;  %v1995_v43 = vmul.f32 1.442695, %v1946_v39  ;;  %v1958_v19 = vsub.f32 %v6643_v18, %v6658_v38 }
 0x3f6   : > { %2172 = vperm.xlu0 %4773, %v6658_v38   ;;  %v1864_v37 = vpop.xlane.xlu1 %1863  ;;  %4374 = vmatpush3.msra.mxu0 %v1536_v55  ;;  %v1985_v55 = vmul.f32 1.442695, %v1941_v28  ;;  %v1987_v7 = vmul.f32 1.442695, %v1942_v1  ;;  %v7777_v28 = vld [vmem:[#allocation93_spill] sm:$0xff]  ;;  %v1949_v1 = vsub.f32 %v7779_v5, %v6498_v6 }
 0x3f7   : > { %v6679_v59 = vmax.f32 %v6664_v51, %v1864_v37  ;;  %4375 = vmatprep.subr.mxu0 %v1551_v41  ;;  %v6717_v14 = vpop.eup %4845  ;;  %v7766_v41 = vld [vmem:[#allocation76_spill] sm:$0xff]  ;;  %v7767_v37 = vld [vmem:[#allocation75_spill] sm:$0xff]  ;;  %v2003_v6 = vmul.f32 1.442695, %v1950_v29 }
 0x3f8   : > { %4376 = vmatpush3.msra.mxu0 %v1535_v36  ;;  %v6723_v57 = vpop.eup %4847  ;;  %v1943_v16 = vsub.f32 %v7767_v37, %v7766_v41  ;;  %v7768_v36 = vld [vmem:[#allocation87_spill] sm:$0xff]  ;;  %4865 = vpow2.f32 %v1985_v55  ;;  %v2001_v55 = vmul.f32 1.442695, %v1949_v1  ;;  %v7780_v41 = vld [vmem:[#allocation86_spill] sm:$0xff] }
 0x3f9   : > { %3018 = vst.msk [vmem:[#allocation3 + $0xf8] sm:$0xff] %vm2441_vm3, %v6679_v59  ;;  %2177 = vperm.xlu1 %4774, %v6600_v50   ;;  %4377 = vmatprep.subr.mxu0 %v1550_v8  ;;  %v6729_v33 = vpop.eup %4849  ;;  %v1944_v62 = vsub.f32 %v7769_v40, %v7768_v36  ;;  %v7770_v8 = vld [vmem:[#allocation32_spill] sm:$0xff]  ;;  %4867 = vpow2.f32 %v1987_v7  ;;  %v1951_v37 = vsub.f32 %v7780_v41, %v6514_v13  ;;  %v7785_v1 = vld [vmem:[#allocation35_spill] sm:$0xff] }
 0x3fa   : > { %2182 = vperm.xlu0 %4773, %v6679_v59   ;;  %4378 = vmatpush3.msra.mxu0 %v1534_v44  ;;  %v6736_v49 = vpop.eup %4851  ;;  %v1989_v44 = vmul.f32 1.442695, %v1943_v16  ;;  %v1952_v7 = vsub.f32 %v6565_v11, %v6587_v22  ;;  %v1953_v40 = vsub.f32 %v7781_v42, %v6530_v52  ;;  %v7782_v22 = vld [vmem:[#allocation92_spill] sm:$0xff] }
 0x3fb   : > { %4379 = vmatprep.subr.mxu0 %v1549_v31  ;;  %v7771_v31 = vld [vmem:[#allocation79_spill] sm:$0xff]  ;;  %v1991_v24 = vmul.f32 1.442695, %v1944_v62  ;;  %v2005_v15 = vmul.f32 1.442695, %v1951_v37  ;;  %v7786_v41 = vld [vmem:[#allocation36_spill] sm:$0xff] }
 0x3fc   : > { %4380 = vmatpush3.msra.mxu0 %v1533_v26  ;;  %v1945_v58 = vsub.f32 %v7772_v23, %v7771_v31  ;;  %v6742_v26 = vpop.eup %4853  ;;  %4869 = vpow2.f32 %v1989_v44  ;;  %v2007_v13 = vmul.f32 1.442695, %v1952_v7  ;;  %v2009_v11 = vmul.f32 1.442695, %v1953_v40  ;;  %v7787_v7 = vld [vmem:[#allocation38_spill] sm:$0xff] }
 0x3fd   : > { %2513 = vperm.xlu1 %4774, %v6699_v53   ;;  %4381 = vmatprep.subr.mxu0 %v1548_v32  ;;  %v6746_v32 = vpop.eup %4855  ;;  %4871 = vpow2.f32 %v1991_v24  ;;  %v1955_v31 = vsub.f32 %v7782_v22, %v6546_v10 }
 0x3fe   : > { %2508 = vperm.xlu0 %4773, %v6705_v61   ;;  %4382 = vmatpush3.msra.mxu0 %v1532_v35  ;;  %v1993_v60 = vmul.f32 1.442695, %v1945_v58  ;;  %v7775_v35 = vld [vmem:[#allocation82_spill] sm:$0xff]  ;;  %v6752_v27 = vpop.eup %4857  ;;  %v1956_v58 = vsub.f32 %v6619_v25, %v6634_v0 }
 0x3ff   : > { %4383 = vmatprep.subr.mxu0 %v1547_v56  ;;  %v1947_v56 = vsub.f32 %v7776_v21, %v7775_v35  ;;  %v6756_v20 = vpop.eup %4859 }
 0x400   : > { %4384 = vmatpush3.msra.mxu0 %v1531_v17  ;;  %v1948_v17 = vsub.f32 %v7778_v3, %v7777_v28  ;;  %4873 = vpow2.f32 %v1993_v60  ;;  %v6762_v2 = vpop.eup %4861  ;;  %v2015_v10 = vmul.f32 1.442695, %v1956_v58  ;;  %v2019_v60 = vmul.f32 1.442695, %v1958_v19 }
 0x401   : > { %2518 = vperm.xlu1 %4774, %v6717_v14   ;;  %4385 = vmatprep.subr.mxu0 %v1546_v12  ;;  %v1997_v4 = vmul.f32 1.442695, %v1947_v56  ;;  %4875 = vpow2.f32 %v1995_v43 }
 0x402   : > { %2523 = vperm.xlu0 %4773, %v6723_v57   ;;  %4386 = vmatpush3.msra.mxu0 %v1530_v9  ;;  %v1999_v12 = vmul.f32 1.442695, %v1948_v17  ;;  %v6766_v9 = vpop.eup %4863 }
 0x403   : > { %1627 = vmatmul.mubr.f32.vlgmr.msra.gmra.mxu0 %v7770_v8  ;;  %4877 = vpow2.f32 %v1997_v4  ;;  %v1954_v8 = vsub.f32 %v6593_v54, %v6615_v63  ;;  %v2013_v54 = vmul.f32 1.442695, %v1955_v31  ;;  %v1957_v63 = vsub.f32 %v6556_v46, %v6570_v30  ;;  %v7789_v31 = vld [vmem:[#allocation40_spill] sm:$0xff] }
 0x404   : > { %4879 = vpow2.f32 %v1999_v12 }
 0x405   : > { %2528 = vperm.xlu1 %4774, %v6729_v33   ;;  %v6772_v16 = vpop.eup %4865  ;;  %4881 = vpow2.f32 %v2001_v55  ;;  %v2011_v52 = vmul.f32 1.442695, %v1954_v8  ;;  %v2017_v25 = vmul.f32 1.442695, %v1957_v63  ;;  %v7788_v8 = vld [vmem:[#allocation37_spill] sm:$0xff] }
 0x406   : > { %2533 = vperm.xlu0 %4773, %v6736_v49   ;;  %v6776_v36 = vpop.eup %4867  ;;  %4883 = vpow2.f32 %v2003_v6 }
 0x407   : > { %4885 = vpow2.f32 %v2005_v15 }
 0x408   : > { %4887 = vpow2.f32 %v2007_v13 }
 0x409   : > { %2538 = vperm.xlu1 %4774, %v6742_v26   ;;  %v6782_v62 = vpop.eup %4869  ;;  %4889 = vpow2.f32 %v2009_v11 }
 0x40a   : > { %2543 = vperm.xlu0 %4773, %v6746_v32   ;;  %v6786_v44 = vpop.eup %4871  ;;  %4891 = vpow2.f32 %v2011_v52 }
 0x40b   : > { %4893 = vpow2.f32 %v2013_v54 }
 0x40c   : > { %4895 = vpow2.f32 %v2015_v10  ;;  %v7790_v10 = vld [vmem:[#allocation39_spill] sm:$0xff] }
 0x40d   : > { %2548 = vperm.xlu1 %4774, %v6752_v27   ;;  %v6792_v23 = vpop.eup %4873  ;;  %4897 = vpow2.f32 %v2017_v25 }
 0x40e   : > { %2553 = vperm.xlu0 %4773, %v6756_v20   ;;  %v6796_v24 = vpop.eup %4875  ;;  %4899 = vpow2.f32 %v2019_v60  ;;  %v7791_v60 = vld [vmem:[#allocation42_spill] sm:$0xff] }
 0x410   : > { %v6802_v34 = vpop.eup %4877 }
 0x411   : > { %2558 = vperm.xlu1 %4774, %v6762_v2   ;;  %v6806_v39 = vpop.eup %4879 }
 0x412   : > { %2563 = vperm.xlu0 %4773, %v6766_v9   ;;  %v6810_v0 = vpop.eup %4881 }
 0x413   : > { %v6812_v46 = vpop.eup %4883 }
 0x414   : > { %v6816_v30 = vpop.eup %4885 }
 0x415   : > { %2568 = vperm.xlu1 %4774, %v6772_v16   ;;  %v6818_v18 = vpop.eup %4887 }
 0x416   : > { %2573 = vperm.xlu0 %4773, %v6776_v36   ;;  %v6822_v38 = vpop.eup %4889 }
 0x417   : > { %v6824_v35 = vpop.eup %4891 }
 0x418   : > { %v6828_v21 = vpop.eup %4893 }
 0x419   : > { %2578 = vperm.xlu1 %4774, %v6782_v62   ;;  %v6830_v56 = vpop.eup %4895 }
 0x41a   : > { %2583 = vperm.xlu0 %4773, %v6786_v44   ;;  %7783 = vst [vmem:[#allocation78_spill] sm:$0xff] %v6830_v56  ;;  %v6834_v43 = vpop.eup %4897 }
 0x41b   : > { %v6836_v28 = vpop.eup %4899 }
 0x41c   : > { %7784 = vst [vmem:[#allocation73_spill] sm:$0xff] %v6836_v28 }
 0x41d   : > { %2588 = vperm.xlu1 %4774, %v6792_v23  }
 0x41e   : > { %2593 = vperm.xlu0 %4773, %v6796_v24  }
 0x421   : > { %2598 = vperm.xlu1 %4774, %v6802_v34  }
 0x422   : > { %2603 = vperm.xlu0 %4773, %v6806_v39  }
 0x425   : > { %2608 = vperm.xlu1 %4774, %v6810_v0  }
 0x426   : > { %2613 = vperm.xlu0 %4773, %v6812_v46  }
 0x428   : > { %v2033_v17 = vpop.permute.xlu1 %2032 }
 0x429   : > { %2618 = vperm.xlu1 %4774, %v6816_v30   ;;  %v2186_v12 = vsub.f32 %v7785_v1, %v2033_v17 }
 0x42a   : > { %2623 = vperm.xlu0 %4773, %v6818_v18   ;;  %v2028_v3 = vpop.permute.xlu0 %2027 }
 0x42b   : > { %v2185_v37 = vsub.f32 %v7786_v41, %v2028_v3  ;;  %v2219_v6 = vmul.f32 1.442695, %v2186_v12  ;;  %v7792_v12 = vld [vmem:[#allocation41_spill] sm:$0xff] }
 0x42d   : > { %2628 = vperm.xlu1 %4774, %v6822_v38   ;;  %v2217_v13 = vmul.f32 1.442695, %v2185_v37  ;;  %4901 = vpow2.f32 %v2219_v6  ;;  %v7793_v37 = vld [vmem:[#allocation44_spill] sm:$0xff] }
 0x42e   : > { %2633 = vperm.xlu0 %4773, %v6824_v35   ;;  %v2043_v4 = vpop.permute.xlu0 %2042 }
 0x42f   : > { %v2188_v11 = vsub.f32 %v7788_v8, %v2043_v4  ;;  %4903 = vpow2.f32 %v2217_v13  ;;  %v7794_v13 = vld [vmem:[#allocation43_spill] sm:$0xff] }
 0x430   : > { %v2038_v5 = vpop.permute.xlu1 %2037 }
 0x431   : > { %2638 = vperm.xlu1 %4774, %v6828_v21   ;;  %v2187_v15 = vsub.f32 %v7787_v7, %v2038_v5  ;;  %v2223_v63 = vmul.f32 1.442695, %v2188_v11  ;;  %v7795_v11 = vld [vmem:[#allocation46_spill] sm:$0xff] }
 0x432   : > { %2643 = vperm.xlu0 %4773, %v6830_v56  }
 0x433   : > { %v2221_v22 = vmul.f32 1.442695, %v2187_v15 }
 0x434   : > { %v2053_v29 = vpop.permute.xlu0 %2052 }
 0x435   : > { %2648 = vperm.xlu1 %4774, %v6834_v43   ;;  %v2190_v19 = vsub.f32 %v7790_v10, %v2053_v29  ;;  %4905 = vpow2.f32 %v2221_v22 }
 0x436   : > { %2653 = vperm.xlu0 %4773, %v6836_v28   ;;  %4907 = vpow2.f32 %v2223_v63  ;;  %v7796_v63 = vld [vmem:[#allocation45_spill] sm:$0xff] }
 0x437   : > { %v2227_v1 = vmul.f32 1.442695, %v2190_v19 }
 0x438   : > { %v2048_v55 = vpop.permute.xlu1 %2047 }
 0x439   : > { %v2189_v52 = vsub.f32 %v7789_v31, %v2048_v55 }
 0x43a   : > { %v6851_v22 = vpop.eup %4901 }
 0x43b   : > { %v2225_v25 = vmul.f32 1.442695, %v2189_v52 }
 0x43c   : > { %v2063_v42 = vpop.permute.xlu0 %2062  ;;  %v6855_v10 = vpop.eup %4903 }
 0x43d   : > { %v2192_v4 = vsub.f32 %v7792_v12, %v2063_v42  ;;  %4909 = vpow2.f32 %v2225_v25  ;;  %v7797_v25 = vld [vmem:[#allocation48_spill] sm:$0xff]  ;;  %v7798_v12 = vld [vmem:[#allocation47_spill] sm:$0xff] }
 0x43e   : > { %4911 = vpow2.f32 %v2227_v1 }
 0x43f   : > { %v2231_v15 = vmul.f32 1.442695, %v2192_v4 }
 0x440   : > { %v2058_v40 = vpop.permute.xlu1 %2057 }
 0x441   : > { %v2191_v3 = vsub.f32 %v7791_v60, %v2058_v40 }
 0x442   : > { %v6858_v60 = vpop.eup %4905 }
 0x443   : > { %v2229_v41 = vmul.f32 1.442695, %v2191_v3 }
 0x444   : > { %v2073_v58 = vpop.permute.xlu0 %2072 }
 0x445   : > { %v2194_v29 = vsub.f32 %v7794_v13, %v2073_v58  ;;  %4913 = vpow2.f32 %v2229_v41  ;;  %v6863_v41 = vpop.eup %4907 }
 0x446   : > { %4915 = vpow2.f32 %v2231_v15 }
 0x447   : > { %v2235_v42 = vmul.f32 1.442695, %v2194_v29 }
 0x448   : > { %v2068_v54 = vpop.permute.xlu1 %2067 }
 0x449   : > { %v2193_v55 = vsub.f32 %v7793_v37, %v2068_v54  ;;  %v7799_v37 = vld [vmem:[#allocation50_spill] sm:$0xff] }
 0x44a   : > { %v6866_v15 = vpop.eup %4909 }
 0x44b   : > { %v2233_v8 = vmul.f32 1.442695, %v2193_v55 }
 0x44c   : > { %v2078_v17 = vpop.permute.xlu1 %2077  ;;  %v2083_v5 = vpop.permute.xlu0 %2082 }
 0x44d   : > { %v2195_v40 = vsub.f32 %v7795_v11, %v2078_v17  ;;  %v2196_v54 = vsub.f32 %v7796_v63, %v2083_v5  ;;  %4917 = vpow2.f32 %v2233_v8  ;;  %v7800_v8 = vld [vmem:[#allocation49_spill] sm:$0xff] }
 0x44e   : > { %4919 = vpow2.f32 %v2235_v42  ;;  %v7801_v42 = vld [vmem:[#allocation52_spill] sm:$0xff] }
 0x44f   : > { %v2237_v19 = vmul.f32 1.442695, %v2195_v40  ;;  %v2239_v1 = vmul.f32 1.442695, %v2196_v54  ;;  %v6871_v40 = vpop.eup %4911 }
 0x450   : > { %v2088_v6 = vpop.permute.xlu1 %2087  ;;  %v2093_v7 = vpop.permute.xlu0 %2092 }
 0x451   : > { %v2197_v58 = vsub.f32 %v7797_v25, %v2088_v6  ;;  %v2198_v4 = vsub.f32 %v7798_v12, %v2093_v7  ;;  %4921 = vpow2.f32 %v2237_v19 }
 0x452   : > { %4923 = vpow2.f32 %v2239_v1  ;;  %v6874_v54 = vpop.eup %4913 }
 0x453   : > { %v2241_v5 = vmul.f32 1.442695, %v2197_v58  ;;  %v2243_v29 = vmul.f32 1.442695, %v2198_v4  ;;  %v7802_v58 = vld [vmem:[#allocation51_spill] sm:$0xff]  ;;  %v6879_v12 = vpop.eup %4915  ;;  %v7803_v4 = vld [vmem:[#allocation54_spill] sm:$0xff] }
 0x454   : > { %v2098_v31 = vpop.permute.xlu1 %2097  ;;  %v2103_v52 = vpop.permute.xlu0 %2102 }
 0x455   : > { %2347 = vadd.xlane.f32.xlu0 %v6851_v22  ;;  %v2199_v55 = vsub.f32 %v7799_v37, %v2098_v31  ;;  %v2200_v11 = vsub.f32 %v7800_v8, %v2103_v52  ;;  %4925 = vpow2.f32 %v2241_v5 }
 0x456   : > { %4927 = vpow2.f32 %v2243_v29  ;;  %v7804_v29 = vld [vmem:[#allocation53_spill] sm:$0xff] }
 0x457   : > { %v2245_v7 = vmul.f32 1.442695, %v2199_v55  ;;  %v2247_v25 = vmul.f32 1.442695, %v2200_v11 }
 0x458   : > { %v2108_v3 = vpop.permute.xlu1 %2107  ;;  %v2113_v17 = vpop.permute.xlu0 %2112 }
 0x459   : > { %2349 = vadd.xlane.f32.xlu0 %v6858_v60  ;;  %2345 = vadd.xlane.f32.xlu1 %v6855_v10  ;;  %v2201_v63 = vsub.f32 %v7801_v42, %v2108_v3  ;;  %v2202_v1 = vsub.f32 %v7802_v58, %v2113_v17  ;;  %4929 = vpow2.f32 %v2245_v7  ;;  %v7805_v7 = vld [vmem:[#allocation56_spill] sm:$0xff] }
 0x45a   : > { %v6882_v37 = vpop.eup %4917  ;;  %4931 = vpow2.f32 %v2247_v25 }
 0x45b   : > { %v2249_v52 = vmul.f32 1.442695, %v2201_v63  ;;  %v2251_v8 = vmul.f32 1.442695, %v2202_v1  ;;  %v6887_v42 = vpop.eup %4919 }
 0x45c   : > { %v2118_v6 = vpop.permute.xlu1 %2117  ;;  %v2123_v13 = vpop.permute.xlu0 %2122 }
 0x45d   : > { %2353 = vadd.xlane.f32.xlu0 %v6866_v15  ;;  %2351 = vadd.xlane.f32.xlu1 %v6863_v41  ;;  %v2203_v5 = vsub.f32 %v7803_v4, %v2118_v6  ;;  %v2204_v11 = vsub.f32 %v7804_v29, %v2123_v13  ;;  %4933 = vpow2.f32 %v2249_v52  ;;  %v7807_v52 = vld [vmem:[#allocation58_spill] sm:$0xff] }
 0x45e   : > { %v6890_v58 = vpop.eup %4921  ;;  %4935 = vpow2.f32 %v2251_v8 }
 0x45f   : > { %v2253_v17 = vmul.f32 1.442695, %v2203_v5  ;;  %v2255_v4 = vmul.f32 1.442695, %v2204_v11  ;;  %v6895_v47 = vpop.eup %4923  ;;  %v7809_v11 = vld [vmem:[#allocation60_spill] sm:$0xff] }
 0x460   : > { %v2128_v31 = vpop.permute.xlu1 %2127  ;;  %v2133_v19 = vpop.permute.xlu0 %2132 }
 0x461   : > { %2357 = vadd.xlane.f32.xlu0 %v6874_v54  ;;  %2355 = vadd.xlane.f32.xlu1 %v6871_v40  ;;  %v2205_v63 = vsub.f32 %v7805_v7, %v2128_v31  ;;  %v2206_v25 = vsub.f32 %v7806_v48, %v2133_v19  ;;  %4937 = vpow2.f32 %v2253_v17  ;;  %v7808_v7 = vld [vmem:[#allocation57_spill] sm:$0xff] }
 0x462   : > { %v6898_v29 = vpop.eup %4925  ;;  %4939 = vpow2.f32 %v2255_v4 }
 0x463   : > { %v2257_v13 = vmul.f32 1.442695, %v2205_v63  ;;  %v2259_v8 = vmul.f32 1.442695, %v2206_v25  ;;  %v6904_v19 = vpop.eup %4927 }
 0x464   : > { %v2138_v3 = vpop.permute.xlu1 %2137  ;;  %v2143_v55 = vpop.permute.xlu0 %2142  ;;  %7810 = vst [vmem:[#allocation69_spill] sm:$0xff] %v6904_v19 }
 0x465   : > { %2361 = vadd.xlane.f32.xlu0 %v6882_v37  ;;  %2359 = vadd.xlane.f32.xlu1 %v6879_v12  ;;  %v2207_v5 = vsub.f32 %v7807_v52, %v2138_v3  ;;  %v2208_v28 = vsub.f32 %v7808_v7, %v2143_v55  ;;  %4941 = vpow2.f32 %v2257_v13  ;;  %v7812_v7 = vld [vmem:[#allocation59_spill] sm:$0xff] }
 0x466   : > { %v6906_v63 = vpop.eup %4929  ;;  %4943 = vpow2.f32 %v2259_v8 }
 0x467   : > { %v2261_v17 = vmul.f32 1.442695, %v2207_v5  ;;  %7811 = vst [vmem:[#allocation72_spill] sm:$0xff] %v6906_v63  ;;  %v2263_v52 = vmul.f32 1.442695, %v2208_v28  ;;  %v6911_v25 = vpop.eup %4931  ;;  %v7816_v5 = vld [vmem:[#allocation61_spill] sm:$0xff] }
 0x468   : > { %v2148_v6 = vpop.permute.xlu1 %2147  ;;  %7813 = vst [vmem:[#allocation74_spill] sm:$0xff] %v6911_v25 }
 0x469   : > { %2365 = vadd.xlane.f32.xlu0 %v6890_v58  ;;  %2363 = vadd.xlane.f32.xlu1 %v6887_v42  ;;  %v2153_v1 = vpop.permute.xlu0 %2152  ;;  %v2209_v48 = vsub.f32 %v7809_v11, %v2148_v6  ;;  %4945 = vpow2.f32 %v2261_v17  ;;  %v7814_v6 = vld [vmem:[#allocation62_spill] sm:$0xff] }
 0x46a   : > { %v2210_v56 = vsub.f32 %v7812_v7, %v2153_v1  ;;  %v6914_v13 = vpop.eup %4933  ;;  %4947 = vpow2.f32 %v2263_v52  ;;  %v7817_v7 = vld [vmem:[#allocation64_spill] sm:$0xff]  ;;  %v1653_v52 = vld [vmem:[#allocation14] sm:$0xff] }
 0x46b   : > { %v2265_v55 = vmul.f32 1.442695, %v2209_v48  ;;  %7815 = vst [vmem:[#allocation68_spill] sm:$0xff] %v6914_v13 }
 0x46c   : > { %v2158_v31 = vpop.permute.xlu1 %2157  ;;  %v2267_v28 = vmul.f32 1.442695, %v2210_v56 }
 0x46d   : > { %2369 = vadd.xlane.f32.xlu0 %v6898_v29  ;;  %2367 = vadd.xlane.f32.xlu1 %v6895_v47  ;;  %v2163_v3 = vpop.permute.xlu0 %2162  ;;  %v2211_v11 = vsub.f32 %v7814_v6, %v2158_v31  ;;  %4949 = vpow2.f32 %v2265_v55  ;;  %v5473_v6 = vmov 0.0  }
 0x46e   : > { %v2212_v8 = vsub.f32 %v7816_v5, %v2163_v3  ;;  %4561 = vmatprep.subr.mxu1 %v5473_v6  ;;  %4563 = vmatprep.mubr.msk.f32.mxu1 %vm5474_vm4, %v5473_v6  ;;  %4951 = vpow2.f32 %v2267_v28  ;;  %v7819_v3 = vld [vmem:[#allocation63_spill] sm:$0xff] }
 0x46f   : > { %v2269_v1 = vmul.f32 1.442695, %v2211_v11  ;;  %v7820_v11 = vld [vmem:[#allocation34_spill] sm:$0xff] }
 0x470   : > { %v2168_v4 = vpop.permute.xlu1 %2167  ;;  %v2271_v56 = vmul.f32 1.442695, %v2212_v8  ;;  %4562 = vmatpush3.msra.mxu1 %v7820_v11 }
 0x471   : > { %2373 = vadd.xlane.f32.xlu0 %v6906_v63  ;;  %2371 = vadd.xlane.f32.xlu1 %v6904_v19  ;;  %v2173_v48 = vpop.permute.xlu0 %2172  ;;  %v6919_v63 = vpop.eup %4935  ;;  %v2213_v19 = vsub.f32 %v7817_v7, %v2168_v4  ;;  %4953 = vpow2.f32 %v2269_v1  ;;  %v7821_v7 = vld [vmem:[#allocation66_spill] sm:$0xff] }
 0x472   : > { %v6922_v17 = vpop.eup %4937  ;;  %v2214_v55 = vsub.f32 %v7819_v3, %v2173_v48  ;;  %4564 = vmatmul.mubr.msk.f32.vlgmr.msra.gmra.mxu1 %vm1037_vm2, %v1653_v52  ;;  %4566 = vmatprep.subr.mxu1 %v5473_v6  ;;  %4955 = vpow2.f32 %v2271_v56  ;;  %v7822_v48 = vld [vmem:[#allocation65_spill] sm:$0xff] }
 0x473   : > { %7818 = vst [vmem:[#allocation84_spill] sm:$0xff] %v6922_v17  ;;  %v6929_v4 = vpop.eup %4939  ;;  %v2273_v5 = vmul.f32 1.442695, %v2213_v19  ;;  %4568 = vmatprep.mubr.msk.f32.mxu1 %vm5474_vm4, %v5473_v6 }
 0x474   : > { %v2178_v31 = vpop.permute.xlu1 %2177  ;;  %v2275_v28 = vmul.f32 1.442695, %v2214_v55 }
 0x475   : > { %2377 = vadd.xlane.f32.xlu0 %v6914_v13  ;;  %2375 = vadd.xlane.f32.xlu1 %v6911_v25  ;;  %v2215_v13 = vsub.f32 %v7821_v7, %v2178_v31  ;;  %v6933_v25 = vpop.eup %4941  ;;  %4957 = vpow2.f32 %v2273_v5 }
 0x476   : > { %v6938_v8 = vpop.eup %4943  ;;  %4959 = vpow2.f32 %v2275_v28 }
 0x477   : > { %v2277_v19 = vmul.f32 1.442695, %v2215_v13  ;;  %v6941_v31 = vpop.eup %4945 }
 0x478   : > { %7823 = vst [vmem:[#allocation81_spill] sm:$0xff] %v6941_v31  ;;  %v6945_v52 = vpop.eup %4947  ;;  %v6959_v55 = vpop.permute.xlu1 %2513 }
 0x479   : > { %2381 = vadd.xlane.f32.xlu0 %v6922_v17  ;;  %2379 = vadd.xlane.f32.xlu1 %v6919_v63  ;;  %v2183_v17 = vpop.permute.xlu0 %2182  ;;  %7824 = vst [vmem:[#allocation71_spill] sm:$0xff] %v6945_v52  ;;  %4961 = vpow2.f32 %v2277_v19  ;;  %7829 = vst [vmem:[#allocation85_spill] sm:$0xff] %v6959_v55 }
 0x47a   : > { %v2216_v1 = vsub.f32 %v7822_v48, %v2183_v17  ;;  %v6947_v6 = vpop.eup %4949 }
 0x47b   : > { %7825 = vst [vmem:[#allocation67_spill] sm:$0xff] %v6947_v6  ;;  %v6953_v17 = vpop.eup %4951 }
 0x47c   : > { %v2279_v56 = vmul.f32 1.442695, %v2216_v1  ;;  %7827 = vst [vmem:[#allocation75_spill] sm:$0xff] %v6953_v17  ;;  %v6973_v1 = vpop.permute.xlu1 %2518 }
 0x47d   : > { %2385 = vadd.xlane.f32.xlu0 %v6933_v25  ;;  %2383 = vadd.xlane.f32.xlu1 %v6929_v4  ;;  %v6951_v13 = vpop.permute.xlu0 %2508  ;;  %7835 = vst [vmem:[#allocation80_spill] sm:$0xff] %v6973_v1 }
 0x47e   : > { %7826 = vst [vmem:[#allocation76_spill] sm:$0xff] %v6951_v13  ;;  %4963 = vpow2.f32 %v2279_v56  ;;  %v6955_v3 = vpop.eup %4953 }
 0x47f   : > { %7828 = vst [vmem:[#allocation87_spill] sm:$0xff] %v6955_v3  ;;  %v6961_v5 = vpop.eup %4955 }
 0x480   : > { %7830 = vst [vmem:[#allocation79_spill] sm:$0xff] %v6961_v5 }
 0x481   : > { %2389 = vadd.xlane.f32.xlu0 %v6941_v31  ;;  %2387 = vadd.xlane.f32.xlu1 %v6938_v8  ;;  %v6965_v28 = vpop.permute.xlu0 %2523 }
 0x482   : > { %v6963_v7 = vpop.eup %4957  ;;  %7832 = vst [vmem:[#allocation90_spill] sm:$0xff] %v6965_v28  ;;  %v7838_v28 = vsub.f32 %v6580_v45, %v6600_v50 }
 0x483   : > { %7831 = vst [vmem:[#allocation77_spill] sm:$0xff] %v6963_v7  ;;  %v6969_v19 = vpop.eup %4959 }
 0x484   : > { %7833 = vst [vmem:[#allocation88_spill] sm:$0xff] %v6969_v19  ;;  %v2021_v55 = vmul.f32 1.442695, %v7838_v28 }
 0x485   : > { %2393 = vadd.xlane.f32.xlu0 %v6947_v6  ;;  %2391 = vadd.xlane.f32.xlu1 %v6945_v52  ;;  %v6977_v56 = vpop.permute.xlu0 %2533 }
 0x486   : > { %v6971_v48 = vpop.eup %4961  ;;  %7836 = vst [vmem:[#allocation93_spill] sm:$0xff] %v6977_v56  ;;  %4965 = vpow2.f32 %v2021_v55 }
 0x487   : > { %7834 = vst [vmem:[#allocation82_spill] sm:$0xff] %v6971_v48 }
 0x489   : > { %2397 = vadd.xlane.f32.xlu0 %v6955_v3  ;;  %2395 = vadd.xlane.f32.xlu1 %v6953_v17  ;;  %v6988_v3 = vpop.permute.xlu1 %2528  ;;  %v6990_v1 = vpop.permute.xlu0 %2543 }
 0x48a   : > { %7840 = vst [vmem:[#allocation83_spill] sm:$0xff] %v6988_v3  ;;  %7841 = vst [vmem:[#allocation86_spill] sm:$0xff] %v6990_v1 }
 0x48b   : > { %v6979_v13 = vpop.eup %4963 }
 0x48c   : > { %7837 = vst [vmem:[#allocation91_spill] sm:$0xff] %v6979_v13 }
 0x48d   : > { %2401 = vadd.xlane.f32.xlu0 %v6963_v7  ;;  %2399 = vadd.xlane.f32.xlu1 %v6961_v5  ;;  %v7839_v7 = vsub.f32 %v6664_v51, %v6679_v59  ;;  %v6994_v56 = vpop.permute.xlu0 %2553 }
 0x48e   : > { %7843 = vst [vmem:[#allocation92_spill] sm:$0xff] %v6994_v56 }
 0x48f   : > { %v2023_v5 = vmul.f32 1.442695, %v7839_v7 }
 0x491   : > { %2405 = vadd.xlane.f32.xlu0 %v6971_v48  ;;  %2403 = vadd.xlane.f32.xlu1 %v6969_v19  ;;  %4967 = vpow2.f32 %v2023_v5  ;;  %v6992_v48 = vpop.permute.xlu1 %2538  ;;  %v6998_v45 = vpop.permute.xlu0 %2563 }
 0x492   : > { %7842 = vst [vmem:[#allocation89_spill] sm:$0xff] %v6992_v48  ;;  %7845 = vst [vmem:[#allocation36_spill] sm:$0xff] %v6998_v45 }
 0x493   : > { %v7000_v50 = vpop.eup %4965 }
 0x495   : > { %2407 = vadd.xlane.f32.xlu1 %v6979_v13  ;;  %v6996_v19 = vpop.permute.xlu1 %2548  ;;  %v7008_v55 = vpop.permute.xlu0 %2573 }
 0x496   : > { %7844 = vst [vmem:[#allocation35_spill] sm:$0xff] %v6996_v19  ;;  %7847 = vst [vmem:[#allocation37_spill] sm:$0xff] %v7008_v55 }
 0x499   : > { %v7006_v59 = vpop.permute.xlu1 %2558  ;;  %v7012_v7 = vpop.permute.xlu0 %2583 }
 0x49a   : > { %7846 = vst [vmem:[#allocation38_spill] sm:$0xff] %v7006_v59  ;;  %7849 = vst [vmem:[#allocation39_spill] sm:$0xff] %v7012_v7  ;;  %v7858_v7 = vld [vmem:[#allocation70_spill] sm:$0xff] }
 0x49d   : > { %v7010_v5 = vpop.permute.xlu1 %2568  ;;  %v7016_v19 = vpop.permute.xlu0 %2593 }
 0x49e   : > { %v7002_v51 = vpop.eup %4967  ;;  %7848 = vst [vmem:[#allocation40_spill] sm:$0xff] %v7010_v5  ;;  %7851 = vst [vmem:[#allocation41_spill] sm:$0xff] %v7016_v19 }
 0x4a1   : > { %v7014_v28 = vpop.permute.xlu1 %2578  ;;  %v7020_v56 = vpop.permute.xlu0 %2603 }
 0x4a2   : > { %7850 = vst [vmem:[#allocation42_spill] sm:$0xff] %v7014_v28  ;;  %7853 = vst [vmem:[#allocation43_spill] sm:$0xff] %v7020_v56 }
 0x4a5   : > { %v7018_v45 = vpop.permute.xlu1 %2588  ;;  %v7024_v1 = vpop.permute.xlu0 %2613 }
 0x4a6   : > { %2658 = vperm.xlu1 %4774, %v7000_v50   ;;  %7852 = vst [vmem:[#allocation44_spill] sm:$0xff] %v7018_v45  ;;  %7855 = vst [vmem:[#allocation45_spill] sm:$0xff] %v7024_v1 }
 0x4a7   : > { %2663 = vperm.xlu0 %4773, %v7002_v51  }
 0x4a9   : > { %v7022_v48 = vpop.permute.xlu1 %2598  ;;  %v7030_v5 = vpop.permute.xlu0 %2623 }
 0x4aa   : > { %7854 = vst [vmem:[#allocation46_spill] sm:$0xff] %v7022_v48  ;;  %7857 = vst [vmem:[#allocation47_spill] sm:$0xff] %v7030_v5 }
 0x4ad   : > { %v7026_v59 = vpop.permute.xlu1 %2608  ;;  %v7036_v56 = vpop.permute.xlu0 %2633 }
 0x4ae   : > { %7856 = vst [vmem:[#allocation48_spill] sm:$0xff] %v7026_v59  ;;  %7860 = vst [vmem:[#allocation49_spill] sm:$0xff] %v7036_v56  ;;  %v2283_v56 = vld [vmem:[#allocation4 + $0x10] sm:$0xff] }
 0x4b1   : > { %v7034_v17 = vpop.permute.xlu1 %2618  ;;  %v7040_v59 = vpop.permute.xlu0 %2643 }
 0x4b2   : > { %7859 = vst [vmem:[#allocation50_spill] sm:$0xff] %v7034_v17  ;;  %7862 = vst [vmem:[#allocation51_spill] sm:$0xff] %v7040_v59  ;;  %v2315_v59 = vmul.f32 %v6717_v14, %v2283_v56  ;;  %v2287_v14 = vld [vmem:[#allocation4 + $0x30] sm:$0xff]  ;;  %v2286_v56 = vld [vmem:[#allocation4 + $0x28] sm:$0xff] }
 0x4b5   : > { %v7038_v1 = vpop.permute.xlu1 %2628  ;;  %v7044_v5 = vpop.permute.xlu0 %2653 }
 0x4b6   : > { %7861 = vst [vmem:[#allocation52_spill] sm:$0xff] %v7038_v1  ;;  %7864 = vst [vmem:[#allocation53_spill] sm:$0xff] %v7044_v5 }
 0x4b9   : > { %v7042_v31 = vpop.permute.xlu1 %2638 }
 0x4ba   : > { %7863 = vst [vmem:[#allocation54_spill] sm:$0xff] %v7042_v31  ;;  %v2284_v31 = vld [vmem:[#allocation4 + $0x18] sm:$0xff] }
 0x4c3   : > { %v4387_v3 = vpop.f32.mrf.mxu0 }
 0x4c5   : > { %v4388_v55 = vpop.f32.mrf.mxu0 }
 0x4c6   : > { %v7028_v13 = vadd.f32 %v4388_v55, %v4387_v3 }
 0x4c8   : > { %v1638_v28 = vmul.f32 %v7028_v13, %v7858_v7  ;;  %v2282_v7 = vld [vmem:[#allocation4 + $0x8] sm:$0xff] }
 0x4c9   : > { %v2314_v17 = vmul.f32 %v6699_v53, %v2282_v7 }
 0x4ca   : > { %v1639_v19 = vrot.slane %v1638_v28, 4 }
 0x4cc   : > { %v1640_v45 = vadd.f32 %v1639_v19, %v1638_v28  ;;  %v7047_v19 = vpop.permute.xlu1 %2648 }
 0x4cd   : > { %7865 = vst [vmem:[#allocation56_spill] sm:$0xff] %v7047_v19 }
 0x4ce   : > { %v1641_v48 = vrot.slane %v1640_v45, 2 }
 0x4d0   : > { %v1642_v6 = vadd.f32 %v1641_v48, %v1640_v45  ;;  %v2281_v48 = vld [vmem:[#allocation4] sm:$0xff] }
 0x4d2   : > { %v1643_v52 = vrot.slane %v1642_v6, 1 }
 0x4d4   : > { %v1644_v3 = vadd.f32 %v1643_v52, %v1642_v6  ;;  %v2313_v52 = vmul.f32 %v6705_v61, %v2281_v48 }
 0x4d6   : > { %v4208_v55 = vmul.f32 -1.442695, %v1644_v3 }
 0x4d8   : > { %4969 = vpow2.f32 %v4208_v55  ;;  %v2285_v55 = vld [vmem:[#allocation4 + $0x20] sm:$0xff] }
 0x4d9   : > { %v2317_v53 = vmul.f32 %v6729_v33, %v2285_v55 }
 0x4de   : > { %v2348_v28 = vpop.xlane.xlu0 %2347 }
 0x4df   : > { %v2410_v45 = vadd.f32 %v2348_v28, %v2314_v17  ;;  %v2316_v17 = vmul.f32 %v6723_v57, %v2284_v31  ;;  %v2289_v57 = vld [vmem:[#allocation4 + $0x40] sm:$0xff]  ;;  %v2288_v31 = vld [vmem:[#allocation4 + $0x38] sm:$0xff] }
 0x4e0   : > { %v2320_v55 = vmul.f32 %v6746_v32, %v2288_v31  ;;  %v2294_v31 = vld [vmem:[#allocation4 + $0x68] sm:$0xff] }
 0x4e1   : > { %2443 = vst.msk [vmem:[#allocation4 + $0x8] sm:$0xff] %vm2441_vm3, %v2410_v45 }
 0x4e2   : > { %v2350_v6 = vpop.xlane.xlu0 %2349  ;;  %v2346_v3 = vpop.xlane.xlu1 %2345 }
 0x4e3   : > { %v2411_v5 = vadd.f32 %v2350_v6, %v2315_v59  ;;  %v2409_v1 = vadd.f32 %v2346_v3, %v2313_v52  ;;  %v2319_v59 = vmul.f32 %v6742_v26, %v2287_v14  ;;  %v2321_v3 = vmul.f32 %v6752_v27, %v2289_v57  ;;  %v2290_v26 = vld [vmem:[#allocation4 + $0x48] sm:$0xff]  ;;  %v2292_v27 = vld [vmem:[#allocation4 + $0x58] sm:$0xff] }
 0x4e5   : > { %2444 = vst.msk [vmem:[#allocation4 + $0x10] sm:$0xff] %vm2441_vm3, %v2411_v5  ;;  %2442 = vst.msk [vmem:[#allocation4] sm:$0xff] %vm2441_vm3, %v2409_v1  ;;  %v4970_v7 = vpop.eup %4969  ;;  %v2318_v1 = vmul.f32 %v6736_v49, %v2286_v56 }
 0x4e6   : > { %v2354_v28 = vpop.xlane.xlu0 %2353  ;;  %v2352_v45 = vpop.xlane.xlu1 %2351  ;;  %v1648_v61 = vadd.f32 1.0, %v4970_v7 }
 0x4e7   : > { %v2413_v48 = vadd.f32 %v2354_v28, %v2317_v53  ;;  %v2412_v19 = vadd.f32 %v2352_v45, %v2316_v17  ;;  %v2291_v17 = vld [vmem:[#allocation4 + $0x50] sm:$0xff]  ;;  %v2322_v45 = vmul.f32 %v6756_v20, %v2290_v26 }
 0x4e8   : > { %4971 = vrcp.f32 %v1648_v61  ;;  %v2323_v28 = vmul.f32 %v6762_v2, %v2291_v17  ;;  %v2293_v61 = vld [vmem:[#allocation4 + $0x60] sm:$0xff]  ;;  %v2295_v2 = vld [vmem:[#allocation4 + $0x70] sm:$0xff] }
 0x4e9   : > { %2446 = vst.msk [vmem:[#allocation4 + $0x20] sm:$0xff] %vm2441_vm3, %v2413_v48  ;;  %2445 = vst.msk [vmem:[#allocation4 + $0x18] sm:$0xff] %vm2441_vm3, %v2412_v19 }
 0x4ea   : > { %v2358_v33 = vpop.xlane.xlu0 %2357  ;;  %v2356_v5 = vpop.xlane.xlu1 %2355 }
 0x4eb   : > { %v2415_v52 = vadd.f32 %v2358_v33, %v2319_v59  ;;  %v2414_v6 = vadd.f32 %v2356_v5, %v2318_v1  ;;  %v2325_v59 = vmul.f32 %v6772_v16, %v2293_v61  ;;  %v2324_v1 = vmul.f32 %v6766_v9, %v2292_v27  ;;  %v2300_v61 = vld [vmem:[#allocation4 + $0x98] sm:$0xff] }
 0x4ec   : > { %v2326_v16 = vmul.f32 %v6776_v36, %v2294_v31 }
 0x4ed   : > { %2448 = vst.msk [vmem:[#allocation4 + $0x30] sm:$0xff] %vm2441_vm3, %v2415_v52  ;;  %2447 = vst.msk [vmem:[#allocation4 + $0x28] sm:$0xff] %vm2441_vm3, %v2414_v6  ;;  %v1652_v52 = vld [vmem:[#allocation12] sm:$0xff] }
 0x4ee   : > { %v2362_v53 = vpop.xlane.xlu0 %2361  ;;  %v2360_v19 = vpop.xlane.xlu1 %2359 }
 0x4ef   : > { %v2417_v7 = vadd.f32 %v2362_v53, %v2321_v3  ;;  %v2416_v49 = vadd.f32 %v2360_v19, %v2320_v55  ;;  %v2327_v55 = vmul.f32 %v6782_v62, %v2295_v2  ;;  %v2297_v19 = vld [vmem:[#allocation4 + $0x80] sm:$0xff] }
 0x4f0   : > { %v2329_v36 = vmul.f32 %v6792_v23, %v2297_v19  ;;  %v7866_v19 = vld [vmem:[#allocation78_spill] sm:$0xff] }
 0x4f1   : > { %2450 = vst.msk [vmem:[#allocation4 + $0x40] sm:$0xff] %vm2441_vm3, %v2417_v7  ;;  %2449 = vst.msk [vmem:[#allocation4 + $0x38] sm:$0xff] %vm2441_vm3, %v2416_v49 }
 0x4f2   : > { %v2366_v14 = vpop.xlane.xlu0 %2365  ;;  %v2364_v56 = vpop.xlane.xlu1 %2363 }
 0x4f3   : > { %v2419_v48 = vadd.f32 %v2366_v14, %v2323_v28  ;;  %v2418_v32 = vadd.f32 %v2364_v56, %v2322_v45  ;;  %v2299_v28 = vld [vmem:[#allocation4 + $0x90] sm:$0xff]  ;;  %v2298_v45 = vld [vmem:[#allocation4 + $0x88] sm:$0xff]  ;;  %v2301_v56 = vld [vmem:[#allocation4 + $0xa0] sm:$0xff] }
 0x4f4   : > { %v2331_v14 = vmul.f32 %v6802_v34, %v2299_v28  ;;  %v2330_v23 = vmul.f32 %v6796_v24, %v2298_v45  ;;  %v2332_v34 = vmul.f32 %v6806_v39, %v2300_v61  ;;  %v7870_v28 = vld [vmem:[#allocation74_spill] sm:$0xff] }
 0x4f5   : > { %2452 = vst.msk [vmem:[#allocation4 + $0x50] sm:$0xff] %vm2441_vm3, %v2419_v48  ;;  %2451 = vst.msk [vmem:[#allocation4 + $0x48] sm:$0xff] %vm2441_vm3, %v2418_v32  ;;  %v4972_v33 = vpop.eup %4971  ;;  %v2333_v48 = vmul.f32 %v6810_v0, %v2301_v56  ;;  %v2303_v32 = vld [vmem:[#allocation4 + $0xb0] sm:$0xff]  ;;  %v7872_v56 = vld [vmem:[#allocation84_spill] sm:$0xff] }
 0x4f6   : > { %v2370_v5 = vpop.xlane.xlu0 %2369  ;;  %v2368_v57 = vpop.xlane.xlu1 %2367  ;;  %v1651_v20 = vmul.f32 %v4972_v33, %v7028_v13  ;;  %v2296_v13 = vld [vmem:[#allocation4 + $0x78] sm:$0xff]  ;;  %v2335_v33 = vmul.f32 %v6816_v30, %v2303_v32 }
 0x4f7   : > { %v2421_v6 = vadd.f32 %v2370_v5, %v2325_v59  ;;  %v2420_v3 = vadd.f32 %v2368_v57, %v2324_v1  ;;  %v2328_v62 = vmul.f32 %v6786_v44, %v2296_v13  ;;  %v2302_v59 = vld [vmem:[#allocation4 + $0xa8] sm:$0xff]  ;;  %v2305_v5 = vld [vmem:[#allocation4 + $0xc0] sm:$0xff]  ;;  %v2304_v57 = vld [vmem:[#allocation4 + $0xb8] sm:$0xff] }
 0x4f8   : > { %4567 = vmatpush3.msra.mxu1 %v1651_v20  ;;  %v2334_v0 = vmul.f32 %v6812_v46, %v2302_v59  ;;  %v2337_v31 = vmul.f32 %v6822_v38, %v2305_v5  ;;  %v2336_v30 = vmul.f32 %v6818_v18, %v2304_v57  ;;  %v2307_v20 = vld [vmem:[#allocation4 + $0xd0] sm:$0xff]  ;;  %v7867_v13 = vld [vmem:[#allocation69_spill] sm:$0xff]  ;;  %v2475_v59 = vld [vmem:[#allocation5 + $0x8] sm:$0xff] }
 0x4f9   : > { %2454 = vst.msk [vmem:[#allocation4 + $0x60] sm:$0xff] %vm2441_vm3, %v2421_v6  ;;  %2453 = vst.msk [vmem:[#allocation4 + $0x58] sm:$0xff] %vm2441_vm3, %v2420_v3  ;;  %4569 = vmatmul.mubr.msk.f32.vlgmr.msra.gmra.mxu1 %vm1037_vm2, %v1652_v52  ;;  %4571 = vmatprep.subr.mxu1 %v7820_v11  ;;  %v2306_v52 = vld [vmem:[#allocation4 + $0xc8] sm:$0xff]  ;;  %v2339_v3 = vmul.f32 %v6828_v21, %v2307_v20  ;;  %v2477_v5 = vld [vmem:[#allocation5 + $0x18] sm:$0xff] }
 0x4fa   : > { %v2374_v9 = vpop.xlane.xlu0 %2373  ;;  %v2372_v53 = vpop.xlane.xlu1 %2371  ;;  %4572 = vmatpush3.xpose.msra.mxu1 %v7820_v11  ;;  %4573 = vmatprep.mubr.f32.mxu1 %v6855_v10  ;;  %v2338_v38 = vmul.f32 %v6824_v35, %v2306_v52 }
 0x4fb   : > { %v2423_v17 = vadd.f32 %v2374_v9, %v2327_v55  ;;  %v2422_v26 = vadd.f32 %v2372_v53, %v2326_v16  ;;  %v2309_v55 = vld [vmem:[#allocation4 + $0xe0] sm:$0xff]  ;;  %v2308_v16 = vld [vmem:[#allocation4 + $0xd8] sm:$0xff] }
 0x4fc   : > { %v2341_v53 = vmul.f32 %v6834_v43, %v2309_v55  ;;  %v2340_v21 = vmul.f32 %v7866_v19, %v2308_v16  ;;  %v7887_v16 = vld [vmem:[#allocation93_spill] sm:$0xff] }
 0x4fd   : > { %2456 = vst.msk [vmem:[#allocation4 + $0x70] sm:$0xff] %vm2441_vm3, %v2423_v17  ;;  %2455 = vst.msk [vmem:[#allocation4 + $0x68] sm:$0xff] %vm2441_vm3, %v2422_v26  ;;  %4574 = vmatmul.mubr.f32.vlgmr.msra.gmra.mxu1 %v6851_v22  ;;  %v2311_v17 = vld [vmem:[#allocation4 + $0xf0] sm:$0xff]  ;;  %v2310_v26 = vld [vmem:[#allocation4 + $0xe8] sm:$0xff] }
 0x4fe   : > { %v2378_v7 = vpop.xlane.xlu0 %2377  ;;  %v2376_v49 = vpop.xlane.xlu1 %2375  ;;  %4576 = vmatprep.mubr.f32.mxu1 %v6858_v60 }
 0x4ff   : > { %v2425_v11 = vadd.f32 %v2378_v7, %v2329_v36  ;;  %v2424_v10 = vadd.f32 %v2376_v49, %v2328_v62  ;;  %v7868_v36 = vld [vmem:[#allocation72_spill] sm:$0xff]  ;;  %v2343_v7 = vmul.f32 %v7000_v50, %v2311_v17  ;;  %v7869_v49 = vld [vmem:[#allocation73_spill] sm:$0xff] }
 0x500   : > { %v2342_v43 = vmul.f32 %v7869_v49, %v2310_v26  ;;  %v7889_v26 = vld [vmem:[#allocation86_spill] sm:$0xff]  ;;  %v7890_v49 = vld [vmem:[#allocation89_spill] sm:$0xff] }
 0x501   : > { %2458 = vst.msk [vmem:[#allocation4 + $0x80] sm:$0xff] %vm2441_vm3, %v2425_v11  ;;  %2457 = vst.msk [vmem:[#allocation4 + $0x78] sm:$0xff] %vm2441_vm3, %v2424_v10  ;;  %4577 = vmatmul.mubr.f32.gmra.mxu1 %v6863_v41  ;;  %v2312_v10 = vld [vmem:[#allocation4 + $0xf8] sm:$0xff] }
 0x502   : > { %v2382_v44 = vpop.xlane.xlu0 %2381  ;;  %v2380_v22 = vpop.xlane.xlu1 %2379  ;;  %4579 = vmatprep.mubr.f32.mxu1 %v6866_v15 }
 0x503   : > { %v2427_v27 = vadd.f32 %v2382_v44, %v2331_v14  ;;  %v2426_v60 = vadd.f32 %v2380_v22, %v2330_v23  ;;  %v7871_v14 = vld [vmem:[#allocation68_spill] sm:$0xff]  ;;  %v2344_v22 = vmul.f32 %v7002_v51, %v2312_v10  ;;  %v7876_v51 = vld [vmem:[#allocation75_spill] sm:$0xff] }
 0x504   : > { %v7891_v10 = vld [vmem:[#allocation92_spill] sm:$0xff] }
 0x505   : > { %2460 = vst.msk [vmem:[#allocation4 + $0x90] sm:$0xff] %vm2441_vm3, %v2427_v27  ;;  %2459 = vst.msk [vmem:[#allocation4 + $0x88] sm:$0xff] %vm2441_vm3, %v2426_v60  ;;  %4580 = vmatmul.mubr.f32.gmra.mxu1 %v6871_v40  ;;  %v7873_v27 = vld [vmem:[#allocation81_spill] sm:$0xff]  ;;  %v7874_v60 = vld [vmem:[#allocation71_spill] sm:$0xff] }
 0x506   : > { %v2386_v24 = vpop.xlane.xlu0 %2385  ;;  %v2384_v41 = vpop.xlane.xlu1 %2383  ;;  %4582 = vmatprep.mubr.f32.mxu1 %v6874_v54 }
 0x507   : > { %v2429_v1 = vadd.f32 %v2386_v24, %v2333_v48  ;;  %v2428_v15 = vadd.f32 %v2384_v41, %v2332_v34  ;;  %v7875_v48 = vld [vmem:[#allocation67_spill] sm:$0xff]  ;;  %v7879_v24 = vld [vmem:[#allocation77_spill] sm:$0xff] }
 0x508   : > { %v7878_v34 = vld [vmem:[#allocation79_spill] sm:$0xff] }
 0x509   : > { %2462 = vst.msk [vmem:[#allocation4 + $0xa0] sm:$0xff] %vm2441_vm3, %v2429_v1  ;;  %2461 = vst.msk [vmem:[#allocation4 + $0x98] sm:$0xff] %vm2441_vm3, %v2428_v15  ;;  %4583 = vmatmul.mubr.f32.gmra.mxu1 %v6879_v12 }
 0x50a   : > { %v2390_v39 = vpop.xlane.xlu0 %2389  ;;  %v2388_v40 = vpop.xlane.xlu1 %2387  ;;  %4585 = vmatprep.mubr.f32.mxu1 %v6882_v37 }
 0x50b   : > { %v2431_v2 = vadd.f32 %v2390_v39, %v2335_v33  ;;  %v2430_v54 = vadd.f32 %v2388_v40, %v2334_v0  ;;  %v2474_v33 = vld [vmem:[#allocation5] sm:$0xff] }
 0x50c   : > { %v7883_v39 = vld [vmem:[#allocation85_spill] sm:$0xff] }
 0x50d   : > { %2464 = vst.msk [vmem:[#allocation4 + $0xb0] sm:$0xff] %vm2441_vm3, %v2431_v2  ;;  %2463 = vst.msk [vmem:[#allocation4 + $0xa8] sm:$0xff] %vm2441_vm3, %v2430_v54  ;;  %4586 = vmatmul.mubr.f32.gmra.mxu1 %v6887_v42  ;;  %v2667_v40 = vmul.f32 %v7883_v39, %v2475_v59  ;;  %v7884_v2 = vld [vmem:[#allocation76_spill] sm:$0xff]  ;;  %v7895_v59 = vld [vmem:[#allocation37_spill] sm:$0xff] }
 0x50e   : > { %v2394_v46 = vpop.xlane.xlu0 %2393  ;;  %v2392_v12 = vpop.xlane.xlu1 %2391  ;;  %4588 = vmatprep.mubr.f32.mxu1 %v6890_v58  ;;  %v2666_v54 = vmul.f32 %v7884_v2, %v2474_v33  ;;  %v2489_v33 = vld [vmem:[#allocation5 + $0x78] sm:$0xff] }
 0x50f   : > { %v2433_v6 = vadd.f32 %v2394_v46, %v2337_v31  ;;  %v2432_v37 = vadd.f32 %v2392_v12, %v2336_v30  ;;  %v2476_v30 = vld [vmem:[#allocation5 + $0x10] sm:$0xff]  ;;  %v7885_v12 = vld [vmem:[#allocation90_spill] sm:$0xff]  ;;  %v7896_v39 = vld [vmem:[#allocation40_spill] sm:$0xff] }
 0x510   : > { %v2669_v20 = vmul.f32 %v7885_v12, %v2477_v5 }
 0x511   : > { %2466 = vst.msk [vmem:[#allocation4 + $0xc0] sm:$0xff] %vm2441_vm3, %v2433_v6  ;;  %2465 = vst.msk [vmem:[#allocation4 + $0xb8] sm:$0xff] %vm2441_vm3, %v2432_v37  ;;  %4589 = vmatmul.mubr.f32.gmra.mxu1 %v6895_v47  ;;  %v2479_v6 = vld [vmem:[#allocation5 + $0x28] sm:$0xff] }
 0x512   : > { %v2398_v18 = vpop.xlane.xlu0 %2397  ;;  %v2396_v42 = vpop.xlane.xlu1 %2395  ;;  %4591 = vmatprep.mubr.f32.mxu1 %v6898_v29 }
 0x513   : > { %v2435_v9 = vadd.f32 %v2398_v18, %v2339_v3  ;;  %v2434_v58 = vadd.f32 %v2396_v42, %v2338_v38  ;;  %v7886_v3 = vld [vmem:[#allocation80_spill] sm:$0xff]  ;;  %v2478_v42 = vld [vmem:[#allocation5 + $0x20] sm:$0xff] }
 0x514   : > { %v2668_v38 = vmul.f32 %v7886_v3, %v2476_v30 }
 0x515   : > { %2468 = vst.msk [vmem:[#allocation4 + $0xd0] sm:$0xff] %vm2441_vm3, %v2435_v9  ;;  %2467 = vst.msk [vmem:[#allocation4 + $0xc8] sm:$0xff] %vm2441_vm3, %v2434_v58  ;;  %4592 = vmatmul.mubr.f32.gmra.mxu1 %v7867_v13  ;;  %v2671_v9 = vmul.f32 %v7887_v16, %v2479_v6 }
 0x516   : > { %v2402_v35 = vpop.xlane.xlu0 %2401  ;;  %v2400_v47 = vpop.xlane.xlu1 %2399  ;;  %4594 = vmatprep.mubr.f32.mxu1 %v7868_v36 }
 0x517   : > { %v2437_v62 = vadd.f32 %v2402_v35, %v2341_v53  ;;  %v2436_v29 = vadd.f32 %v2400_v47, %v2340_v21  ;;  %v2481_v53 = vld [vmem:[#allocation5 + $0x38] sm:$0xff]  ;;  %v7888_v21 = vld [vmem:[#allocation83_spill] sm:$0xff] }
 0x518   : > { %v2670_v13 = vmul.f32 %v7888_v21, %v2478_v42  ;;  %v2480_v47 = vld [vmem:[#allocation5 + $0x30] sm:$0xff]  ;;  %v2673_v36 = vmul.f32 %v7889_v26, %v2481_v53 }
 0x519   : > { %2470 = vst.msk [vmem:[#allocation4 + $0xe0] sm:$0xff] %vm2441_vm3, %v2437_v62  ;;  %2469 = vst.msk [vmem:[#allocation4 + $0xd8] sm:$0xff] %vm2441_vm3, %v2436_v29  ;;  %4595 = vmatmul.mubr.f32.gmra.mxu1 %v7870_v28  ;;  %v2483_v29 = vld [vmem:[#allocation5 + $0x48] sm:$0xff] }
 0x51a   : > { %v2406_v45 = vpop.xlane.xlu0 %2405  ;;  %v2404_v11 = vpop.xlane.xlu1 %2403  ;;  %4597 = vmatprep.mubr.f32.mxu1 %v7871_v14  ;;  %v2675_v14 = vmul.f32 %v7891_v10, %v2483_v29 }
 0x51b   : > { %v2439_v23 = vadd.f32 %v2406_v45, %v2343_v7  ;;  %v2438_v44 = vadd.f32 %v2404_v11, %v2342_v43  ;;  %v2672_v43 = vmul.f32 %v7890_v49, %v2480_v47  ;;  %v2482_v45 = vld [vmem:[#allocation5 + $0x40] sm:$0xff] }
 0x51d   : > { %2472 = vst.msk [vmem:[#allocation4 + $0xf0] sm:$0xff] %vm2441_vm3, %v2439_v23  ;;  %2471 = vst.msk [vmem:[#allocation4 + $0xe8] sm:$0xff] %vm2441_vm3, %v2438_v44  ;;  %4598 = vmatmul.mubr.f32.gmra.mxu1 %v6919_v63  ;;  %v7877_v63 = vld [vmem:[#allocation87_spill] sm:$0xff]  ;;  %v2485_v44 = vld [vmem:[#allocation5 + $0x58] sm:$0xff] }
 0x51e   : > { %v2408_v50 = vpop.xlane.xlu1 %2407  ;;  %4600 = vmatprep.mubr.f32.mxu1 %v7872_v56 }
 0x51f   : > { %v2440_v61 = vadd.f32 %v2408_v50, %v2344_v22  ;;  %v7892_v50 = vld [vmem:[#allocation35_spill] sm:$0xff] }
 0x520   : > { %v2674_v56 = vmul.f32 %v7892_v50, %v2482_v45 }
 0x521   : > { %2473 = vst.msk [vmem:[#allocation4 + $0xf8] sm:$0xff] %vm2441_vm3, %v2440_v61  ;;  %4601 = vmatmul.mubr.f32.gmra.mxu1 %v6929_v4  ;;  %v7880_v4 = vld [vmem:[#allocation88_spill] sm:$0xff] }
 0x522   : > { %4603 = vmatprep.mubr.f32.mxu1 %v6933_v25  ;;  %v7881_v25 = vld [vmem:[#allocation82_spill] sm:$0xff] }
 0x525   : > { %4604 = vmatmul.mubr.f32.gmra.mxu1 %v6938_v8  ;;  %v7882_v8 = vld [vmem:[#allocation91_spill] sm:$0xff] }
 0x526   : > { %4606 = vmatprep.mubr.f32.mxu1 %v7873_v27  ;;  %v2484_v27 = vld [vmem:[#allocation5 + $0x50] sm:$0xff] }
 0x529   : > { %4607 = vmatmul.mubr.f32.gmra.mxu1 %v7874_v60 }
 0x52a   : > { %4609 = vmatprep.mubr.f32.mxu1 %v7875_v48  ;;  %v7893_v48 = vld [vmem:[#allocation36_spill] sm:$0xff] }
 0x52d   : > { %4610 = vmatmul.mubr.f32.gmra.mxu1 %v7876_v51  ;;  %v2677_v51 = vmul.f32 %v7893_v48, %v2485_v44 }
 0x52e   : > { %4612 = vmatprep.mubr.f32.mxu1 %v7877_v63 }
 0x531   : > { %4613 = vmatmul.mubr.f32.gmra.mxu1 %v7878_v34  ;;  %v2487_v34 = vld [vmem:[#allocation5 + $0x68] sm:$0xff] }
 0x532   : > { %4615 = vmatprep.mubr.f32.mxu1 %v7879_v24  ;;  %v1723_v41 = vpop.f32.mrf.mxu1 }
 0x534   : > { %v4565_v32 = vpop.f32.mrf.mxu1 }
 0x535   : > { %4616 = vmatmul.mubr.f32.gmra.mxu1 %v7880_v4  ;;  %v7894_v4 = vld [vmem:[#allocation38_spill] sm:$0xff] }
 0x536   : > { %4618 = vmatprep.mubr.f32.mxu1 %v7881_v25  ;;  %v2676_v25 = vmul.f32 %v7894_v4, %v2484_v27 }
 0x539   : > { %4619 = vmatmul.mubr.f32.gmra.mxu1 %v7882_v8 }
 0x5b9   : > { %v1796_v1 = vpop.f32.mrf.mxu1 }
 0x5ba   : > { %v1797_v15 = vadd.f32 %v1796_v1, %v1723_v41  ;;  %v2486_v41 = vld [vmem:[#allocation5 + $0x60] sm:$0xff]  ;;  %v2679_v1 = vmul.f32 %v7895_v59, %v2487_v34 }
 0x5bb   : > { %v4570_v0 = vpop.f32.mrf.mxu1 }
 0x5bc   : > { %1800 = vst [vmem:[%s478_s8] sm:$0xff] %v1797_v15 }
 0x5bd   : > { %v4575_v57 = vpop.f32.mrf.mxu1 }
 0x5be   : > { %v2924_v31 = vadd.f32 %v4575_v57, %v2667_v40  ;;  %v2678_v40 = vmul.f32 %v7896_v39, %v2486_v41  ;;  %v2488_v57 = vld [vmem:[#allocation5 + $0x70] sm:$0xff] }
 0x5bf   : > { %v2764_v46 = vpop.f32.mrf.mxu1 }
 0x5c0   : > { %2956 = vst.msk [vmem:[#allocation5 + $0x8] sm:$0xff] %vm1037_vm2, %v2924_v31  ;;  %v2923_v52 = vadd.f32 %v2764_v46, %v2666_v54  ;;  %v7897_v54 = vld [vmem:[#allocation39_spill] sm:$0xff]  ;;  %v2491_v46 = vld [vmem:[#allocation5 + $0x88] sm:$0xff] }
 0x5c1   : > { %v4578_v37 = vpop.f32.mrf.mxu1  ;;  %v2681_v31 = vmul.f32 %v7897_v54, %v2489_v33 }
 0x5c2   : > { %2955 = vst.msk [vmem:[#allocation5] sm:$0xff] %vm1037_vm2, %v2923_v52  ;;  %v2926_v18 = vadd.f32 %v4578_v37, %v2669_v20  ;;  %v7898_v20 = vld [vmem:[#allocation42_spill] sm:$0xff]  ;;  %v2490_v37 = vld [vmem:[#allocation5 + $0x80] sm:$0xff] }
 0x5c3   : > { %v2774_v55 = vpop.f32.mrf.mxu1  ;;  %v2680_v52 = vmul.f32 %v7898_v20, %v2488_v57 }
 0x5c4   : > { %2958 = vst.msk [vmem:[#allocation5 + $0x18] sm:$0xff] %vm1037_vm2, %v2926_v18  ;;  %v2925_v58 = vadd.f32 %v2774_v55, %v2668_v38  ;;  %v7899_v38 = vld [vmem:[#allocation41_spill] sm:$0xff]  ;;  %v2493_v55 = vld [vmem:[#allocation5 + $0x98] sm:$0xff] }
 0x5c5   : > { %v4581_v19 = vpop.f32.mrf.mxu1  ;;  %v2683_v18 = vmul.f32 %v7899_v38, %v2491_v46  ;;  %v2664_v38 = vpop.permute.xlu0 %2663 }
 0x5c6   : > { %2957 = vst.msk [vmem:[#allocation5 + $0x10] sm:$0xff] %vm1037_vm2, %v2925_v58  ;;  %v2928_v35 = vadd.f32 %v4581_v19, %v2671_v9  ;;  %v7900_v9 = vld [vmem:[#allocation44_spill] sm:$0xff]  ;;  %v2492_v19 = vld [vmem:[#allocation5 + $0x90] sm:$0xff] }
 0x5c7   : > { %v2784_v17 = vpop.f32.mrf.mxu1  ;;  %v2682_v58 = vmul.f32 %v7900_v9, %v2490_v37  ;;  %v2504_v9 = vld [vmem:[#allocation5 + $0xf0] sm:$0xff] }
 0x5c8   : > { %2960 = vst.msk [vmem:[#allocation5 + $0x28] sm:$0xff] %vm1037_vm2, %v2928_v35  ;;  %v2927_v62 = vadd.f32 %v2784_v17, %v2670_v13  ;;  %v7901_v13 = vld [vmem:[#allocation43_spill] sm:$0xff]  ;;  %v2495_v17 = vld [vmem:[#allocation5 + $0xa8] sm:$0xff] }
 0x5c9   : > { %v4584_v7 = vpop.f32.mrf.mxu1  ;;  %v2685_v35 = vmul.f32 %v7901_v13, %v2493_v55 }
 0x5ca   : > { %2959 = vst.msk [vmem:[#allocation5 + $0x20] sm:$0xff] %vm1037_vm2, %v2927_v62  ;;  %v2930_v28 = vadd.f32 %v4584_v7, %v2673_v36  ;;  %v7902_v36 = vld [vmem:[#allocation46_spill] sm:$0xff]  ;;  %v2494_v7 = vld [vmem:[#allocation5 + $0xa0] sm:$0xff] }
 0x5cb   : > { %v2794_v11 = vpop.f32.mrf.mxu1  ;;  %v2684_v62 = vmul.f32 %v7902_v36, %v2492_v19 }
 0x5cc   : > { %2962 = vst.msk [vmem:[#allocation5 + $0x38] sm:$0xff] %vm1037_vm2, %v2930_v28  ;;  %v2929_v23 = vadd.f32 %v2794_v11, %v2672_v43  ;;  %v7903_v43 = vld [vmem:[#allocation45_spill] sm:$0xff]  ;;  %v2497_v11 = vld [vmem:[#allocation5 + $0xb8] sm:$0xff] }
 0x5cd   : > { %v4587_v22 = vpop.f32.mrf.mxu1  ;;  %v2687_v28 = vmul.f32 %v7903_v43, %v2495_v17 }
 0x5ce   : > { %2961 = vst.msk [vmem:[#allocation5 + $0x30] sm:$0xff] %vm1037_vm2, %v2929_v23  ;;  %v2932_v61 = vadd.f32 %v4587_v22, %v2675_v14  ;;  %v7904_v14 = vld [vmem:[#allocation48_spill] sm:$0xff]  ;;  %v2496_v22 = vld [vmem:[#allocation5 + $0xb0] sm:$0xff] }
 0x5cf   : > { %v2804_v60 = vpop.f32.mrf.mxu1  ;;  %v2686_v23 = vmul.f32 %v7904_v14, %v2494_v7 }
 0x5d0   : > { %2964 = vst.msk [vmem:[#allocation5 + $0x48] sm:$0xff] %vm1037_vm2, %v2932_v61  ;;  %v2931_v63 = vadd.f32 %v2804_v60, %v2674_v56  ;;  %v7905_v56 = vld [vmem:[#allocation47_spill] sm:$0xff]  ;;  %v2499_v60 = vld [vmem:[#allocation5 + $0xc8] sm:$0xff] }
 0x5d1   : > { %v4590_v24 = vpop.f32.mrf.mxu1  ;;  %v2689_v61 = vmul.f32 %v7905_v56, %v2497_v11 }
 0x5d2   : > { %2963 = vst.msk [vmem:[#allocation5 + $0x40] sm:$0xff] %vm1037_vm2, %v2931_v63  ;;  %v2934_v8 = vadd.f32 %v4590_v24, %v2677_v51  ;;  %v7906_v51 = vld [vmem:[#allocation50_spill] sm:$0xff]  ;;  %v2498_v24 = vld [vmem:[#allocation5 + $0xc0] sm:$0xff] }
 0x5d3   : > { %v2814_v32 = vpop.f32.mrf.mxu1  ;;  %v2688_v63 = vmul.f32 %v7906_v51, %v2496_v22 }
 0x5d4   : > { %2966 = vst.msk [vmem:[#allocation5 + $0x58] sm:$0xff] %vm1037_vm2, %v2934_v8  ;;  %v2933_v15 = vadd.f32 %v2814_v32, %v2676_v25  ;;  %v7907_v25 = vld [vmem:[#allocation49_spill] sm:$0xff]  ;;  %v2501_v32 = vld [vmem:[#allocation5 + $0xd8] sm:$0xff] }
 0x5d5   : > { %v4593_v0 = vpop.f32.mrf.mxu1  ;;  %v2691_v8 = vmul.f32 %v7907_v25, %v2499_v60 }
 0x5d6   : > { %2965 = vst.msk [vmem:[#allocation5 + $0x50] sm:$0xff] %vm1037_vm2, %v2933_v15  ;;  %v2936_v5 = vadd.f32 %v4593_v0, %v2679_v1  ;;  %v7908_v1 = vld [vmem:[#allocation52_spill] sm:$0xff]  ;;  %v2500_v0 = vld [vmem:[#allocation5 + $0xd0] sm:$0xff] }
 0x5d7   : > { %v2824_v2 = vpop.f32.mrf.mxu1  ;;  %v2690_v15 = vmul.f32 %v7908_v1, %v2498_v24 }
 0x5d8   : > { %2968 = vst.msk [vmem:[#allocation5 + $0x68] sm:$0xff] %vm1037_vm2, %v2936_v5  ;;  %v2935_v30 = vadd.f32 %v2824_v2, %v2678_v40  ;;  %v7909_v40 = vld [vmem:[#allocation51_spill] sm:$0xff]  ;;  %v2503_v2 = vld [vmem:[#allocation5 + $0xe8] sm:$0xff] }
 0x5d9   : > { %v4596_v12 = vpop.f32.mrf.mxu1  ;;  %v2693_v5 = vmul.f32 %v7909_v40, %v2501_v32 }
 0x5da   : > { %2967 = vst.msk [vmem:[#allocation5 + $0x60] sm:$0xff] %vm1037_vm2, %v2935_v30  ;;  %v2938_v6 = vadd.f32 %v4596_v12, %v2681_v31  ;;  %v7910_v31 = vld [vmem:[#allocation54_spill] sm:$0xff]  ;;  %v2502_v12 = vld [vmem:[#allocation5 + $0xe0] sm:$0xff] }
 0x5db   : > { %v2834_v3 = vpop.f32.mrf.mxu1  ;;  %v2692_v30 = vmul.f32 %v7910_v31, %v2500_v0 }
 0x5dc   : > { %2970 = vst.msk [vmem:[#allocation5 + $0x78] sm:$0xff] %vm1037_vm2, %v2938_v6  ;;  %v2937_v42 = vadd.f32 %v2834_v3, %v2680_v52  ;;  %v7911_v52 = vld [vmem:[#allocation53_spill] sm:$0xff]  ;;  %v2505_v3 = vld [vmem:[#allocation5 + $0xf8] sm:$0xff] }
 0x5dd   : > { %v4599_v16 = vpop.f32.mrf.mxu1  ;;  %v2695_v6 = vmul.f32 %v7911_v52, %v2503_v2  ;;  %v2697_v19 = vmul.f32 %v2664_v38, %v2505_v3 }
 0x5de   : > { %2969 = vst.msk [vmem:[#allocation5 + $0x70] sm:$0xff] %vm1037_vm2, %v2937_v42  ;;  %v2940_v53 = vadd.f32 %v4599_v16, %v2683_v18  ;;  %v7912_v42 = vld [vmem:[#allocation56_spill] sm:$0xff] }
 0x5df   : > { %v2844_v21 = vpop.f32.mrf.mxu1  ;;  %v2694_v55 = vmul.f32 %v7912_v42, %v2502_v12 }
 0x5e0   : > { %2972 = vst.msk [vmem:[#allocation5 + $0x88] sm:$0xff] %vm1037_vm2, %v2940_v53  ;;  %v2939_v47 = vadd.f32 %v2844_v21, %v2682_v58  ;;  %v2659_v58 = vpop.permute.xlu1 %2658 }
 0x5e1   : > { %v4602_v26 = vpop.f32.mrf.mxu1 }
 0x5e2   : > { %2971 = vst.msk [vmem:[#allocation5 + $0x80] sm:$0xff] %vm1037_vm2, %v2939_v47  ;;  %v2942_v29 = vadd.f32 %v4602_v26, %v2685_v35  ;;  %v2696_v35 = vmul.f32 %v2659_v58, %v2504_v9 }
 0x5e3   : > { %v2854_v49 = vpop.f32.mrf.mxu1 }
 0x5e4   : > { %2974 = vst.msk [vmem:[#allocation5 + $0x98] sm:$0xff] %vm1037_vm2, %v2942_v29  ;;  %v2941_v45 = vadd.f32 %v2854_v49, %v2684_v62 }
 0x5e5   : > { %v4605_v10 = vpop.f32.mrf.mxu1 }
 0x5e6   : > { %2973 = vst.msk [vmem:[#allocation5 + $0x90] sm:$0xff] %vm1037_vm2, %v2941_v45  ;;  %v2944_v44 = vadd.f32 %v4605_v10, %v2687_v28 }
 0x5e7   : > { %v2864_v50 = vpop.f32.mrf.mxu1 }
 0x5e8   : > { %2976 = vst.msk [vmem:[#allocation5 + $0xa8] sm:$0xff] %vm1037_vm2, %v2944_v44  ;;  %v2943_v27 = vadd.f32 %v2864_v50, %v2686_v23 }
 0x5e9   : > { %v4608_v48 = vpop.f32.mrf.mxu1 }
 0x5ea   : > { %2975 = vst.msk [vmem:[#allocation5 + $0xa0] sm:$0xff] %vm1037_vm2, %v2943_v27  ;;  %v2946_v34 = vadd.f32 %v4608_v48, %v2689_v61 }
 0x5eb   : > { %v2874_v4 = vpop.f32.mrf.mxu1 }
 0x5ec   : > { %2978 = vst.msk [vmem:[#allocation5 + $0xb8] sm:$0xff] %vm1037_vm2, %v2946_v34  ;;  %v2945_v41 = vadd.f32 %v2874_v4, %v2688_v63 }
 0x5ed   : > { %v4611_v59 = vpop.f32.mrf.mxu1 }
 0x5ee   : > { %2977 = vst.msk [vmem:[#allocation5 + $0xb0] sm:$0xff] %vm1037_vm2, %v2945_v41  ;;  %v2948_v33 = vadd.f32 %v4611_v59, %v2691_v8 }
 0x5ef   : > { %v2884_v39 = vpop.f32.mrf.mxu1 }
 0x5f0   : > { %2980 = vst.msk [vmem:[#allocation5 + $0xc8] sm:$0xff] %vm1037_vm2, %v2948_v33  ;;  %v2947_v57 = vadd.f32 %v2884_v39, %v2690_v15 }
 0x5f1   : > { %v4614_v54 = vpop.f32.mrf.mxu1 }
 0x5f2   : > { %2979 = vst.msk [vmem:[#allocation5 + $0xc0] sm:$0xff] %vm1037_vm2, %v2947_v57  ;;  %v2950_v46 = vadd.f32 %v4614_v54, %v2693_v5 }
 0x5f3   : > { %v2894_v20 = vpop.f32.mrf.mxu1 }
 0x5f4   : > { %2982 = vst.msk [vmem:[#allocation5 + $0xd8] sm:$0xff] %vm1037_vm2, %v2950_v46  ;;  %v2949_v37 = vadd.f32 %v2894_v20, %v2692_v30 }
 0x5f5   : > { %v4617_v18 = vpop.f32.mrf.mxu1 }
 0x5f6   : > { %2981 = vst.msk [vmem:[#allocation5 + $0xd0] sm:$0xff] %vm1037_vm2, %v2949_v37  ;;  %v2952_v16 = vadd.f32 %v4617_v18, %v2695_v6 }
 0x5f7   : > { %v2904_v53 = vpop.f32.mrf.mxu1 }
 0x5f8   : > { %2984 = vst.msk [vmem:[#allocation5 + $0xe8] sm:$0xff] %vm1037_vm2, %v2952_v16  ;;  %v2951_v21 = vadd.f32 %v2904_v53, %v2694_v55 }
 0x5f9   : > { %v4620_v13 = vpop.f32.mrf.mxu1 }
 0x5fa   : > { %2983 = vst.msk [vmem:[#allocation5 + $0xe0] sm:$0xff] %vm1037_vm2, %v2951_v21  ;;  %v2954_v47 = vadd.f32 %v4620_v13, %v2697_v19  ;;  %3022 = sbr.rel (%p4211_p3) target bundleno = 2118 (0x846), region = 84 }
 0x5fb   : > { %v2914_v17 = vpop.f32.mrf.mxu1 }
 0x5fc   : > { %2986 = vst.msk [vmem:[#allocation5 + $0xf8] sm:$0xff] %vm1037_vm2, %v2954_v47  ;;  %v2953_v26 = vadd.f32 %v2914_v17, %v2696_v35 }
 0x5fe   : > { %2985 = vst.msk [vmem:[#allocation5 + $0xf0] sm:$0xff] %vm1037_vm2, %v2953_v26 }
 0x5ff   : > { %v3054_v36 = vld [vmem:[#allocation4 + $0xf8] sm:$0xff]  ;;  %v3053_v62 = vld [vmem:[#allocation4 + $0xf0] sm:$0xff]  ;;  %v7913_v7 = vld [vmem:[#allocation33_spill] sm:$0xff]  ;;  %v5475_v49 = vmov 0  }
 0x600   : > { %v3038_v29 = vld [vmem:[#allocation4 + $0x78] sm:$0xff]  ;;  %3705 = vmatprep.subr.mxu0 %v7913_v7  ;;  %4974 = vset.pattern.permute.xlu1 %v5475_v49  ;;  %4975 = vrcp.f32 %v3054_v36  ;;  %v3037_v43 = vld [vmem:[#allocation4 + $0x70] sm:$0xff]  ;;  %v3052_v45 = vld [vmem:[#allocation4 + $0xe8] sm:$0xff] }
 0x601   : > { %4973 = vset.pattern.permute.xlu0 %v5475_v49  ;;  %4977 = vrcp.f32 %v3053_v62  ;;  %v7914_v28 = vld [vmem:[#allocation32_spill] sm:$0xff]  ;;  %v3036_v11 = vld [vmem:[#allocation4 + $0x68] sm:$0xff]  ;;  %v3051_v10 = vld [vmem:[#allocation4 + $0xe0] sm:$0xff] }
 0x602   : > { %3706 = vmatpush1.msra.mxu0 %v7914_v28  ;;  %4979 = vrcp.f32 %v3038_v29  ;;  %v3035_v14 = vld [vmem:[#allocation4 + $0x60] sm:$0xff]  ;;  %v3050_v23 = vld [vmem:[#allocation4 + $0xd8] sm:$0xff]  ;;  %v3049_v61 = vld [vmem:[#allocation4 + $0xd0] sm:$0xff] }
 0x603   : > { %4981 = vrcp.f32 %v3037_v43  ;;  %v3034_v44 = vld [vmem:[#allocation4 + $0x58] sm:$0xff]  ;;  %v3033_v60 = vld [vmem:[#allocation4 + $0x50] sm:$0xff]  ;;  %v3048_v51 = vld [vmem:[#allocation4 + $0xc8] sm:$0xff] }
 0x604   : > { %4983 = vrcp.f32 %v3052_v45  ;;  %v3032_v34 = vld [vmem:[#allocation4 + $0x48] sm:$0xff]  ;;  %v3047_v4 = vld [vmem:[#allocation4 + $0xc0] sm:$0xff]  ;;  %v3046_v32 = vld [vmem:[#allocation4 + $0xb8] sm:$0xff] }
 0x605   : > { %4985 = vrcp.f32 %v3036_v11  ;;  %v3031_v8 = vld [vmem:[#allocation4 + $0x40] sm:$0xff]  ;;  %v3030_v1 = vld [vmem:[#allocation4 + $0x38] sm:$0xff]  ;;  %v3045_v33 = vld [vmem:[#allocation4 + $0xb0] sm:$0xff] }
 0x606   : > { %4987 = vrcp.f32 %v3051_v10  ;;  %v3029_v39 = vld [vmem:[#allocation4 + $0x30] sm:$0xff]  ;;  %v3044_v5 = vld [vmem:[#allocation4 + $0xa8] sm:$0xff]  ;;  %v3043_v31 = vld [vmem:[#allocation4 + $0xa0] sm:$0xff] }
 0x607   : > { %4989 = vrcp.f32 %v3035_v14  ;;  %v3028_v2 = vld [vmem:[#allocation4 + $0x28] sm:$0xff]  ;;  %v3027_v46 = vld [vmem:[#allocation4 + $0x20] sm:$0xff]  ;;  %v3042_v20 = vld [vmem:[#allocation4 + $0x98] sm:$0xff] }
 0x608   : > { %4991 = vrcp.f32 %v3050_v23  ;;  %v3026_v6 = vld [vmem:[#allocation4 + $0x18] sm:$0xff]  ;;  %v3041_v3 = vld [vmem:[#allocation4 + $0x90] sm:$0xff]  ;;  %v3040_v55 = vld [vmem:[#allocation4 + $0x88] sm:$0xff] }
 0x609   : > { %4993 = vrcp.f32 %v3034_v44  ;;  %v3025_v18 = vld [vmem:[#allocation4 + $0x10] sm:$0xff]  ;;  %v3024_v9 = vld [vmem:[#allocation4 + $0x8] sm:$0xff]  ;;  %v3039_v53 = vld [vmem:[#allocation4 + $0x80] sm:$0xff] }
 0x60a   : > { %4995 = vrcp.f32 %v3049_v61  ;;  %v3023_v21 = vld [vmem:[#allocation4] sm:$0xff]  ;;  %v3118_v7 = vld [vmem:[#allocation5 + $0xf8] sm:$0xff]  ;;  %v3117_v49 = vld [vmem:[#allocation5 + $0xf0] sm:$0xff] }
 0x60b   : > { %4997 = vrcp.f32 %v3033_v60  ;;  %v7218_v28 = vld [vmem:[%s7915_s16] ss:$0 sm:$0xff]  ;;  %v3102_v14 = vld [vmem:[#allocation5 + $0x78] sm:$0xff]  ;;  %v3101_v23 = vld [vmem:[#allocation5 + $0x70] sm:$0xff] }
 0x60c   : > { %4999 = vrcp.f32 %v3048_v51  ;;  %v3100_v51 = vld [vmem:[#allocation5 + $0x68] sm:$0xff] }
 0x60d   : > { %v4976_v22 = vpop.eup %4975  ;;  %5001 = vrcp.f32 %v3032_v34 }
 0x60e   : > { %v4978_v50 = vpop.eup %4977  ;;  %3276 = vperm.xlu0 %4973, %v4976_v22   ;;  %5003 = vrcp.f32 %v3047_v4 }
 0x60f   : > { %v4980_v56 = vpop.eup %4979  ;;  %3271 = vperm.xlu1 %4974, %v4978_v50   ;;  %5005 = vrcp.f32 %v3031_v8 }
 0x610   : > { %v4982_v27 = vpop.eup %4981  ;;  %5007 = vrcp.f32 %v3046_v32 }
 0x611   : > { %v4984_v48 = vpop.eup %4983  ;;  %5009 = vrcp.f32 %v3030_v1  ;;  %v3099_v1 = vld [vmem:[#allocation5 + $0x60] sm:$0xff] }
 0x612   : > { %3196 = vperm.xlu0 %4973, %v4980_v56   ;;  %v4986_v63 = vpop.eup %4985  ;;  %5011 = vrcp.f32 %v3045_v33 }
 0x613   : > { %3191 = vperm.xlu1 %4974, %v4982_v27   ;;  %v4988_v24 = vpop.eup %4987  ;;  %5013 = vrcp.f32 %v3029_v39 }
 0x614   : > { %v4990_v25 = vpop.eup %4989  ;;  %5015 = vrcp.f32 %v3044_v5 }
 0x615   : > { %v4992_v41 = vpop.eup %4991  ;;  %5017 = vrcp.f32 %v3028_v2 }
 0x616   : > { %3266 = vperm.xlu0 %4973, %v4984_v48   ;;  %v4994_v59 = vpop.eup %4993  ;;  %5019 = vrcp.f32 %v3043_v31  ;;  %v3116_v48 = vld [vmem:[#allocation5 + $0xe8] sm:$0xff]  ;;  %v3098_v31 = vld [vmem:[#allocation5 + $0x58] sm:$0xff] }
 0x617   : > { %3186 = vperm.xlu1 %4974, %v4986_v63   ;;  %v4996_v15 = vpop.eup %4995  ;;  %5021 = vrcp.f32 %v3027_v46 }
 0x618   : > { %v4998_v0 = vpop.eup %4997  ;;  %5023 = vrcp.f32 %v3042_v20 }
 0x619   : > { %v5000_v40 = vpop.eup %4999  ;;  %5025 = vrcp.f32 %v3026_v6 }
 0x61a   : > { %3261 = vperm.xlu0 %4973, %v4988_v24   ;;  %v5002_v57 = vpop.eup %5001  ;;  %5027 = vrcp.f32 %v3041_v3 }
 0x61b   : > { %3181 = vperm.xlu1 %4974, %v4990_v25   ;;  %v5004_v54 = vpop.eup %5003  ;;  %5029 = vrcp.f32 %v3025_v18  ;;  %v3097_v18 = vld [vmem:[#allocation5 + $0x50] sm:$0xff] }
 0x61c   : > { %v5006_v30 = vpop.eup %5005  ;;  %5031 = vrcp.f32 %v3040_v55 }
 0x61d   : > { %v5008_v12 = vpop.eup %5007  ;;  %5033 = vrcp.f32 %v3024_v9 }
 0x61e   : > { %3256 = vperm.xlu0 %4973, %v4992_v41   ;;  %v5010_v52 = vpop.eup %5009  ;;  %5035 = vrcp.f32 %v3039_v53 }
 0x61f   : > { %3176 = vperm.xlu1 %4974, %v4994_v59   ;;  %v5012_v37 = vpop.eup %5011  ;;  %5037 = vrcp.f32 %v3023_v21  ;;  %v3115_v59 = vld [vmem:[#allocation5 + $0xe0] sm:$0xff] }
 0x620   : > { %v5014_v38 = vpop.eup %5013 }
 0x621   : > { %v5016_v42 = vpop.eup %5015 }
 0x622   : > { %3251 = vperm.xlu0 %4973, %v4996_v15   ;;  %v5018_v16 = vpop.eup %5017 }
 0x623   : > { %3171 = vperm.xlu1 %4974, %v4998_v0   ;;  %v5020_v58 = vpop.eup %5019 }
 0x624   : > { %v5022_v19 = vpop.eup %5021 }
 0x625   : > { %v5024_v13 = vpop.eup %5023 }
 0x626   : > { %3246 = vperm.xlu0 %4973, %v5000_v40   ;;  %v5026_v35 = vpop.eup %5025 }
 0x627   : > { %3166 = vperm.xlu1 %4974, %v5002_v57   ;;  %v5028_v47 = vpop.eup %5027 }
 0x628   : > { %v5030_v17 = vpop.eup %5029 }
 0x629   : > { %v5032_v26 = vpop.eup %5031 }
 0x62a   : > { %3241 = vperm.xlu0 %4973, %v5004_v54   ;;  %v5034_v36 = vpop.eup %5033  ;;  %v3114_v54 = vld [vmem:[#allocation5 + $0xd8] sm:$0xff] }
 0x62b   : > { %3161 = vperm.xlu1 %4974, %v5006_v30   ;;  %v5036_v62 = vpop.eup %5035 }
 0x62c   : > { %v5038_v29 = vpop.eup %5037 }
 0x62e   : > { %3236 = vperm.xlu0 %4973, %v5008_v12  }
 0x62f   : > { %3156 = vperm.xlu1 %4974, %v5010_v52  }
 0x632   : > { %3231 = vperm.xlu0 %4973, %v5012_v37  }
 0x633   : > { %3151 = vperm.xlu1 %4974, %v5014_v38   ;;  %v3113_v38 = vld [vmem:[#allocation5 + $0xd0] sm:$0xff] }
 0x636   : > { %3226 = vperm.xlu0 %4973, %v5016_v42  }
 0x637   : > { %3146 = vperm.xlu1 %4974, %v5018_v16  }
 0x63a   : > { %3221 = vperm.xlu0 %4973, %v5020_v58  }
 0x63b   : > { %3141 = vperm.xlu1 %4974, %v5022_v19  }
 0x63e   : > { %3216 = vperm.xlu0 %4973, %v5024_v13   ;;  %v3112_v13 = vld [vmem:[#allocation5 + $0xc8] sm:$0xff] }
 0x63f   : > { %3136 = vperm.xlu1 %4974, %v5026_v35   ;;  %v3096_v35 = vld [vmem:[#allocation5 + $0x48] sm:$0xff] }
 0x642   : > { %3211 = vperm.xlu0 %4973, %v5028_v47  }
 0x643   : > { %3131 = vperm.xlu1 %4974, %v5030_v17  }
 0x646   : > { %3206 = vperm.xlu0 %4973, %v5032_v26  }
 0x647   : > { %3126 = vperm.xlu1 %4974, %v5034_v36  }
 0x64a   : > { %3201 = vperm.xlu0 %4973, %v5036_v62  }
 0x64b   : > { %3121 = vperm.xlu1 %4974, %v5038_v29  }
 0x689   : > { %v3277_v43 = vpop.permute.xlu0 %3276 }
 0x68a   : > { %v7220_v45 = vmul.f32 %v3277_v43, %v3118_v7  ;;  %v3272_v11 = vpop.permute.xlu1 %3271  ;;  %v3111_v43 = vld [vmem:[#allocation5 + $0xc0] sm:$0xff] }
 0x68b   : > { %v7222_v10 = vmul.f32 %v3272_v11, %v3117_v49  ;;  %v3095_v11 = vld [vmem:[#allocation5 + $0x40] sm:$0xff] }
 0x68c   : > { %v3349_v44 = vmul.f32 %v7218_v28, %v7220_v45 }
 0x68d   : > { %v3197_v22 = vpop.permute.xlu0 %3196  ;;  %v3348_v50 = vmul.f32 %v7218_v28, %v7222_v10 }
 0x68e   : > { %v7228_v56 = vmul.f32 %v3197_v22, %v3102_v14  ;;  %v3192_v61 = vpop.permute.xlu1 %3191  ;;  %v3443_v27 = vsel %vm1037_vm2, %v3349_v44, 0.0 }
 0x68f   : > { %v7231_v60 = vmul.f32 %v3192_v61, %v3101_v23  ;;  %3444 = vadd.xlane.f32.xlu0 %v3443_v27  ;;  %v3440_v63 = vsel %vm1037_vm2, %v3348_v50, 0.0 }
 0x690   : > { %v3333_v34 = vmul.f32 %v7218_v28, %v7228_v56 }
 0x691   : > { %v3267_v24 = vpop.permute.xlu0 %3266  ;;  %v3332_v41 = vmul.f32 %v7218_v28, %v7231_v60 }
 0x692   : > { %v7236_v4 = vmul.f32 %v3267_v24, %v3116_v48  ;;  %v3187_v25 = vpop.permute.xlu1 %3186  ;;  %v3395_v8 = vsel %vm1037_vm2, %v3333_v34, 0.0 }
 0x693   : > { %v7241_v32 = vmul.f32 %v3187_v25, %v3100_v51  ;;  %3441 = vadd.xlane.f32.xlu0 %v3440_v63  ;;  %3396 = vadd.xlane.f32.xlu1 %v3395_v8  ;;  %v3392_v40 = vsel %vm1037_vm2, %v3332_v41, 0.0  ;;  %v3110_v51 = vld [vmem:[#allocation5 + $0xb8] sm:$0xff] }
 0x694   : > { %v3347_v15 = vmul.f32 %v7218_v28, %v7236_v4  ;;  %v3094_v63 = vld [vmem:[#allocation5 + $0x38] sm:$0xff] }
 0x695   : > { %v3262_v33 = vpop.permute.xlu0 %3261  ;;  %v3331_v57 = vmul.f32 %v7218_v28, %v7241_v32 }
 0x696   : > { %v7245_v0 = vmul.f32 %v3262_v33, %v3115_v59  ;;  %v3182_v39 = vpop.permute.xlu1 %3181  ;;  %v3437_v5 = vsel %vm1037_vm2, %v3347_v15, 0.0  ;;  %v3109_v33 = vld [vmem:[#allocation5 + $0xb0] sm:$0xff] }
 0x697   : > { %v7251_v2 = vmul.f32 %v3182_v39, %v3099_v1  ;;  %3393 = vadd.xlane.f32.xlu0 %v3392_v40  ;;  %3438 = vadd.xlane.f32.xlu1 %v3437_v5  ;;  %v3389_v52 = vsel %vm1037_vm2, %v3331_v57, 0.0  ;;  %v3093_v39 = vld [vmem:[#allocation5 + $0x30] sm:$0xff] }
 0x698   : > { %v3346_v30 = vmul.f32 %v7218_v28, %v7245_v0 }
 0x699   : > { %v3257_v46 = vpop.permute.xlu0 %3256  ;;  %v3330_v37 = vmul.f32 %v7218_v28, %v7251_v2 }
 0x69a   : > { %v7255_v12 = vmul.f32 %v3257_v46, %v3114_v54  ;;  %v3177_v20 = vpop.permute.xlu1 %3176  ;;  %v3434_v6 = vsel %vm1037_vm2, %v3346_v30, 0.0 }
 0x69b   : > { %v7261_v3 = vmul.f32 %v3177_v20, %v3098_v31  ;;  %3390 = vadd.xlane.f32.xlu0 %v3389_v52  ;;  %3435 = vadd.xlane.f32.xlu1 %v3434_v6  ;;  %v3386_v58 = vsel %vm1037_vm2, %v3330_v37, 0.0  ;;  %v3108_v52 = vld [vmem:[#allocation5 + $0xa8] sm:$0xff] }
 0x69c   : > { %v3345_v42 = vmul.f32 %v7218_v28, %v7255_v12  ;;  %v3092_v6 = vld [vmem:[#allocation5 + $0x28] sm:$0xff] }
 0x69d   : > { %v3252_v55 = vpop.permute.xlu0 %3251  ;;  %v3329_v19 = vmul.f32 %v7218_v28, %v7261_v3 }
 0x69e   : > { %v7265_v16 = vmul.f32 %v3252_v55, %v3113_v38  ;;  %v3172_v9 = vpop.permute.xlu1 %3171  ;;  %v3431_v53 = vsel %vm1037_vm2, %v3345_v42, 0.0 }
 0x69f   : > { %v7271_v21 = vmul.f32 %v3172_v9, %v3097_v18  ;;  %3387 = vadd.xlane.f32.xlu0 %v3386_v58  ;;  %3432 = vadd.xlane.f32.xlu1 %v3431_v53  ;;  %v3383_v62 = vsel %vm1037_vm2, %v3329_v19, 0.0  ;;  %v3107_v19 = vld [vmem:[#allocation5 + $0xa0] sm:$0xff] }
 0x6a0   : > { %v3344_v47 = vmul.f32 %v7218_v28, %v7265_v16 }
 0x6a1   : > { %v3247_v17 = vpop.permute.xlu0 %3246  ;;  %v3328_v7 = vmul.f32 %v7218_v28, %v7271_v21 }
 0x6a2   : > { %v7275_v26 = vmul.f32 %v3247_v17, %v3112_v13  ;;  %v3167_v36 = vpop.permute.xlu1 %3166  ;;  %v3428_v29 = vsel %vm1037_vm2, %v3344_v47, 0.0  ;;  %v3091_v13 = vld [vmem:[#allocation5 + $0x20] sm:$0xff] }
 0x6a3   : > { %v7281_v49 = vmul.f32 %v3167_v36, %v3096_v35  ;;  %3384 = vadd.xlane.f32.xlu0 %v3383_v62  ;;  %3429 = vadd.xlane.f32.xlu1 %v3428_v29  ;;  %v3380_v50 = vsel %vm1037_vm2, %v3328_v7, 0.0 }
 0x6a4   : > { %v3343_v14 = vmul.f32 %v7218_v28, %v7275_v26 }
 0x6a5   : > { %v3242_v23 = vpop.permute.xlu0 %3241  ;;  %v3327_v27 = vmul.f32 %v7218_v28, %v7281_v49 }
 0x6a6   : > { %v7285_v44 = vmul.f32 %v3242_v23, %v3111_v43  ;;  %v3162_v22 = vpop.permute.xlu1 %3161  ;;  %v3425_v61 = vsel %vm1037_vm2, %v3343_v14, 0.0  ;;  %v3090_v14 = vld [vmem:[#allocation5 + $0x18] sm:$0xff] }
 0x6a7   : > { %v7291_v48 = vmul.f32 %v3162_v22, %v3095_v11  ;;  %3381 = vadd.xlane.f32.xlu0 %v3380_v50  ;;  %3426 = vadd.xlane.f32.xlu1 %v3425_v61  ;;  %v3377_v41 = vsel %vm1037_vm2, %v3327_v27, 0.0  ;;  %v3106_v11 = vld [vmem:[#allocation5 + $0x98] sm:$0xff] }
 0x6a8   : > { %v3342_v34 = vmul.f32 %v7218_v28, %v7285_v44 }
 0x6a9   : > { %v3237_v24 = vpop.permute.xlu0 %3236  ;;  %v3326_v1 = vmul.f32 %v7218_v28, %v7291_v48 }
 0x6aa   : > { %v7295_v25 = vmul.f32 %v3237_v24, %v3110_v51  ;;  %v3157_v8 = vpop.permute.xlu1 %3156  ;;  %v3422_v59 = vsel %vm1037_vm2, %v3342_v34, 0.0  ;;  %v3105_v24 = vld [vmem:[#allocation5 + $0x90] sm:$0xff] }
 0x6ab   : > { %v7301_v15 = vmul.f32 %v3157_v8, %v3094_v63  ;;  %3378 = vadd.xlane.f32.xlu0 %v3377_v41  ;;  %3423 = vadd.xlane.f32.xlu1 %v3422_v59  ;;  %v3374_v31 = vsel %vm1037_vm2, %v3326_v1, 0.0  ;;  %v3089_v8 = vld [vmem:[#allocation5 + $0x10] sm:$0xff] }
 0x6ac   : > { %v3341_v40 = vmul.f32 %v7218_v28, %v7295_v25 }
 0x6ad   : > { %v3232_v5 = vpop.permute.xlu0 %3231  ;;  %v3325_v46 = vmul.f32 %v7218_v28, %v7301_v15 }
 0x6ae   : > { %v7305_v57 = vmul.f32 %v3232_v5, %v3109_v33  ;;  %v3152_v54 = vpop.permute.xlu1 %3151  ;;  %v3419_v30 = vsel %vm1037_vm2, %v3341_v40, 0.0 }
 0x6af   : > { %v7311_v20 = vmul.f32 %v3152_v54, %v3093_v39  ;;  %3375 = vadd.xlane.f32.xlu0 %v3374_v31  ;;  %3420 = vadd.xlane.f32.xlu1 %v3419_v30  ;;  %v3371_v55 = vsel %vm1037_vm2, %v3325_v46, 0.0  ;;  %v3104_v31 = vld [vmem:[#allocation5 + $0x88] sm:$0xff] }
 0x6b0   : > { %v3340_v37 = vmul.f32 %v7218_v28, %v7305_v57  ;;  %v3088_v30 = vld [vmem:[#allocation5 + $0x8] sm:$0xff] }
 0x6b1   : > { %v3227_v38 = vpop.permute.xlu0 %3226  ;;  %v3324_v58 = vmul.f32 %v7218_v28, %v7311_v20 }
 0x6b2   : > { %v7315_v18 = vmul.f32 %v3227_v38, %v3108_v52  ;;  %v3147_v42 = vpop.permute.xlu1 %3146  ;;  %v3416_v9 = vsel %vm1037_vm2, %v3340_v37, 0.0 }
 0x6b3   : > { %v7321_v53 = vmul.f32 %v3147_v42, %v3092_v6  ;;  %3372 = vadd.xlane.f32.xlu0 %v3371_v55  ;;  %3417 = vadd.xlane.f32.xlu1 %v3416_v9  ;;  %v3368_v62 = vsel %vm1037_vm2, %v3324_v58, 0.0  ;;  %v3103_v58 = vld [vmem:[#allocation5 + $0x80] sm:$0xff] }
 0x6b4   : > { %v3339_v35 = vmul.f32 %v7218_v28, %v7315_v18 }
 0x6b5   : > { %v3222_v47 = vpop.permute.xlu0 %3221  ;;  %v3323_v7 = vmul.f32 %v7218_v28, %v7321_v53 }
 0x6b6   : > { %v7325_v17 = vmul.f32 %v3222_v47, %v3107_v19  ;;  %v3142_v36 = vpop.permute.xlu1 %3141  ;;  %v3413_v29 = vsel %vm1037_vm2, %v3339_v35, 0.0  ;;  %v3087_v19 = vld [vmem:[#allocation5] sm:$0xff] }
 0x6b7   : > { %v7331_v43 = vmul.f32 %v3142_v36, %v3091_v13  ;;  %3369 = vadd.xlane.f32.xlu0 %v3368_v62  ;;  %3414 = vadd.xlane.f32.xlu1 %v3413_v29  ;;  %v3365_v27 = vsel %vm1037_vm2, %v3323_v7, 0.0 }
 0x6b8   : > { %v3338_v23 = vmul.f32 %v7218_v28, %v7325_v17 }
 0x6b9   : > { %v3217_v22 = vpop.permute.xlu0 %3216  ;;  %v3322_v63 = vmul.f32 %v7218_v28, %v7331_v43 }
 0x6ba   : > { %v7335_v50 = vmul.f32 %v3217_v22, %v3106_v11  ;;  %v3137_v61 = vpop.permute.xlu1 %3136  ;;  %v3410_v51 = vsel %vm1037_vm2, %v3338_v23, 0.0 }
 0x6bb   : > { %v7341_v34 = vmul.f32 %v3137_v61, %v3090_v14  ;;  %3366 = vadd.xlane.f32.xlu0 %v3365_v27  ;;  %3411 = vadd.xlane.f32.xlu1 %v3410_v51  ;;  %v3362_v39 = vsel %vm1037_vm2, %v3322_v63, 0.0  ;;  %v5476_v51 = vmov 0.0   ;;  %v3671_v63 = vld [vmem:[#allocation11] sm:$0xff] }
 0x6bc   : > { %v3337_v41 = vmul.f32 %v7218_v28, %v7335_v50  ;;  %3739 = vmatprep.mubr.f32.mxu0 %v5476_v51 }
 0x6bd   : > { %v3212_v59 = vpop.permute.xlu0 %3211  ;;  %v3321_v5 = vmul.f32 %v7218_v28, %v7341_v34  ;;  %4245 = vmatmul.mubr.msk.f32.vlgmr.msra.gmra.mxu0 %vm1037_vm2, %v3671_v63 }
 0x6be   : > { %v7345_v1 = vmul.f32 %v3212_v59, %v3105_v24  ;;  %v3132_v33 = vpop.permute.xlu1 %3131  ;;  %v3407_v40 = vsel %vm1037_vm2, %v3337_v41, 0.0  ;;  %v7383_v24 = vld [vmem:[%s7916_s2] sm:$0xff] }
 0x6bf   : > { %v7351_v54 = vmul.f32 %v3132_v33, %v3089_v8  ;;  %3363 = vadd.xlane.f32.xlu0 %v3362_v39  ;;  %3408 = vadd.xlane.f32.xlu1 %v3407_v40  ;;  %v3359_v38 = vsel %vm1037_vm2, %v3321_v5, 0.0 }
 0x6c0   : > { %v3336_v46 = vmul.f32 %v7218_v28, %v7345_v1  ;;  %4459 = vmatprep.mubr.msk.f32.mxu1 %vm1037_vm2, %v7383_v24 }
 0x6c1   : > { %v3207_v52 = vpop.permute.xlu0 %3206  ;;  %v3320_v55 = vmul.f32 %v7218_v28, %v7351_v54 }
 0x6c2   : > { %v7355_v6 = vmul.f32 %v3207_v52, %v3104_v31  ;;  %v3127_v37 = vpop.permute.xlu1 %3126  ;;  %v3404_v42 = vsel %vm1037_vm2, %v3336_v46, 0.0 }
 0x6c3   : > { %v7361_v9 = vmul.f32 %v3127_v37, %v3088_v30  ;;  %3360 = vadd.xlane.f32.xlu0 %v3359_v38  ;;  %3405 = vadd.xlane.f32.xlu1 %v3404_v42  ;;  %v3356_v62 = vsel %vm1037_vm2, %v3320_v55, 0.0 }
 0x6c4   : > { %v3335_v13 = vmul.f32 %v7218_v28, %v7355_v6 }
 0x6c5   : > { %v3202_v35 = vpop.permute.xlu0 %3201  ;;  %v3319_v7 = vmul.f32 %v7218_v28, %v7361_v9 }
 0x6c6   : > { %v7365_v47 = vmul.f32 %v3202_v35, %v3103_v58  ;;  %v3122_v36 = vpop.permute.xlu1 %3121  ;;  %v3401_v29 = vsel %vm1037_vm2, %v3335_v13, 0.0 }
 0x6c7   : > { %v7371_v11 = vmul.f32 %v3122_v36, %v3087_v19  ;;  %3357 = vadd.xlane.f32.xlu0 %v3356_v62  ;;  %3402 = vadd.xlane.f32.xlu1 %v3401_v29  ;;  %v3353_v23 = vsel %vm1037_vm2, %v3319_v7, 0.0 }
 0x6c8   : > { %v3334_v14 = vmul.f32 %v7218_v28, %v7365_v47 }
 0x6c9   : > { %v3318_v61 = vmul.f32 %v7218_v28, %v7371_v11 }
 0x6ca   : > { %v3398_v22 = vsel %vm1037_vm2, %v3334_v14, 0.0 }
 0x6cb   : > { %3354 = vadd.xlane.f32.xlu0 %v3353_v23  ;;  %3399 = vadd.xlane.f32.xlu1 %v3398_v22  ;;  %v3350_v27 = vsel %vm1037_vm2, %v3318_v61, 0.0 }
 0x6cf   : > { %3351 = vadd.xlane.f32.xlu0 %v3350_v27 }
 0x718   : > { %v3445_v8 = vpop.xlane.xlu0 %3444 }
 0x719   : > { %v4244_v28 = vmul.f32 -1.442695, %v3445_v8 }
 0x71b   : > { %5039 = vpow2.f32 %v4244_v28 }
 0x71c   : > { %v3442_v41 = vpop.xlane.xlu0 %3441  ;;  %v3397_v59 = vpop.xlane.xlu1 %3396 }
 0x71d   : > { %v4243_v33 = vmul.f32 -1.442695, %v3442_v41  ;;  %v4228_v39 = vmul.f32 -1.442695, %v3397_v59 }
 0x71f   : > { %5041 = vpow2.f32 %v4243_v33 }
 0x720   : > { %5043 = vpow2.f32 %v4228_v39  ;;  %v3394_v40 = vpop.xlane.xlu0 %3393  ;;  %v3439_v5 = vpop.xlane.xlu1 %3438 }
 0x721   : > { %v4227_v31 = vmul.f32 -1.442695, %v3394_v40  ;;  %v4242_v30 = vmul.f32 -1.442695, %v3439_v5 }
 0x723   : > { %5045 = vpow2.f32 %v4227_v31 }
 0x724   : > { %5047 = vpow2.f32 %v4242_v30  ;;  %v3391_v46 = vpop.xlane.xlu0 %3390  ;;  %v3436_v52 = vpop.xlane.xlu1 %3435 }
 0x725   : > { %v4226_v37 = vmul.f32 -1.442695, %v3391_v46  ;;  %v4241_v38 = vmul.f32 -1.442695, %v3436_v52 }
 0x727   : > { %5049 = vpow2.f32 %v4226_v37 }
 0x728   : > { %v5040_v42 = vpop.eup %5039  ;;  %5051 = vpow2.f32 %v4241_v38  ;;  %v3388_v55 = vpop.xlane.xlu0 %3387 }
 0x729   : > { %v3433_v58 = vpop.xlane.xlu1 %3432  ;;  %v3573_v19 = vadd.f32 1.0, %v5040_v42  ;;  %v4225_v13 = vmul.f32 -1.442695, %v3388_v55 }
 0x72a   : > { %v4240_v35 = vmul.f32 -1.442695, %v3433_v58 }
 0x72b   : > { %5053 = vrcp.f32 %v3573_v19 }
 0x72c   : > { %v5042_v36 = vpop.eup %5041  ;;  %5055 = vpow2.f32 %v4225_v13  ;;  %v3385_v62 = vpop.xlane.xlu0 %3384 }
 0x72d   : > { %v3430_v29 = vpop.xlane.xlu1 %3429  ;;  %v5044_v7 = vpop.eup %5043  ;;  %v3572_v14 = vadd.f32 1.0, %v5042_v36  ;;  %5057 = vpow2.f32 %v4240_v35  ;;  %v4224_v23 = vmul.f32 -1.442695, %v3385_v62 }
 0x72e   : > { %v3557_v22 = vadd.f32 1.0, %v5044_v7  ;;  %v4239_v61 = vmul.f32 -1.442695, %v3430_v29 }
 0x72f   : > { %5059 = vrcp.f32 %v3572_v14 }
 0x730   : > { %v5046_v27 = vpop.eup %5045  ;;  %5061 = vrcp.f32 %v3557_v22  ;;  %v3382_v51 = vpop.xlane.xlu0 %3381 }
 0x731   : > { %v3427_v63 = vpop.xlane.xlu1 %3426  ;;  %v5048_v8 = vpop.eup %5047  ;;  %v3556_v28 = vadd.f32 1.0, %v5046_v27  ;;  %5063 = vpow2.f32 %v4224_v23  ;;  %v4223_v41 = vmul.f32 -1.442695, %v3382_v51 }
 0x732   : > { %v3571_v59 = vadd.f32 1.0, %v5048_v8  ;;  %5065 = vpow2.f32 %v4239_v61  ;;  %v4238_v33 = vmul.f32 -1.442695, %v3427_v63 }
 0x733   : > { %5067 = vrcp.f32 %v3556_v28 }
 0x734   : > { %v5050_v39 = vpop.eup %5049  ;;  %5069 = vrcp.f32 %v3571_v59  ;;  %v3379_v40 = vpop.xlane.xlu0 %3378 }
 0x735   : > { %v3424_v5 = vpop.xlane.xlu1 %3423  ;;  %v5052_v31 = vpop.eup %5051  ;;  %v3555_v30 = vadd.f32 1.0, %v5050_v39  ;;  %5071 = vpow2.f32 %v4223_v41  ;;  %v4222_v46 = vmul.f32 -1.442695, %v3379_v40 }
 0x736   : > { %v3570_v52 = vadd.f32 1.0, %v5052_v31  ;;  %5073 = vpow2.f32 %v4238_v33  ;;  %v4237_v37 = vmul.f32 -1.442695, %v3424_v5 }
 0x737   : > { %5075 = vrcp.f32 %v3555_v30 }
 0x738   : > { %v5054_v38 = vpop.eup %5053  ;;  %5077 = vrcp.f32 %v3570_v52  ;;  %v3376_v42 = vpop.xlane.xlu0 %3375 }
 0x739   : > { %v3421_v55 = vpop.xlane.xlu1 %3420  ;;  %v5056_v58 = vpop.eup %5055  ;;  %5079 = vpow2.f32 %v4222_v46  ;;  %v4221_v19 = vmul.f32 -1.442695, %v3376_v42  ;;  %v3669_v13 = vmul.f32 %v5054_v38, %v7220_v45 }
 0x73a   : > { %v5058_v35 = vpop.eup %5057  ;;  %v3554_v36 = vadd.f32 1.0, %v5056_v58  ;;  %5081 = vpow2.f32 %v4237_v37  ;;  %v4236_v62 = vmul.f32 -1.442695, %v3421_v55 }
 0x73b   : > { %v3569_v29 = vadd.f32 1.0, %v5058_v35  ;;  %5083 = vpow2.f32 %v4221_v19  ;;  %4427 = vmatprep.subr.msk.mxu1 %vm1037_vm2, %v3669_v13 }
 0x73c   : > { %v5060_v7 = vpop.eup %5059  ;;  %5085 = vrcp.f32 %v3554_v36  ;;  %v3373_v14 = vpop.xlane.xlu0 %3372 }
 0x73d   : > { %v3418_v23 = vpop.xlane.xlu1 %3417  ;;  %v5062_v22 = vpop.eup %5061  ;;  %5087 = vrcp.f32 %v3569_v29  ;;  %v4220_v61 = vmul.f32 -1.442695, %v3373_v14  ;;  %v3668_v51 = vmul.f32 %v5060_v7, %v7222_v10 }
 0x73e   : > { %v4235_v27 = vmul.f32 -1.442695, %v3418_v23  ;;  %v5064_v63 = vpop.eup %5063  ;;  %5089 = vpow2.f32 %v4236_v62  ;;  %v3653_v45 = vmul.f32 %v5062_v22, %v7228_v56 }
 0x73f   : > { %v5066_v8 = vpop.eup %5065  ;;  %v3553_v28 = vadd.f32 1.0, %v5064_v63  ;;  %5091 = vpow2.f32 %v4220_v61 }
 0x740   : > { %v5068_v41 = vpop.eup %5067  ;;  %v3568_v59 = vadd.f32 1.0, %v5066_v8  ;;  %5093 = vpow2.f32 %v4235_v27  ;;  %4428 = vmatpush3.xpose.msk.msra.mxu1 %vm1037_vm2, %v3653_v45  ;;  %v3370_v33 = vpop.xlane.xlu0 %3369 }
 0x741   : > { %v3415_v39 = vpop.xlane.xlu1 %3414  ;;  %v5070_v40 = vpop.eup %5069  ;;  %5095 = vrcp.f32 %v3553_v28  ;;  %v4219_v5 = vmul.f32 -1.442695, %v3370_v33  ;;  %4429 = vmatprep.subr.msk.mxu1 %vm1037_vm2, %v3668_v51  ;;  %v3652_v31 = vmul.f32 %v5068_v41, %v7231_v60 }
 0x742   : > { %v4234_v10 = vmul.f32 -1.442695, %v3415_v39  ;;  %v5072_v30 = vpop.eup %5071  ;;  %5097 = vrcp.f32 %v3568_v59  ;;  %v3667_v56 = vmul.f32 %v5070_v40, %v7236_v4 }
 0x743   : > { %v5074_v46 = vpop.eup %5073  ;;  %v3552_v52 = vadd.f32 1.0, %v5072_v30  ;;  %5099 = vpow2.f32 %v4219_v5 }
 0x744   : > { %v5076_v37 = vpop.eup %5075  ;;  %v3567_v38 = vadd.f32 1.0, %v5074_v46  ;;  %5101 = vpow2.f32 %v4234_v10  ;;  %4430 = vmatpush3.xpose.msk.msra.mxu1 %vm1037_vm2, %v3652_v31  ;;  %v3367_v42 = vpop.xlane.xlu0 %3366 }
 0x745   : > { %v3412_v55 = vpop.xlane.xlu1 %3411  ;;  %v5078_v58 = vpop.eup %5077  ;;  %5103 = vrcp.f32 %v3552_v52  ;;  %v4218_v19 = vmul.f32 -1.442695, %v3367_v42  ;;  %4431 = vmatprep.subr.msk.mxu1 %vm1037_vm2, %v3667_v56  ;;  %v3651_v13 = vmul.f32 %v5076_v37, %v7241_v32 }
 0x746   : > { %v4233_v60 = vmul.f32 -1.442695, %v3412_v55  ;;  %v5080_v35 = vpop.eup %5079  ;;  %5105 = vrcp.f32 %v3567_v38  ;;  %v3666_v4 = vmul.f32 %v5078_v58, %v7245_v0 }
 0x747   : > { %v5082_v36 = vpop.eup %5081  ;;  %v3551_v62 = vadd.f32 1.0, %v5080_v35  ;;  %5107 = vpow2.f32 %v4218_v19 }
 0x748   : > { %v5084_v29 = vpop.eup %5083  ;;  %v3566_v7 = vadd.f32 1.0, %v5082_v36  ;;  %5109 = vpow2.f32 %v4233_v60  ;;  %4432 = vmatpush3.xpose.msk.msra.mxu1 %vm1037_vm2, %v3651_v13  ;;  %v3364_v14 = vpop.xlane.xlu0 %3363 }
 0x749   : > { %v3409_v23 = vpop.xlane.xlu1 %3408  ;;  %v5086_v22 = vpop.eup %5085  ;;  %5111 = vrcp.f32 %v3551_v62  ;;  %v3550_v61 = vadd.f32 1.0, %v5084_v29  ;;  %v4217_v27 = vmul.f32 -1.442695, %v3364_v14  ;;  %4433 = vmatprep.subr.msk.mxu1 %vm1037_vm2, %v3666_v4 }
 0x74a   : > { %v4232_v32 = vmul.f32 -1.442695, %v3409_v23  ;;  %v5088_v51 = vpop.eup %5087  ;;  %5113 = vrcp.f32 %v3566_v7  ;;  %v3650_v0 = vmul.f32 %v5086_v22, %v7251_v2 }
 0x74b   : > { %v5090_v63 = vpop.eup %5089  ;;  %5115 = vrcp.f32 %v3550_v61  ;;  %v3665_v45 = vmul.f32 %v5088_v51, %v7255_v12 }
 0x74c   : > { %v5092_v8 = vpop.eup %5091  ;;  %v3565_v28 = vadd.f32 1.0, %v5090_v63  ;;  %5117 = vpow2.f32 %v4217_v27  ;;  %4434 = vmatpush3.xpose.msk.msra.mxu1 %vm1037_vm2, %v3650_v0  ;;  %v3361_v41 = vpop.xlane.xlu0 %3360 }
 0x74d   : > { %v3406_v59 = vpop.xlane.xlu1 %3405  ;;  %v5094_v33 = vpop.eup %5093  ;;  %v3549_v39 = vadd.f32 1.0, %v5092_v8  ;;  %5119 = vpow2.f32 %v4232_v32  ;;  %v4216_v40 = vmul.f32 -1.442695, %v3361_v41  ;;  %4435 = vmatprep.subr.msk.mxu1 %vm1037_vm2, %v3665_v45 }
 0x74e   : > { %v5096_v5 = vpop.eup %5095  ;;  %5121 = vrcp.f32 %v3565_v28  ;;  %v3564_v2 = vadd.f32 1.0, %v5094_v33  ;;  %v4231_v10 = vmul.f32 -1.442695, %v3406_v59 }
 0x74f   : > { %v5098_v31 = vpop.eup %5097  ;;  %5123 = vrcp.f32 %v3549_v39  ;;  %v3649_v12 = vmul.f32 %v5096_v5, %v7261_v3 }
 0x750   : > { %v5100_v30 = vpop.eup %5099  ;;  %5125 = vrcp.f32 %v3564_v2  ;;  %v3358_v56 = vpop.xlane.xlu0 %3357  ;;  %v3664_v46 = vmul.f32 %v5098_v31, %v7265_v16 }
 0x751   : > { %v3403_v52 = vpop.xlane.xlu1 %3402  ;;  %v5102_v37 = vpop.eup %5101  ;;  %v3548_v38 = vadd.f32 1.0, %v5100_v30  ;;  %5127 = vpow2.f32 %v4216_v40  ;;  %4436 = vmatpush3.xpose.msk.msra.mxu1 %vm1037_vm2, %v3649_v12  ;;  %v4215_v42 = vmul.f32 -1.442695, %v3358_v56 }
 0x752   : > { %v5104_v55 = vpop.eup %5103  ;;  %v3563_v58 = vadd.f32 1.0, %v5102_v37  ;;  %5129 = vpow2.f32 %v4231_v10  ;;  %4437 = vmatprep.subr.msk.mxu1 %vm1037_vm2, %v3664_v46  ;;  %v4230_v19 = vmul.f32 -1.442695, %v3403_v52 }
 0x753   : > { %v5106_v60 = vpop.eup %5105  ;;  %5131 = vrcp.f32 %v3548_v38  ;;  %v3648_v3 = vmul.f32 %v5104_v55, %v7271_v21 }
 0x754   : > { %v5108_v13 = vpop.eup %5107  ;;  %5133 = vrcp.f32 %v3563_v58  ;;  %v3355_v16 = vpop.xlane.xlu0 %3354  ;;  %v3663_v35 = vmul.f32 %v5106_v60, %v7275_v26 }
 0x755   : > { %v3400_v4 = vpop.xlane.xlu1 %3399  ;;  %v5110_v36 = vpop.eup %5109  ;;  %v3547_v62 = vadd.f32 1.0, %v5108_v13  ;;  %5135 = vpow2.f32 %v4215_v42  ;;  %4438 = vmatpush3.xpose.msk.msra.mxu1 %vm1037_vm2, %v3648_v3  ;;  %v4214_v29 = vmul.f32 -1.442695, %v3355_v16 }
 0x756   : > { %v5112_v7 = vpop.eup %5111  ;;  %v3562_v14 = vadd.f32 1.0, %v5110_v36  ;;  %5137 = vpow2.f32 %v4230_v19  ;;  %4439 = vmatprep.subr.msk.mxu1 %vm1037_vm2, %v3663_v35  ;;  %v4229_v23 = vmul.f32 -1.442695, %v3400_v4 }
 0x757   : > { %v5114_v22 = vpop.eup %5113  ;;  %5139 = vrcp.f32 %v3547_v62  ;;  %v3647_v21 = vmul.f32 %v5112_v7, %v7281_v49 }
 0x758   : > { %v5116_v61 = vpop.eup %5115  ;;  %5141 = vrcp.f32 %v3562_v14  ;;  %v3352_v26 = vpop.xlane.xlu0 %3351  ;;  %v3662_v27 = vmul.f32 %v5114_v22, %v7285_v44 }
 0x759   : > { %v5118_v32 = vpop.eup %5117  ;;  %5143 = vpow2.f32 %v4214_v29  ;;  %4440 = vmatpush3.xpose.msk.msra.mxu1 %vm1037_vm2, %v3647_v21  ;;  %v4213_v51 = vmul.f32 -1.442695, %v3352_v26  ;;  %v3646_v0 = vmul.f32 %v5116_v61, %v7291_v48 }
 0x75a   : > { %v5120_v63 = vpop.eup %5119  ;;  %v3546_v45 = vadd.f32 1.0, %v5118_v32  ;;  %5145 = vpow2.f32 %v4229_v23  ;;  %4441 = vmatprep.subr.msk.mxu1 %vm1037_vm2, %v3662_v27 }
 0x75b   : > { %v5122_v8 = vpop.eup %5121  ;;  %v3561_v28 = vadd.f32 1.0, %v5120_v63  ;;  %5147 = vpow2.f32 %v4213_v51 }
 0x75c   : > { %v5124_v49 = vpop.eup %5123  ;;  %5149 = vrcp.f32 %v3546_v45  ;;  %v3661_v41 = vmul.f32 %v5122_v8, %v7295_v25 }
 0x75d   : > { %v5126_v44 = vpop.eup %5125  ;;  %5151 = vrcp.f32 %v3561_v28  ;;  %4442 = vmatpush3.xpose.msk.msra.mxu1 %vm1037_vm2, %v3646_v0  ;;  %v3645_v59 = vmul.f32 %v5124_v49, %v7301_v15 }
 0x75e   : > { %v5128_v33 = vpop.eup %5127  ;;  %4443 = vmatprep.subr.msk.mxu1 %vm1037_vm2, %v3661_v41  ;;  %v3660_v48 = vmul.f32 %v5126_v44, %v7305_v57 }
 0x75f   : > { %v5130_v39 = vpop.eup %5129  ;;  %v3545_v40 = vadd.f32 1.0, %v5128_v33 }
 0x760   : > { %v5132_v5 = vpop.eup %5131  ;;  %v3560_v2 = vadd.f32 1.0, %v5130_v39 }
 0x761   : > { %v5134_v10 = vpop.eup %5133  ;;  %5153 = vrcp.f32 %v3545_v40  ;;  %4444 = vmatpush3.xpose.msk.msra.mxu1 %vm1037_vm2, %v3645_v59  ;;  %v3644_v25 = vmul.f32 %v5132_v5, %v7311_v20 }
 0x762   : > { %v5136_v31 = vpop.eup %5135  ;;  %5155 = vrcp.f32 %v3560_v2  ;;  %4445 = vmatprep.subr.msk.mxu1 %vm1037_vm2, %v3660_v48  ;;  %v3659_v15 = vmul.f32 %v5134_v10, %v7315_v18 }
 0x763   : > { %v5138_v12 = vpop.eup %5137  ;;  %v3544_v30 = vadd.f32 1.0, %v5136_v31 }
 0x764   : > { %v5140_v56 = vpop.eup %5139  ;;  %v3559_v57 = vadd.f32 1.0, %v5138_v12 }
 0x765   : > { %v5142_v46 = vpop.eup %5141  ;;  %5157 = vrcp.f32 %v3544_v30  ;;  %4446 = vmatpush3.xpose.msk.msra.mxu1 %vm1037_vm2, %v3644_v25  ;;  %v3643_v52 = vmul.f32 %v5140_v56, %v7321_v53 }
 0x766   : > { %v5144_v37 = vpop.eup %5143  ;;  %5159 = vrcp.f32 %v3559_v57  ;;  %4447 = vmatprep.subr.msk.mxu1 %vm1037_vm2, %v3659_v15  ;;  %v3658_v20 = vmul.f32 %v5142_v46, %v7325_v17 }
 0x767   : > { %v5146_v38 = vpop.eup %5145  ;;  %v3543_v42 = vadd.f32 1.0, %v5144_v37 }
 0x768   : > { %v5148_v55 = vpop.eup %5147  ;;  %v3558_v18 = vadd.f32 1.0, %v5146_v38 }
 0x769   : > { %v5150_v58 = vpop.eup %5149  ;;  %5161 = vrcp.f32 %v3543_v42  ;;  %v3542_v19 = vadd.f32 1.0, %v5148_v55  ;;  %4448 = vmatpush3.xpose.msk.msra.mxu1 %vm1037_vm2, %v3643_v52 }
 0x76a   : > { %v5152_v60 = vpop.eup %5151  ;;  %5163 = vrcp.f32 %v3558_v18  ;;  %4449 = vmatprep.subr.msk.mxu1 %vm1037_vm2, %v3658_v20  ;;  %v3642_v53 = vmul.f32 %v5150_v58, %v7331_v43 }
 0x76b   : > { %5165 = vrcp.f32 %v3542_v19  ;;  %v3657_v3 = vmul.f32 %v5152_v60, %v7335_v50 }
 0x76d   : > { %4450 = vmatpush3.xpose.msk.msra.mxu1 %vm1037_vm2, %v3642_v53 }
 0x76e   : > { %v5154_v17 = vpop.eup %5153  ;;  %4451 = vmatprep.subr.msk.mxu1 %vm1037_vm2, %v3657_v3 }
 0x76f   : > { %v5156_v13 = vpop.eup %5155  ;;  %v3641_v16 = vmul.f32 %v5154_v17, %v7341_v34 }
 0x770   : > { %v3656_v35 = vmul.f32 %v5156_v13, %v7345_v1 }
 0x771   : > { %4452 = vmatpush3.xpose.msk.msra.mxu1 %vm1037_vm2, %v3641_v16 }
 0x772   : > { %v5158_v4 = vpop.eup %5157  ;;  %4453 = vmatprep.subr.msk.mxu1 %vm1037_vm2, %v3656_v35 }
 0x773   : > { %v5160_v36 = vpop.eup %5159  ;;  %v3640_v43 = vmul.f32 %v5158_v4, %v7351_v54 }
 0x774   : > { %v3655_v50 = vmul.f32 %v5160_v36, %v7355_v6 }
 0x775   : > { %4454 = vmatpush3.xpose.msk.msra.mxu1 %vm1037_vm2, %v3640_v43 }
 0x776   : > { %v5162_v62 = vpop.eup %5161  ;;  %4455 = vmatprep.subr.msk.mxu1 %vm1037_vm2, %v3655_v50 }
 0x777   : > { %v5164_v29 = vpop.eup %5163  ;;  %v3639_v34 = vmul.f32 %v5162_v62, %v7361_v9 }
 0x778   : > { %v5166_v1 = vpop.eup %5165  ;;  %v3654_v7 = vmul.f32 %v5164_v29, %v7365_v47 }
 0x779   : > { %4456 = vmatpush3.xpose.msk.msra.mxu1 %vm1037_vm2, %v3639_v34  ;;  %v3638_v14 = vmul.f32 %v5166_v1, %v7371_v11 }
 0x77a   : > { %4457 = vmatprep.subr.msk.mxu1 %vm1037_vm2, %v3654_v7 }
 0x77d   : > { %4458 = vmatpush3.xpose.msk.msra.mxu1 %vm1037_vm2, %v3638_v14  ;;  %v3741_v54 = vpop.f32.mrf.mxu0 }
 0x77f   : > { %v3743_v22 = vpop.f32.mrf.mxu0 }
 0x780   : > { %4460 = vmatmul.mubr.msk.f32.vlgmr.msra.gmra.mxu1 %vm1037_vm2, %v7383_v24 }
 0x840   : > { %v3911_v6 = vpop.f32.mrf.mxu1 }
 0x841   : > { %v3912_v23 = vadd.f32 %v3911_v6, %v3741_v54 }
 0x842   : > { %v3913_v21 = vpop.f32.mrf.mxu1 }
 0x843   : > { %3916 = vst [vmem:[%s5793_s26] sm:$0xff] %v3912_v23  ;;  %v3914_v9 = vadd.f32 %v3913_v21, %v3743_v22 }
 0x845   : > { %3917 = vst [vmem:[%s5793_s26 + $0x8] sm:$0xff] %v3914_v9 }
 0x846 PF: > { %s7917_s11 = sld [smem:[#allocation26_spill]]  ;;  %s3938_s12 = sshll.u32 %s5793_s26, 4  ;;  %s3939_s12 = int_to_ptr.vmem [resolvable:$true] %s3938_s12 }
 0x847   : > { %s7919_s24 = sld [smem:[#allocation103_spill]]  ;;  %s3919_s10 = scalar_lea.sflag [#allocation8], %s5760_s3 }
 0x848   : > { %s5301_s6 = scalar_lea.vmem %s3939_s12, 256  ;;  %s5477_s16 = smov [#allocation15]  }
 0x849   : > { %p5302_p6 = scmp.ne.s32.totalorder %s3939_s12, %s5301_s6  ;;  %s5305_s29 = sshll.u32 %s5477_s16, 4  ;;  %s5306_s29 = int_to_ptr.vmem [resolvable:$false] %s5305_s29 }
 0x84a   : > { %s5307_s30 = scalar_lea.vmem %s5306_s29, 512  ;;  %p5308_p1 = scmp.lt.s32.totalorder %s3939_s12, %s5306_s29 }
 0x84b   : > { %p5303_p7 = pnand %p5302_p6, %p5663_p5  ;;  %p5309_p2 = scmp.lt.s32.totalorder %s5307_s30, %s5301_s6 }
 0x84c   : > { %s4288_s28 = sshll.u32 %s7917_s11, 8 }
 0x84d   : > { %s3936_s7 = scalar_lea.hbm %s7919_s24, %s4288_s28  ;;  %p5304_p13 = pneg %p5303_p7 }
 0x84e   : > { %p5310_p8 = por %p5309_p2, %p5308_p1 }
 0x850   : > { %p5311_p11 = pnand %p5310_p8, %p5304_p13 }
 0x852   : > { %5314 = shalt.err (!%p5311_p11)
}
 0x853   : > { %s5315_s2 = scalar_lea.hbm %s3936_s7, 256  ;;  %s5319_s28 = scalar_lea.hbm %s7919_s24, 512 }
 0x854   : > { %p5316_p10 = scmp.ne.s32.totalorder %s3936_s7, %s5315_s2  ;;  %p5320_p9 = scmp.lt.s32.totalorder %s3936_s7, %s7919_s24 }
 0x855   : > { %p5321_p3 = scmp.lt.s32.totalorder %s5319_s28, %s5315_s2 }
 0x856   : > { %p5317_p0 = pnand %p5316_p10, %p5663_p5 }
 0x857   : > { %p5322_p6 = por %p5321_p3, %p5320_p9 }
 0x858   : > { %p5318_p4 = pneg %p5317_p0 }
 0x85a   : > { %p5323_p7 = pnand %p5322_p6, %p5318_p4 }
 0x85c   : > { %5326 = shalt.err (!%p5323_p7)
}
 0x85d   : > { %4639 = dma.vmem_to_hbm [thread:$0]  (%p5663_p5), %s3939_s12, 256, %s3936_s7, %s3919_s10  }
 0x85e   : > { %s4283_s16 = sshll.u32 %s7917_s11, 1  ;;  %s3953_s29 = sshll.u32 %s478_s8, 4  ;;  %s3954_s29 = int_to_ptr.vmem [resolvable:$true] %s3953_s29 }
 0x85f   : > { %s3949_s30 = sadd.s32 %s5447_s19, %s4283_s16  ;;  %s7921_s2 = sld [smem:[#allocation104_spill]] }
 0x860   : > { %s4284_s3 = sshll.u32 %s3949_s30, 7  ;;  %s3924_s27 = scalar_lea.sflag [#allocation17], %s418_s4 }
 0x861   : > { %s5327_s1 = scalar_lea.vmem %s3954_s29, 128  ;;  %s5478_s9 = smov [#allocation16]  }
 0x862   : > { %p5328_p13 = scmp.ne.s32.totalorder %s3954_s29, %s5327_s1  ;;  %s5331_s24 = sshll.u32 %s5478_s9, 4  ;;  %s5332_s24 = int_to_ptr.vmem [resolvable:$false] %s5331_s24 }
 0x863   : > { %s5333_s11 = scalar_lea.vmem %s5332_s24, 256  ;;  %p5334_p5 = scmp.lt.s32.totalorder %s3954_s29, %s5332_s24 }
 0x864   : > { %p5329_p1 = pnand %p5328_p13, %p5717_p12  ;;  %p5335_p8 = scmp.lt.s32.totalorder %s5333_s11, %s5327_s1 }
 0x865   : > { %s3951_s28 = scalar_lea.hbm %s7921_s2, %s4284_s3 }
 0x866   : > { %p5330_p2 = pneg %p5329_p1  ;;  %p5336_p11 = por %p5335_p8, %p5334_p5 }
 0x868   : > { %p5337_p10 = pnand %p5336_p11, %p5330_p2 }
 0x86a   : > { %5340 = shalt.err (!%p5337_p10)
}
 0x86b   : > { %s5341_s19 = scalar_lea.hbm %s3951_s28, 128  ;;  %s5345_s8 = scalar_lea.hbm %s7921_s2, 512 }
 0x86c   : > { %p5342_p0 = scmp.ne.s32.totalorder %s3951_s28, %s5341_s19  ;;  %p5346_p3 = scmp.lt.s32.totalorder %s3951_s28, %s7921_s2 }
 0x86d   : > { %p5347_p6 = scmp.lt.s32.totalorder %s5345_s8, %s5341_s19 }
 0x86e   : > { %p5343_p4 = pnand %p5342_p0, %p5717_p12 }
 0x86f   : > { %p5348_p7 = por %p5347_p6, %p5346_p3 }
 0x870   : > { %p5344_p9 = pneg %p5343_p4 }
 0x872   : > { %p5349_p13 = pnand %p5348_p7, %p5344_p9 }
 0x874   : > { %5352 = shalt.err (!%p5349_p13)
}
 0x875   : > { %4640 = dma.vmem_to_hbm [thread:$0]  (%p5717_p12), %s3954_s29, 128, %s3951_s28, %s3924_s27  }
 0x876 PF: > { %s7922_s1 = sld [smem:[#allocation25_spill]]  ;;  %p4674_p1 = scmp.ge.s32.totalorder %s5463_s23, 2 }
 0x877   : > { %s7923_s24 = sld [smem:[#allocation28_spill]] }
 0x87c   : > { %s3965_s10 = sand.u32 1, %s7922_s1  }
 0x87d   : > { %p7924_p2 = scmp.ne.s32.totalorder %s7923_s24, 0  ;;  %s3966_s16 = scalar_lea.sflag [#allocation8], %s3965_s10 }
 0x87f   : > { %p4661_p5 = pnand %p4674_p1, %p7924_p2 }
 0x881   : > { %p4662_p8 = pneg %p4661_p5 }
 0x883   : > { %5414 = dma.done.wait (%p4662_p8), %s3966_s16, 256  }
 0x884   : > { %5416 = vsyncadd (%p4662_p8), %s3966_s16, 4294967040  ;;  %s7925_s30 = sld [smem:[#allocation24_spill]] }
 0x885   : > { %s7926_s3 = sld [smem:[#allocation31_spill]] }
 0x88a   : > { %s3974_s26 = sand.u32 1, %s7925_s30  }
 0x88b   : > { %p7927_p11 = scmp.ne.s32.totalorder %s7926_s3, 0  ;;  %s3975_s6 = scalar_lea.sflag [#allocation17], %s3974_s26 }
 0x88d   : > { %p4664_p10 = pnand %p4674_p1, %p7927_p11 }
 0x88f   : > { %p4665_p0 = pneg %p4664_p10 }
 0x891   : > { %5418 = dma.done.wait (%p4665_p0), %s3975_s6, 128  }
 0x892   : > { %5420 = vsyncadd (%p4665_p0), %s3975_s6, 4294967168  ;;  %s34_s23 = sadd.s32 1, %s5463_s23   ;;  %s7928_s29 = smov %s5738_s13 }
 0x893   : > { %p31_p12 = scmp.ge.s32.totalorder %s34_s23, 6   ;;  %s7929_s0 = sld [smem:[#allocation29_spill]] }
 0x894   : > { %s7930_s28 = smov %s7946_s20  ;;  %s7931_s13 = smov %s5427_s14 }
 0x895   : > { %s7932_s14 = smov %s5431_s15  ;;  %s7933_s15 = smov %s7928_s29 }
 0x896   : > { %s7934_s16 = smov %s5439_s17  ;;  %s7935_s17 = smov %s5443_s18 }
 0x897   : > { %s7936_s18 = smov %s5735_s5  ;;  %s7937_s19 = smov %s5455_s21 }
 0x898   : > { %s7938_s20 = smov %s5459_s22  ;;  %s7940_s22 = smov %s7930_s28 }
 0x899   : > { %s7939_s21 = smov %s7929_s0  ;;  %33 = sbr.rel (!%p31_p12) target bundleno = 26 (0x1a), region = 151 }
 0x89e   :  { %3980 = vsyncpa [#allocation7], 1 }
 0x89f   :  { %3982 = vsyncpa [#allocation7 + $0x1], 1 }
 0x8a0   :  { %3983 = vsyncpa [#allocation10], 1 }
 0x8a1   :  { %3985 = vsyncpa [#allocation10 + $0x1], 1 }
 0x8a2   :  { %3986 = vsyncpa [#allocation13], 1 }
 0x8a3   :  { %3987 = vsyncpa [#allocation8], 1 }
 0x8a4   :  { %3989 = vsyncpa [#allocation8 + $0x1], 1 }
 0x8a5   :  { %3990 = vsyncpa [#allocation17], 1 }
 0x8a6   :  { %3992 = vsyncpa [#allocation17 + $0x1], 1 }

</bundles_post_ra>
